<compile_context>
chip_gen: v6e
topology: v6e:2x2x1
jax: 0.10.0
libtpu: 0.0.40
codegen_flags: <defaults>
</compile_context>

<pallas_src>
import jax
import jax.numpy as jnp
from jax import lax
from jax.experimental import pallas as pl
from jax.experimental.pallas import tpu as pltpu


def _round_up(n, m):
    return ((n + m - 1) // m) * m


def gru_kernel(gi_ref, whh_ref, bhn_ref, o_ref, h_ref):
    """Serial GRU recurrence over one (batch-block, time-chunk) tile.

    gi_ref : (Tc, Bb, 3*Hp)  precomputed x @ W_ih + folded bias (gates [r|z|n],
                             each gate in its own lane-aligned Hp column block)
    whh_ref: (Hp, 3*Hp)      hidden->hidden weights (f32 or bf16)
    bhn_ref: (1, Hp)         b_hh_n (must stay inside r * (.) per GRU semantics)
    o_ref  : (Tc, Bb, Hp)    output tile (lane-dense: Hp is a multiple of 128)
    h_ref  : (Bb, Hp)        VMEM scratch: hidden state carried across chunks
    """
    c = pl.program_id(1)                 # time-chunk index (sequential axis)
    Tc, Bb, _ = gi_ref.shape
    Hp = h_ref.shape[-1]

    @pl.when(c == 0)
    def _():
        h_ref[...] = jnp.zeros_like(h_ref)

    w_hh = whh_ref[...]                                    # hoisted out of loop
    b_hn = jnp.broadcast_to(bhn_ref[...], (Bb, Hp))        # hoisted broadcast

    # Full unroll for small Hp; partial unroll at large Hp to avoid vreg spills
    # of the (Bb, 3*Hp)-sized live values on the serial critical path.
    unroll = True if Hp < 512 else 2

    def step(t, h_prev):
        gi_t = gi_ref[t]                                           # (Bb, 3*Hp)
        gh = jnp.dot(h_prev.astype(w_hh.dtype), w_hh,
                     preferred_element_type=jnp.float32)
        # Gate slices are lane-aligned (offsets are multiples of 128).
        r = jax.nn.sigmoid(gi_t[:, 0:Hp] + gh[:, 0:Hp])
        z = jax.nn.sigmoid(gi_t[:, Hp:2 * Hp] + gh[:, Hp:2 * Hp])
        n = jnp.tanh(gi_t[:, 2 * Hp:] + r * (gh[:, 2 * Hp:] + b_hn))
        h_new = n + z * (h_prev - n)            # == (1 - z) * n + z * h_prev
        o_ref[t] = h_new.astype(o_ref.dtype)
        return h_new

    h_ref[...] = lax.fori_loop(0, Tc, step, h_ref[...], unroll=unroll)


def gru_forward(x, w_ih, w_hh, b_ih, b_hh, *, t_chunk=None, batch_block=8,
                weight_dtype=jnp.float32):
    """x: (T, B, D) f32.  w_ih: (D, 3H), w_hh: (H, 3H), biases: (3H,).

    Returns (T, B, H), matching torch.nn.GRU(D, H, 1)(x) with h0 = 0
    (gate order r, z, n).  `weight_dtype=jnp.bfloat16` halves weight VMEM and
    DMA bytes (recommended at large H, especially on v7x); all gate elementwise
    math stays f32.
    """
    T, B, D = x.shape
    H = w_hh.shape[0]

    Hp = _round_up(H, 128)                     # lane-align each gate block
    Bb = max(8, _round_up(batch_block, 8))     # per-core batch block (sublanes)
    Bp = _round_up(B, Bb)
    Tc = t_chunk if t_chunk is not None else min(T, 32)
    T_pad = _round_up(T, Tc)

    # Regroup/pad weights so each gate occupies its own Hp-wide, lane-aligned
    # column block: (rows, 3H) -> (rows_p, 3*Hp).  Zero padding keeps the
    # padded hidden lanes exactly zero for all timesteps.
    def pad_gate_cols(w, rows_p):
        rows = w.shape[0]
        wg = w.reshape(rows, 3, H)
        wg = jnp.pad(wg, ((0, rows_p - rows), (0, 0), (0, Hp - H)))
        return wg.reshape(rows_p, 3 * Hp)

    w_ih_p = pad_gate_cols(w_ih, D).astype(weight_dtype)      # (D, 3*Hp)
    w_hh_p = pad_gate_cols(w_hh, Hp).astype(weight_dtype)     # (Hp, 3*Hp)

    b_ih_g = b_ih.reshape(3, H)
    b_hh_g = b_hh.reshape(3, H)
    # Fold b_hh into b_ih for the r and z gates; b_hh_n must stay per-step.
    b_gi_g = jnp.stack(
        [b_ih_g[0] + b_hh_g[0], b_ih_g[1] + b_hh_g[1], b_ih_g[2]], axis=0)
    b_gi = jnp.pad(b_gi_g, ((0, 0), (0, Hp - H))).reshape(1, 3 * Hp)
    b_hn = jnp.pad(b_hh_g[2], (0, Hp - H)).reshape(1, Hp)

    x_p = jnp.pad(x.astype(jnp.float32),
                  ((0, T_pad - T), (0, Bp - B), (0, 0)))

    # Input projection hoisted OUT of the kernel: one big XLA matmul over all
    # T_pad*Bp rows (full MXU row utilization), off the recurrence critical
    # path.  f32 accumulation; padded lanes stay exactly zero.
    gi = jnp.dot(x_p.reshape(T_pad * Bp, D).astype(weight_dtype), w_ih_p,
                 preferred_element_type=jnp.float32)
    gi = (gi + b_gi).reshape(T_pad, Bp, 3 * Hp)

    # Explicit VMEM budget: gi/out tiles double-buffered, weights single
    # buffered (budgeted at 2x in case the fallback path is taken).
    w_isize = jnp.dtype(weight_dtype).itemsize
    footprint = (2 * Tc * Bb * 3 * Hp * 4       # gi blocks
                 + 2 * Tc * Bb * Hp * 4         # out blocks
                 + 2 * Hp * 3 * Hp * w_isize    # w_hh
                 + 2 * Hp * 4                   # b_hh_n
                 + Bb * Hp * 4)                 # carried hidden scratch
    vmem_limit = int(min(128 * 1024 * 1024,
                         max(32 * 1024 * 1024, 2 * footprint)))

    grid = (Bp // Bb, T_pad // Tc)   # (parallel batch blocks, sequential time)

    def call(single_buffer_weights):
        def const_spec(shape):
            # Constant-index weights/bias: single-buffer so they are resident
            # once in VMEM instead of twice (zero perf cost).
            if single_buffer_weights:
                return pl.BlockSpec(shape, lambda b, c: (0, 0),
                                    pipeline_mode=pl.Buffered(1))
            return pl.BlockSpec(shape, lambda b, c: (0, 0))

        return pl.pallas_call(
            gru_kernel,
            out_shape=jax.ShapeDtypeStruct((T_pad, Bp, Hp), jnp.float32),
            grid_spec=pltpu.PrefetchScalarGridSpec(
                num_scalar_prefetch=0,
                grid=grid,
                in_specs=[
                    pl.BlockSpec((Tc, Bb, 3 * Hp), lambda b, c: (c, b, 0)),
                    const_spec((Hp, 3 * Hp)),
                    const_spec((1, Hp)),
                ],
                out_specs=pl.BlockSpec((Tc, Bb, Hp), lambda b, c: (c, b, 0)),
                scratch_shapes=[
                    pltpu.VMEM((Bb, Hp), jnp.float32),  # carried hidden state
                ],
            ),
            compiler_params=pltpu.CompilerParams(
                # Batch blocks are independent recurrences -> "parallel"
                # (split across v7x's two TensorCores, each with its own h
                # scratch); the time axis is the sequential recurrence.
                dimension_semantics=("parallel", "arbitrary"),
                vmem_limit_bytes=vmem_limit,
            ),
        )(gi, w_hh_p, b_hn)

    try:
        out = call(single_buffer_weights=True)
    except Exception:
        # Fallback for jax builds without BlockSpec(pipeline_mode=...);
        # identical numerics, weights merely double-buffered in VMEM.
        out = call(single_buffer_weights=False)

    if T_pad == T and Bp == B and Hp == H:
        return out          # skip the trim copy when no padding was needed
    # NOTE: callers that tolerate padded outputs can skip this HBM copy.
    return out[:T, :B, :H]


def gru_reference(x, w_ih, w_hh, b_ih, b_hh):
    """Pure-JAX reference matching torch.nn.GRU semantics (gate order r,z,n)."""
    T, B, D = x.shape
    H = w_hh.shape[0]

    def step(h_prev, x_t):
        gi = x_t @ w_ih + b_ih
        gh = h_prev @ w_hh + b_hh
        i_r, i_z, i_n = gi[:, :H], gi[:, H:2 * H], gi[:, 2 * H:]
        h_r, h_z, h_n = gh[:, :H], gh[:, H:2 * H], gh[:, 2 * H:]
        r = jax.nn.sigmoid(i_r + h_r)
        z = jax.nn.sigmoid(i_z + h_z)
        n = jnp.tanh(i_n + r * h_n)
        h_new = (1.0 - z) * n + z * h_prev
        return h_new, h_new

    h0 = jnp.zeros((B, H), jnp.float32)
    _, ys = lax.scan(step, h0, x)
    return ys


if __name__ == "__main__":
    # Small shapes consistent with the module: (seq, batch, embedding_dim).
    T, B, D, H = 8, 2, 32, 32

    key = jax.random.PRNGKey(0)
    kx, k1, k2, k3, k4 = jax.random.split(key, 5)

    # Deterministic parameter init (PyTorch GRU uses U(-1/sqrt(H), 1/sqrt(H))).
    scale = 1.0 / jnp.sqrt(jnp.float32(H))
    x = jax.random.normal(kx, (T, B, D), jnp.float32)
    # Stored already transposed for x @ W style matmuls: (D, 3H) / (H, 3H).
    w_ih = jax.random.uniform(k1, (D, 3 * H), jnp.float32, -scale, scale)
    w_hh = jax.random.uniform(k2, (H, 3 * H), jnp.float32, -scale, scale)
    b_ih = jax.random.uniform(k3, (3 * H,), jnp.float32, -scale, scale)
    b_hh = jax.random.uniform(k4, (3 * H,), jnp.float32, -scale, scale)

    ref = gru_reference(x, w_ih, w_hh, b_ih, b_hh)

    # f32 weights: tight tolerance.
    out = jax.block_until_ready(gru_forward(x, w_ih, w_hh, b_ih, b_hh))
    assert out.shape == (T, B, H)
    assert jnp.allclose(out, ref, atol=1e-4, rtol=1e-4), "f32 mismatch vs ref"

    # bf16 weights (halves weight VMEM/DMA; gate math stays f32): sanity check.
    out_bf16 = jax.block_until_ready(
        gru_forward(x, w_ih, w_hh, b_ih, b_hh, weight_dtype=jnp.bfloat16))
    assert out_bf16.shape == (T, B, H)
    assert jnp.allclose(out_bf16, ref, atol=5e-2, rtol=5e-2), "bf16 mismatch"

    print("KERNEL_OK")
</pallas_src>

<mosaic_0001>
module attributes {stable_mosaic.version = 11 : i64} {
  func.func @gru_kernel(%arg0: i32, %arg1: i32, %arg2: memref<8x8x384xf32, #tpu.memory_space<vmem>>, %arg3: memref<128x384xf32, #tpu.memory_space<vmem>>, %arg4: memref<1x128xf32, #tpu.memory_space<vmem>>, %arg5: memref<8x8x128xf32, #tpu.memory_space<vmem>>, %arg6: memref<8x128xf32, #tpu.memory_space<vmem>>) attributes {dimension_semantics = [#tpu.dimension_semantics<parallel>, #tpu.dimension_semantics<arbitrary>], iteration_bounds = array<i64: 1, 1>, scalar_prefetch = 0 : i64, scratch_operands = 1 : i64, tpu.core_type = #tpu.core_type<tc>, window_params = [{transform_indices = @transform_0, window_bounds = array<i64: 8, 8, 384>}, {pipeline_mode = #tpu.pipeline_mode<synchronous>, transform_indices = @transform_1, window_bounds = array<i64: 128, 384>}, {pipeline_mode = #tpu.pipeline_mode<synchronous>, transform_indices = @transform_2, window_bounds = array<i64: 1, 128>}, {transform_indices = @transform_3, window_bounds = array<i64: 8, 8, 128>}]} {
    %c0_i32 = arith.constant 0 : i32
    %0 = arith.cmpi eq, %arg1, %c0_i32 : i32
    %1 = arith.extui %0 : i1 to i32
    %c0_i32_0 = arith.constant 0 : i32
    %2 = arith.cmpi ne, %1, %c0_i32_0 : i32
    scf.if %2 {
      %cst_64 = arith.constant 0.000000e+00 : f32
      %273 = vector.broadcast %cst_64 : f32 to vector<8x128xf32>
      %c0_65 = arith.constant 0 : index
      %c0_66 = arith.constant 0 : index
      %274 = vector.load %arg6[%c0_65, %c0_66] : memref<8x128xf32, #tpu.memory_space<vmem>>, vector<8x128xf32>
      tpu.vector_store %arg6[%c0_65, %c0_66], %273 {strides = array<i32>} : memref<8x128xf32, #tpu.memory_space<vmem>>, vector<8x128xf32>,
    } else {
    }
    %c0 = arith.constant 0 : index
    %c0_1 = arith.constant 0 : index
    %3 = vector.load %arg3[%c0, %c0_1] : memref<128x384xf32, #tpu.memory_space<vmem>>, vector<128x384xf32>
    %c0_2 = arith.constant 0 : index
    %c0_3 = arith.constant 0 : index
    %4 = vector.load %arg4[%c0_2, %c0_3] : memref<1x128xf32, #tpu.memory_space<vmem>>, vector<1x128xf32>
    %5 = vector.shape_cast %4 : vector<1x128xf32> to vector<1x128xf32>
    %6 = vector.broadcast %5 : vector<1x128xf32> to vector<8x128xf32>
    %c0_4 = arith.constant 0 : index
    %c0_5 = arith.constant 0 : index
    %7 = vector.load %arg6[%c0_4, %c0_5] : memref<8x128xf32, #tpu.memory_space<vmem>>, vector<8x128xf32>
    %c0_i32_6 = arith.constant 0 : i32
    %8 = arith.index_cast %c0_i32_6 : i32 to index
    %c0_7 = arith.constant 0 : index
    %c0_8 = arith.constant 0 : index
    %9 = vector.load %arg2[%8, %c0_7, %c0_8] : memref<8x8x384xf32, #tpu.memory_space<vmem>>, vector<1x8x384xf32>
    %10 = vector.shape_cast %9 : vector<1x8x384xf32> to vector<8x384xf32>
    %cst = arith.constant dense<0.000000e+00> : vector<8x384xf32>
    %11 = tpu.matmul %7, %3, %cst {dimension_numbers = #tpu.dot_dimension_numbers<[1], [0], [0], [1], [0, 0, 1, 1], [], []>} : vector<8x128xf32>, vector<128x384xf32>, vector<8x384xf32> -> vector<8x384xf32>
    %12 = vector.extract_strided_slice %10 {offsets = [0, 0], sizes = [8, 128], strides = [1, 1]} : vector<8x384xf32> to vector<8x128xf32>
    %13 = vector.extract_strided_slice %11 {offsets = [0, 0], sizes = [8, 128], strides = [1, 1]} : vector<8x384xf32> to vector<8x128xf32>
    %14 = arith.addf %12, %13 : vector<8x128xf32>
    %15 = arith.negf %14 : vector<8x128xf32>
    %16 = math.exp %15 : vector<8x128xf32>
    %cst_9 = arith.constant 1.000000e+00 : f32
    %17 = vector.broadcast %cst_9 : f32 to vector<8x128xf32>
    %18 = arith.addf %17, %16 : vector<8x128xf32>
    %19 = arith.divf %17, %18 : vector<8x128xf32>
    %20 = vector.extract_strided_slice %10 {offsets = [0, 128], sizes = [8, 128], strides = [1, 1]} : vector<8x384xf32> to vector<8x128xf32>
    %21 = vector.extract_strided_slice %11 {offsets = [0, 128], sizes = [8, 128], strides = [1, 1]} : vector<8x384xf32> to vector<8x128xf32>
    %22 = arith.addf %20, %21 : vector<8x128xf32>
    %23 = arith.negf %22 : vector<8x128xf32>
    %24 = math.exp %23 : vector<8x128xf32>
    %cst_10 = arith.constant 1.000000e+00 : f32
    %25 = vector.broadcast %cst_10 : f32 to vector<8x128xf32>
    %26 = arith.addf %25, %24 : vector<8x128xf32>
    %27 = arith.divf %25, %26 : vector<8x128xf32>
    %28 = vector.extract_strided_slice %10 {offsets = [0, 256], sizes = [8, 128], strides = [1, 1]} : vector<8x384xf32> to vector<8x128xf32>
    %29 = vector.extract_strided_slice %11 {offsets = [0, 256], sizes = [8, 128], strides = [1, 1]} : vector<8x384xf32> to vector<8x128xf32>
    %30 = arith.addf %29, %6 : vector<8x128xf32>
    %31 = arith.mulf %19, %30 : vector<8x128xf32>
    %32 = arith.addf %28, %31 : vector<8x128xf32>
    %33 = math.tanh %32 : vector<8x128xf32>
    %34 = arith.subf %7, %33 : vector<8x128xf32>
    %35 = arith.mulf %27, %34 : vector<8x128xf32>
    %36 = arith.addf %33, %35 : vector<8x128xf32>
    %37 = arith.index_cast %c0_i32_6 : i32 to index
    %c0_11 = arith.constant 0 : index
    %c0_12 = arith.constant 0 : index
    %38 = vector.load %arg5[%37, %c0_11, %c0_12] : memref<8x8x128xf32, #tpu.memory_space<vmem>>, vector<1x8x128xf32>
    %39 = vector.shape_cast %38 : vector<1x8x128xf32> to vector<8x128xf32>
    %40 = vector.shape_cast %36 : vector<8x128xf32> to vector<1x8x128xf32>
    tpu.vector_store %arg5[%37, %c0_11, %c0_12], %40 {strides = array<i32>} : memref<8x8x128xf32, #tpu.memory_space<vmem>>, vector<1x8x128xf32>,
    %c1_i32 = arith.constant 1 : i32
    %41 = arith.index_cast %c1_i32 : i32 to index
    %c0_13 = arith.constant 0 : index
    %c0_14 = arith.constant 0 : index
    %42 = vector.load %arg2[%41, %c0_13, %c0_14] : memref<8x8x384xf32, #tpu.memory_space<vmem>>, vector<1x8x384xf32>
    %43 = vector.shape_cast %42 : vector<1x8x384xf32> to vector<8x384xf32>
    %cst_15 = arith.constant dense<0.000000e+00> : vector<8x384xf32>
    %44 = tpu.matmul %36, %3, %cst_15 {dimension_numbers = #tpu.dot_dimension_numbers<[1], [0], [0], [1], [0, 0, 1, 1], [], []>} : vector<8x128xf32>, vector<128x384xf32>, vector<8x384xf32> -> vector<8x384xf32>
    %45 = vector.extract_strided_slice %43 {offsets = [0, 0], sizes = [8, 128], strides = [1, 1]} : vector<8x384xf32> to vector<8x128xf32>
    %46 = vector.extract_strided_slice %44 {offsets = [0, 0], sizes = [8, 128], strides = [1, 1]} : vector<8x384xf32> to vector<8x128xf32>
    %47 = arith.addf %45, %46 : vector<8x128xf32>
    %48 = arith.negf %47 : vector<8x128xf32>
    %49 = math.exp %48 : vector<8x128xf32>
    %cst_16 = arith.constant 1.000000e+00 : f32
    %50 = vector.broadcast %cst_16 : f32 to vector<8x128xf32>
    %51 = arith.addf %50, %49 : vector<8x128xf32>
    %52 = arith.divf %50, %51 : vector<8x128xf32>
    %53 = vector.extract_strided_slice %43 {offsets = [0, 128], sizes = [8, 128], strides = [1, 1]} : vector<8x384xf32> to vector<8x128xf32>
    %54 = vector.extract_strided_slice %44 {offsets = [0, 128], sizes = [8, 128], strides = [1, 1]} : vector<8x384xf32> to vector<8x128xf32>
    %55 = arith.addf %53, %54 : vector<8x128xf32>
    %56 = arith.negf %55 : vector<8x128xf32>
    %57 = math.exp %56 : vector<8x128xf32>
    %cst_17 = arith.constant 1.000000e+00 : f32
    %58 = vector.broadcast %cst_17 : f32 to vector<8x128xf32>
    %59 = arith.addf %58, %57 : vector<8x128xf32>
    %60 = arith.divf %58, %59 : vector<8x128xf32>
    %61 = vector.extract_strided_slice %43 {offsets = [0, 256], sizes = [8, 128], strides = [1, 1]} : vector<8x384xf32> to vector<8x128xf32>
    %62 = vector.extract_strided_slice %44 {offsets = [0, 256], sizes = [8, 128], strides = [1, 1]} : vector<8x384xf32> to vector<8x128xf32>
    %63 = arith.addf %62, %6 : vector<8x128xf32>
    %64 = arith.mulf %52, %63 : vector<8x128xf32>
    %65 = arith.addf %61, %64 : vector<8x128xf32>
    %66 = math.tanh %65 : vector<8x128xf32>
    %67 = arith.subf %36, %66 : vector<8x128xf32>
    %68 = arith.mulf %60, %67 : vector<8x128xf32>
    %69 = arith.addf %66, %68 : vector<8x128xf32>
    %70 = arith.index_cast %c1_i32 : i32 to index
    %c0_18 = arith.constant 0 : index
    %c0_19 = arith.constant 0 : index
    %71 = vector.load %arg5[%70, %c0_18, %c0_19] : memref<8x8x128xf32, #tpu.memory_space<vmem>>, vector<1x8x128xf32>
    %72 = vector.shape_cast %71 : vector<1x8x128xf32> to vector<8x128xf32>
    %73 = vector.shape_cast %69 : vector<8x128xf32> to vector<1x8x128xf32>
    tpu.vector_store %arg5[%70, %c0_18, %c0_19], %73 {strides = array<i32>} : memref<8x8x128xf32, #tpu.memory_space<vmem>>, vector<1x8x128xf32>,
    %c2_i32 = arith.constant 2 : i32
    %74 = arith.index_cast %c2_i32 : i32 to index
    %c0_20 = arith.constant 0 : index
    %c0_21 = arith.constant 0 : index
    %75 = vector.load %arg2[%74, %c0_20, %c0_21] : memref<8x8x384xf32, #tpu.memory_space<vmem>>, vector<1x8x384xf32>
    %76 = vector.shape_cast %75 : vector<1x8x384xf32> to vector<8x384xf32>
    %cst_22 = arith.constant dense<0.000000e+00> : vector<8x384xf32>
    %77 = tpu.matmul %69, %3, %cst_22 {dimension_numbers = #tpu.dot_dimension_numbers<[1], [0], [0], [1], [0, 0, 1, 1], [], []>} : vector<8x128xf32>, vector<128x384xf32>, vector<8x384xf32> -> vector<8x384xf32>
    %78 = vector.extract_strided_slice %76 {offsets = [0, 0], sizes = [8, 128], strides = [1, 1]} : vector<8x384xf32> to vector<8x128xf32>
    %79 = vector.extract_strided_slice %77 {offsets = [0, 0], sizes = [8, 128], strides = [1, 1]} : vector<8x384xf32> to vector<8x128xf32>
    %80 = arith.addf %78, %79 : vector<8x128xf32>
    %81 = arith.negf %80 : vector<8x128xf32>
    %82 = math.exp %81 : vector<8x128xf32>
    %cst_23 = arith.constant 1.000000e+00 : f32
    %83 = vector.broadcast %cst_23 : f32 to vector<8x128xf32>
    %84 = arith.addf %83, %82 : vector<8x128xf32>
    %85 = arith.divf %83, %84 : vector<8x128xf32>
    %86 = vector.extract_strided_slice %76 {offsets = [0, 128], sizes = [8, 128], strides = [1, 1]} : vector<8x384xf32> to vector<8x128xf32>
    %87 = vector.extract_strided_slice %77 {offsets = [0, 128], sizes = [8, 128], strides = [1, 1]} : vector<8x384xf32> to vector<8x128xf32>
    %88 = arith.addf %86, %87 : vector<8x128xf32>
    %89 = arith.negf %88 : vector<8x128xf32>
    %90 = math.exp %89 : vector<8x128xf32>
    %cst_24 = arith.constant 1.000000e+00 : f32
    %91 = vector.broadcast %cst_24 : f32 to vector<8x128xf32>
    %92 = arith.addf %91, %90 : vector<8x128xf32>
    %93 = arith.divf %91, %92 : vector<8x128xf32>
    %94 = vector.extract_strided_slice %76 {offsets = [0, 256], sizes = [8, 128], strides = [1, 1]} : vector<8x384xf32> to vector<8x128xf32>
    %95 = vector.extract_strided_slice %77 {offsets = [0, 256], sizes = [8, 128], strides = [1, 1]} : vector<8x384xf32> to vector<8x128xf32>
    %96 = arith.addf %95, %6 : vector<8x128xf32>
    %97 = arith.mulf %85, %96 : vector<8x128xf32>
    %98 = arith.addf %94, %97 : vector<8x128xf32>
    %99 = math.tanh %98 : vector<8x128xf32>
    %100 = arith.subf %69, %99 : vector<8x128xf32>
    %101 = arith.mulf %93, %100 : vector<8x128xf32>
    %102 = arith.addf %99, %101 : vector<8x128xf32>
    %103 = arith.index_cast %c2_i32 : i32 to index
    %c0_25 = arith.constant 0 : index
    %c0_26 = arith.constant 0 : index
    %104 = vector.load %arg5[%103, %c0_25, %c0_26] : memref<8x8x128xf32, #tpu.memory_space<vmem>>, vector<1x8x128xf32>
    %105 = vector.shape_cast %104 : vector<1x8x128xf32> to vector<8x128xf32>
    %106 = vector.shape_cast %102 : vector<8x128xf32> to vector<1x8x128xf32>
    tpu.vector_store %arg5[%103, %c0_25, %c0_26], %106 {strides = array<i32>} : memref<8x8x128xf32, #tpu.memory_space<vmem>>, vector<1x8x128xf32>,
    %c3_i32 = arith.constant 3 : i32
    %107 = arith.index_cast %c3_i32 : i32 to index
    %c0_27 = arith.constant 0 : index
    %c0_28 = arith.constant 0 : index
    %108 = vector.load %arg2[%107, %c0_27, %c0_28] : memref<8x8x384xf32, #tpu.memory_space<vmem>>, vector<1x8x384xf32>
    %109 = vector.shape_cast %108 : vector<1x8x384xf32> to vector<8x384xf32>
    %cst_29 = arith.constant dense<0.000000e+00> : vector<8x384xf32>
    %110 = tpu.matmul %102, %3, %cst_29 {dimension_numbers = #tpu.dot_dimension_numbers<[1], [0], [0], [1], [0, 0, 1, 1], [], []>} : vector<8x128xf32>, vector<128x384xf32>, vector<8x384xf32> -> vector<8x384xf32>
    %111 = vector.extract_strided_slice %109 {offsets = [0, 0], sizes = [8, 128], strides = [1, 1]} : vector<8x384xf32> to vector<8x128xf32>
    %112 = vector.extract_strided_slice %110 {offsets = [0, 0], sizes = [8, 128], strides = [1, 1]} : vector<8x384xf32> to vector<8x128xf32>
    %113 = arith.addf %111, %112 : vector<8x128xf32>
    %114 = arith.negf %113 : vector<8x128xf32>
    %115 = math.exp %114 : vector<8x128xf32>
    %cst_30 = arith.constant 1.000000e+00 : f32
    %116 = vector.broadcast %cst_30 : f32 to vector<8x128xf32>
    %117 = arith.addf %116, %115 : vector<8x128xf32>
    %118 = arith.divf %116, %117 : vector<8x128xf32>
    %119 = vector.extract_strided_slice %109 {offsets = [0, 128], sizes = [8, 128], strides = [1, 1]} : vector<8x384xf32> to vector<8x128xf32>
    %120 = vector.extract_strided_slice %110 {offsets = [0, 128], sizes = [8, 128], strides = [1, 1]} : vector<8x384xf32> to vector<8x128xf32>
    %121 = arith.addf %119, %120 : vector<8x128xf32>
    %122 = arith.negf %121 : vector<8x128xf32>
    %123 = math.exp %122 : vector<8x128xf32>
    %cst_31 = arith.constant 1.000000e+00 : f32
    %124 = vector.broadcast %cst_31 : f32 to vector<8x128xf32>
    %125 = arith.addf %124, %123 : vector<8x128xf32>
    %126 = arith.divf %124, %125 : vector<8x128xf32>
    %127 = vector.extract_strided_slice %109 {offsets = [0, 256], sizes = [8, 128], strides = [1, 1]} : vector<8x384xf32> to vector<8x128xf32>
    %128 = vector.extract_strided_slice %110 {offsets = [0, 256], sizes = [8, 128], strides = [1, 1]} : vector<8x384xf32> to vector<8x128xf32>
    %129 = arith.addf %128, %6 : vector<8x128xf32>
    %130 = arith.mulf %118, %129 : vector<8x128xf32>
    %131 = arith.addf %127, %130 : vector<8x128xf32>
    %132 = math.tanh %131 : vector<8x128xf32>
    %133 = arith.subf %102, %132 : vector<8x128xf32>
    %134 = arith.mulf %126, %133 : vector<8x128xf32>
    %135 = arith.addf %132, %134 : vector<8x128xf32>
    %136 = arith.index_cast %c3_i32 : i32 to index
    %c0_32 = arith.constant 0 : index
    %c0_33 = arith.constant 0 : index
    %137 = vector.load %arg5[%136, %c0_32, %c0_33] : memref<8x8x128xf32, #tpu.memory_space<vmem>>, vector<1x8x128xf32>
    %138 = vector.shape_cast %137 : vector<1x8x128xf32> to vector<8x128xf32>
    %139 = vector.shape_cast %135 : vector<8x128xf32> to vector<1x8x128xf32>
    tpu.vector_store %arg5[%136, %c0_32, %c0_33], %139 {strides = array<i32>} : memref<8x8x128xf32, #tpu.memory_space<vmem>>, vector<1x8x128xf32>,
    %c4_i32 = arith.constant 4 : i32
    %140 = arith.index_cast %c4_i32 : i32 to index
    %c0_34 = arith.constant 0 : index
    %c0_35 = arith.constant 0 : index
    %141 = vector.load %arg2[%140, %c0_34, %c0_35] : memref<8x8x384xf32, #tpu.memory_space<vmem>>, vector<1x8x384xf32>
    %142 = vector.shape_cast %141 : vector<1x8x384xf32> to vector<8x384xf32>
    %cst_36 = arith.constant dense<0.000000e+00> : vector<8x384xf32>
    %143 = tpu.matmul %135, %3, %cst_36 {dimension_numbers = #tpu.dot_dimension_numbers<[1], [0], [0], [1], [0, 0, 1, 1], [], []>} : vector<8x128xf32>, vector<128x384xf32>, vector<8x384xf32> -> vector<8x384xf32>
    %144 = vector.extract_strided_slice %142 {offsets = [0, 0], sizes = [8, 128], strides = [1, 1]} : vector<8x384xf32> to vector<8x128xf32>
    %145 = vector.extract_strided_slice %143 {offsets = [0, 0], sizes = [8, 128], strides = [1, 1]} : vector<8x384xf32> to vector<8x128xf32>
    %146 = arith.addf %144, %145 : vector<8x128xf32>
    %147 = arith.negf %146 : vector<8x128xf32>
    %148 = math.exp %147 : vector<8x128xf32>
    %cst_37 = arith.constant 1.000000e+00 : f32
    %149 = vector.broadcast %cst_37 : f32 to vector<8x128xf32>
    %150 = arith.addf %149, %148 : vector<8x128xf32>
    %151 = arith.divf %149, %150 : vector<8x128xf32>
    %152 = vector.extract_strided_slice %142 {offsets = [0, 128], sizes = [8, 128], strides = [1, 1]} : vector<8x384xf32> to vector<8x128xf32>
    %153 = vector.extract_strided_slice %143 {offsets = [0, 128], sizes = [8, 128], strides = [1, 1]} : vector<8x384xf32> to vector<8x128xf32>
    %154 = arith.addf %152, %153 : vector<8x128xf32>
    %155 = arith.negf %154 : vector<8x128xf32>
    %156 = math.exp %155 : vector<8x128xf32>
    %cst_38 = arith.constant 1.000000e+00 : f32
    %157 = vector.broadcast %cst_38 : f32 to vector<8x128xf32>
    %158 = arith.addf %157, %156 : vector<8x128xf32>
    %159 = arith.divf %157, %158 : vector<8x128xf32>
    %160 = vector.extract_strided_slice %142 {offsets = [0, 256], sizes = [8, 128], strides = [1, 1]} : vector<8x384xf32> to vector<8x128xf32>
    %161 = vector.extract_strided_slice %143 {offsets = [0, 256], sizes = [8, 128], strides = [1, 1]} : vector<8x384xf32> to vector<8x128xf32>
    %162 = arith.addf %161, %6 : vector<8x128xf32>
    %163 = arith.mulf %151, %162 : vector<8x128xf32>
    %164 = arith.addf %160, %163 : vector<8x128xf32>
    %165 = math.tanh %164 : vector<8x128xf32>
    %166 = arith.subf %135, %165 : vector<8x128xf32>
    %167 = arith.mulf %159, %166 : vector<8x128xf32>
    %168 = arith.addf %165, %167 : vector<8x128xf32>
    %169 = arith.index_cast %c4_i32 : i32 to index
    %c0_39 = arith.constant 0 : index
    %c0_40 = arith.constant 0 : index
    %170 = vector.load %arg5[%169, %c0_39, %c0_40] : memref<8x8x128xf32, #tpu.memory_space<vmem>>, vector<1x8x128xf32>
    %171 = vector.shape_cast %170 : vector<1x8x128xf32> to vector<8x128xf32>
    %172 = vector.shape_cast %168 : vector<8x128xf32> to vector<1x8x128xf32>
    tpu.vector_store %arg5[%169, %c0_39, %c0_40], %172 {strides = array<i32>} : memref<8x8x128xf32, #tpu.memory_space<vmem>>, vector<1x8x128xf32>,
    %c5_i32 = arith.constant 5 : i32
    %173 = arith.index_cast %c5_i32 : i32 to index
    %c0_41 = arith.constant 0 : index
    %c0_42 = arith.constant 0 : index
    %174 = vector.load %arg2[%173, %c0_41, %c0_42] : memref<8x8x384xf32, #tpu.memory_space<vmem>>, vector<1x8x384xf32>
    %175 = vector.shape_cast %174 : vector<1x8x384xf32> to vector<8x384xf32>
    %cst_43 = arith.constant dense<0.000000e+00> : vector<8x384xf32>
    %176 = tpu.matmul %168, %3, %cst_43 {dimension_numbers = #tpu.dot_dimension_numbers<[1], [0], [0], [1], [0, 0, 1, 1], [], []>} : vector<8x128xf32>, vector<128x384xf32>, vector<8x384xf32> -> vector<8x384xf32>
    %177 = vector.extract_strided_slice %175 {offsets = [0, 0], sizes = [8, 128], strides = [1, 1]} : vector<8x384xf32> to vector<8x128xf32>
    %178 = vector.extract_strided_slice %176 {offsets = [0, 0], sizes = [8, 128], strides = [1, 1]} : vector<8x384xf32> to vector<8x128xf32>
    %179 = arith.addf %177, %178 : vector<8x128xf32>
    %180 = arith.negf %179 : vector<8x128xf32>
    %181 = math.exp %180 : vector<8x128xf32>
    %cst_44 = arith.constant 1.000000e+00 : f32
    %182 = vector.broadcast %cst_44 : f32 to vector<8x128xf32>
    %183 = arith.addf %182, %181 : vector<8x128xf32>
    %184 = arith.divf %182, %183 : vector<8x128xf32>
    %185 = vector.extract_strided_slice %175 {offsets = [0, 128], sizes = [8, 128], strides = [1, 1]} : vector<8x384xf32> to vector<8x128xf32>
    %186 = vector.extract_strided_slice %176 {offsets = [0, 128], sizes = [8, 128], strides = [1, 1]} : vector<8x384xf32> to vector<8x128xf32>
    %187 = arith.addf %185, %186 : vector<8x128xf32>
    %188 = arith.negf %187 : vector<8x128xf32>
    %189 = math.exp %188 : vector<8x128xf32>
    %cst_45 = arith.constant 1.000000e+00 : f32
    %190 = vector.broadcast %cst_45 : f32 to vector<8x128xf32>
    %191 = arith.addf %190, %189 : vector<8x128xf32>
    %192 = arith.divf %190, %191 : vector<8x128xf32>
    %193 = vector.extract_strided_slice %175 {offsets = [0, 256], sizes = [8, 128], strides = [1, 1]} : vector<8x384xf32> to vector<8x128xf32>
    %194 = vector.extract_strided_slice %176 {offsets = [0, 256], sizes = [8, 128], strides = [1, 1]} : vector<8x384xf32> to vector<8x128xf32>
    %195 = arith.addf %194, %6 : vector<8x128xf32>
    %196 = arith.mulf %184, %195 : vector<8x128xf32>
    %197 = arith.addf %193, %196 : vector<8x128xf32>
    %198 = math.tanh %197 : vector<8x128xf32>
    %199 = arith.subf %168, %198 : vector<8x128xf32>
    %200 = arith.mulf %192, %199 : vector<8x128xf32>
    %201 = arith.addf %198, %200 : vector<8x128xf32>
    %202 = arith.index_cast %c5_i32 : i32 to index
    %c0_46 = arith.constant 0 : index
    %c0_47 = arith.constant 0 : index
    %203 = vector.load %arg5[%202, %c0_46, %c0_47] : memref<8x8x128xf32, #tpu.memory_space<vmem>>, vector<1x8x128xf32>
    %204 = vector.shape_cast %203 : vector<1x8x128xf32> to vector<8x128xf32>
    %205 = vector.shape_cast %201 : vector<8x128xf32> to vector<1x8x128xf32>
    tpu.vector_store %arg5[%202, %c0_46, %c0_47], %205 {strides = array<i32>} : memref<8x8x128xf32, #tpu.memory_space<vmem>>, vector<1x8x128xf32>,
    %c6_i32 = arith.constant 6 : i32
    %206 = arith.index_cast %c6_i32 : i32 to index
    %c0_48 = arith.constant 0 : index
    %c0_49 = arith.constant 0 : index
    %207 = vector.load %arg2[%206, %c0_48, %c0_49] : memref<8x8x384xf32, #tpu.memory_space<vmem>>, vector<1x8x384xf32>
    %208 = vector.shape_cast %207 : vector<1x8x384xf32> to vector<8x384xf32>
    %cst_50 = arith.constant dense<0.000000e+00> : vector<8x384xf32>
    %209 = tpu.matmul %201, %3, %cst_50 {dimension_numbers = #tpu.dot_dimension_numbers<[1], [0], [0], [1], [0, 0, 1, 1], [], []>} : vector<8x128xf32>, vector<128x384xf32>, vector<8x384xf32> -> vector<8x384xf32>
    %210 = vector.extract_strided_slice %208 {offsets = [0, 0], sizes = [8, 128], strides = [1, 1]} : vector<8x384xf32> to vector<8x128xf32>
    %211 = vector.extract_strided_slice %209 {offsets = [0, 0], sizes = [8, 128], strides = [1, 1]} : vector<8x384xf32> to vector<8x128xf32>
    %212 = arith.addf %210, %211 : vector<8x128xf32>
    %213 = arith.negf %212 : vector<8x128xf32>
    %214 = math.exp %213 : vector<8x128xf32>
    %cst_51 = arith.constant 1.000000e+00 : f32
    %215 = vector.broadcast %cst_51 : f32 to vector<8x128xf32>
    %216 = arith.addf %215, %214 : vector<8x128xf32>
    %217 = arith.divf %215, %216 : vector<8x128xf32>
    %218 = vector.extract_strided_slice %208 {offsets = [0, 128], sizes = [8, 128], strides = [1, 1]} : vector<8x384xf32> to vector<8x128xf32>
    %219 = vector.extract_strided_slice %209 {offsets = [0, 128], sizes = [8, 128], strides = [1, 1]} : vector<8x384xf32> to vector<8x128xf32>
    %220 = arith.addf %218, %219 : vector<8x128xf32>
    %221 = arith.negf %220 : vector<8x128xf32>
    %222 = math.exp %221 : vector<8x128xf32>
    %cst_52 = arith.constant 1.000000e+00 : f32
    %223 = vector.broadcast %cst_52 : f32 to vector<8x128xf32>
    %224 = arith.addf %223, %222 : vector<8x128xf32>
    %225 = arith.divf %223, %224 : vector<8x128xf32>
    %226 = vector.extract_strided_slice %208 {offsets = [0, 256], sizes = [8, 128], strides = [1, 1]} : vector<8x384xf32> to vector<8x128xf32>
    %227 = vector.extract_strided_slice %209 {offsets = [0, 256], sizes = [8, 128], strides = [1, 1]} : vector<8x384xf32> to vector<8x128xf32>
    %228 = arith.addf %227, %6 : vector<8x128xf32>
    %229 = arith.mulf %217, %228 : vector<8x128xf32>
    %230 = arith.addf %226, %229 : vector<8x128xf32>
    %231 = math.tanh %230 : vector<8x128xf32>
    %232 = arith.subf %201, %231 : vector<8x128xf32>
    %233 = arith.mulf %225, %232 : vector<8x128xf32>
    %234 = arith.addf %231, %233 : vector<8x128xf32>
    %235 = arith.index_cast %c6_i32 : i32 to index
    %c0_53 = arith.constant 0 : index
    %c0_54 = arith.constant 0 : index
    %236 = vector.load %arg5[%235, %c0_53, %c0_54] : memref<8x8x128xf32, #tpu.memory_space<vmem>>, vector<1x8x128xf32>
    %237 = vector.shape_cast %236 : vector<1x8x128xf32> to vector<8x128xf32>
    %238 = vector.shape_cast %234 : vector<8x128xf32> to vector<1x8x128xf32>
    tpu.vector_store %arg5[%235, %c0_53, %c0_54], %238 {strides = array<i32>} : memref<8x8x128xf32, #tpu.memory_space<vmem>>, vector<1x8x128xf32>,
    %c7_i32 = arith.constant 7 : i32
    %239 = arith.index_cast %c7_i32 : i32 to index
    %c0_55 = arith.constant 0 : index
    %c0_56 = arith.constant 0 : index
    %240 = vector.load %arg2[%239, %c0_55, %c0_56] : memref<8x8x384xf32, #tpu.memory_space<vmem>>, vector<1x8x384xf32>
    %241 = vector.shape_cast %240 : vector<1x8x384xf32> to vector<8x384xf32>
    %cst_57 = arith.constant dense<0.000000e+00> : vector<8x384xf32>
    %242 = tpu.matmul %234, %3, %cst_57 {dimension_numbers = #tpu.dot_dimension_numbers<[1], [0], [0], [1], [0, 0, 1, 1], [], []>} : vector<8x128xf32>, vector<128x384xf32>, vector<8x384xf32> -> vector<8x384xf32>
    %243 = vector.extract_strided_slice %241 {offsets = [0, 0], sizes = [8, 128], strides = [1, 1]} : vector<8x384xf32> to vector<8x128xf32>
    %244 = vector.extract_strided_slice %242 {offsets = [0, 0], sizes = [8, 128], strides = [1, 1]} : vector<8x384xf32> to vector<8x128xf32>
    %245 = arith.addf %243, %244 : vector<8x128xf32>
    %246 = arith.negf %245 : vector<8x128xf32>
    %247 = math.exp %246 : vector<8x128xf32>
    %cst_58 = arith.constant 1.000000e+00 : f32
    %248 = vector.broadcast %cst_58 : f32 to vector<8x128xf32>
    %249 = arith.addf %248, %247 : vector<8x128xf32>
    %250 = arith.divf %248, %249 : vector<8x128xf32>
    %251 = vector.extract_strided_slice %241 {offsets = [0, 128], sizes = [8, 128], strides = [1, 1]} : vector<8x384xf32> to vector<8x128xf32>
    %252 = vector.extract_strided_slice %242 {offsets = [0, 128], sizes = [8, 128], strides = [1, 1]} : vector<8x384xf32> to vector<8x128xf32>
    %253 = arith.addf %251, %252 : vector<8x128xf32>
    %254 = arith.negf %253 : vector<8x128xf32>
    %255 = math.exp %254 : vector<8x128xf32>
    %cst_59 = arith.constant 1.000000e+00 : f32
    %256 = vector.broadcast %cst_59 : f32 to vector<8x128xf32>
    %257 = arith.addf %256, %255 : vector<8x128xf32>
    %258 = arith.divf %256, %257 : vector<8x128xf32>
    %259 = vector.extract_strided_slice %241 {offsets = [0, 256], sizes = [8, 128], strides = [1, 1]} : vector<8x384xf32> to vector<8x128xf32>
    %260 = vector.extract_strided_slice %242 {offsets = [0, 256], sizes = [8, 128], strides = [1, 1]} : vector<8x384xf32> to vector<8x128xf32>
    %261 = arith.addf %260, %6 : vector<8x128xf32>
    %262 = arith.mulf %250, %261 : vector<8x128xf32>
    %263 = arith.addf %259, %262 : vector<8x128xf32>
    %264 = math.tanh %263 : vector<8x128xf32>
    %265 = arith.subf %234, %264 : vector<8x128xf32>
    %266 = arith.mulf %258, %265 : vector<8x128xf32>
    %267 = arith.addf %264, %266 : vector<8x128xf32>
    %268 = arith.index_cast %c7_i32 : i32 to index
    %c0_60 = arith.constant 0 : index
    %c0_61 = arith.constant 0 : index
    %269 = vector.load %arg5[%268, %c0_60, %c0_61] : memref<8x8x128xf32, #tpu.memory_space<vmem>>, vector<1x8x128xf32>
    %270 = vector.shape_cast %269 : vector<1x8x128xf32> to vector<8x128xf32>
    %271 = vector.shape_cast %267 : vector<8x128xf32> to vector<1x8x128xf32>
    tpu.vector_store %arg5[%268, %c0_60, %c0_61], %271 {strides = array<i32>} : memref<8x8x128xf32, #tpu.memory_space<vmem>>, vector<1x8x128xf32>,
    %c8_i32 = arith.constant 8 : i32
    %c0_62 = arith.constant 0 : index
    %c0_63 = arith.constant 0 : index
    %272 = vector.load %arg6[%c0_62, %c0_63] : memref<8x128xf32, #tpu.memory_space<vmem>>, vector<8x128xf32>
    tpu.vector_store %arg6[%c0_62, %c0_63], %267 {strides = array<i32>} : memref<8x128xf32, #tpu.memory_space<vmem>>, vector<8x128xf32>,
    return
  }
  func.func @transform_0(%arg0: i32, %arg1: i32) -> (i32, i32, i32) {
    %c0_i32 = arith.constant 0 : i32
    %c0_i32_0 = arith.constant 0 : i32
    return %arg1, %arg0, %c0_i32 : i32, i32, i32
  }
  func.func @transform_1(%arg0: i32, %arg1: i32) -> (i32, i32) {
    %c0_i32 = arith.constant 0 : i32
    %c0_i32_0 = arith.constant 0 : i32
    %c0_i32_1 = arith.constant 0 : i32
    return %c0_i32, %c0_i32_0 : i32, i32
  }
  func.func @transform_2(%arg0: i32, %arg1: i32) -> (i32, i32) {
    %c0_i32 = arith.constant 0 : i32
    %c0_i32_0 = arith.constant 0 : i32
    %c0_i32_1 = arith.constant 0 : i32
    return %c0_i32, %c0_i32_0 : i32, i32
  }
  func.func @transform_3(%arg0: i32, %arg1: i32) -> (i32, i32, i32) {
    %c0_i32 = arith.constant 0 : i32
    %c0_i32_0 = arith.constant 0 : i32
    return %arg1, %arg0, %c0_i32 : i32, i32, i32
  }
}

module attributes {stable_mosaic.version = 11 : i64} {
  func.func @gru_kernel(%arg0: i32, %arg1: i32, %arg2: memref<8x8x384xf32, #tpu.memory_space<vmem>>, %arg3: memref<128x384xf32, #tpu.memory_space<vmem>>, %arg4: memref<1x128xf32, #tpu.memory_space<vmem>>, %arg5: memref<8x8x128xf32, #tpu.memory_space<vmem>>, %arg6: memref<8x128xf32, #tpu.memory_space<vmem>>) attributes {dimension_semantics = [#tpu.dimension_semantics<parallel>, #tpu.dimension_semantics<arbitrary>], iteration_bounds = array<i64: 1, 1>, scalar_prefetch = 0 : i64, scratch_operands = 1 : i64, tpu.core_type = #tpu.core_type<tc>, window_params = [{transform_indices = @transform_0, window_bounds = array<i64: 8, 8, 384>}, {pipeline_mode = #tpu.pipeline_mode<synchronous>, transform_indices = @transform_1, window_bounds = array<i64: 128, 384>}, {pipeline_mode = #tpu.pipeline_mode<synchronous>, transform_indices = @transform_2, window_bounds = array<i64: 1, 128>}, {transform_indices = @transform_3, window_bounds = array<i64: 8, 8, 128>}]} {
    %c0_i32 = arith.constant 0 : i32
    %0 = arith.cmpi eq, %arg1, %c0_i32 : i32
    %1 = arith.extui %0 : i1 to i32
    %c0_i32_0 = arith.constant 0 : i32
    %2 = arith.cmpi ne, %1, %c0_i32_0 : i32
    scf.if %2 {
      %cst_64 = arith.constant 0.000000e+00 : f32
      %273 = vector.broadcast %cst_64 : f32 to vector<8x128xf32>
      %c0_65 = arith.constant 0 : index
      %c0_66 = arith.constant 0 : index
      %274 = vector.load %arg6[%c0_65, %c0_66] : memref<8x128xf32, #tpu.memory_space<vmem>>, vector<8x128xf32>
      tpu.vector_store %arg6[%c0_65, %c0_66], %273 {strides = array<i32>} : memref<8x128xf32, #tpu.memory_space<vmem>>, vector<8x128xf32>,
    } else {
    }
    %c0 = arith.constant 0 : index
    %c0_1 = arith.constant 0 : index
    %3 = vector.load %arg3[%c0, %c0_1] : memref<128x384xf32, #tpu.memory_space<vmem>>, vector<128x384xf32>
    %c0_2 = arith.constant 0 : index
    %c0_3 = arith.constant 0 : index
    %4 = vector.load %arg4[%c0_2, %c0_3] : memref<1x128xf32, #tpu.memory_space<vmem>>, vector<1x128xf32>
    %5 = vector.shape_cast %4 : vector<1x128xf32> to vector<1x128xf32>
    %6 = vector.broadcast %5 : vector<1x128xf32> to vector<8x128xf32>
    %c0_4 = arith.constant 0 : index
    %c0_5 = arith.constant 0 : index
    %7 = vector.load %arg6[%c0_4, %c0_5] : memref<8x128xf32, #tpu.memory_space<vmem>>, vector<8x128xf32>
    %c0_i32_6 = arith.constant 0 : i32
    %8 = arith.index_cast %c0_i32_6 : i32 to index
    %c0_7 = arith.constant 0 : index
    %c0_8 = arith.constant 0 : index
    %9 = vector.load %arg2[%8, %c0_7, %c0_8] : memref<8x8x384xf32, #tpu.memory_space<vmem>>, vector<1x8x384xf32>
    %10 = vector.shape_cast %9 : vector<1x8x384xf32> to vector<8x384xf32>
    %cst = arith.constant dense<0.000000e+00> : vector<8x384xf32>
    %11 = tpu.matmul %7, %3, %cst {dimension_numbers = #tpu.dot_dimension_numbers<[1], [0], [0], [1], [0, 0, 1, 1], [], []>} : vector<8x128xf32>, vector<128x384xf32>, vector<8x384xf32> -> vector<8x384xf32>
    %12 = vector.extract_strided_slice %10 {offsets = [0, 0], sizes = [8, 128], strides = [1, 1]} : vector<8x384xf32> to vector<8x128xf32>
    %13 = vector.extract_strided_slice %11 {offsets = [0, 0], sizes = [8, 128], strides = [1, 1]} : vector<8x384xf32> to vector<8x128xf32>
    %14 = arith.addf %12, %13 : vector<8x128xf32>
    %15 = arith.negf %14 : vector<8x128xf32>
    %16 = math.exp %15 : vector<8x128xf32>
    %cst_9 = arith.constant 1.000000e+00 : f32
    %17 = vector.broadcast %cst_9 : f32 to vector<8x128xf32>
    %18 = arith.addf %17, %16 : vector<8x128xf32>
    %19 = arith.divf %17, %18 : vector<8x128xf32>
    %20 = vector.extract_strided_slice %10 {offsets = [0, 128], sizes = [8, 128], strides = [1, 1]} : vector<8x384xf32> to vector<8x128xf32>
    %21 = vector.extract_strided_slice %11 {offsets = [0, 128], sizes = [8, 128], strides = [1, 1]} : vector<8x384xf32> to vector<8x128xf32>
    %22 = arith.addf %20, %21 : vector<8x128xf32>
    %23 = arith.negf %22 : vector<8x128xf32>
    %24 = math.exp %23 : vector<8x128xf32>
    %cst_10 = arith.constant 1.000000e+00 : f32
    %25 = vector.broadcast %cst_10 : f32 to vector<8x128xf32>
    %26 = arith.addf %25, %24 : vector<8x128xf32>
    %27 = arith.divf %25, %26 : vector<8x128xf32>
    %28 = vector.extract_strided_slice %10 {offsets = [0, 256], sizes = [8, 128], strides = [1, 1]} : vector<8x384xf32> to vector<8x128xf32>
    %29 = vector.extract_strided_slice %11 {offsets = [0, 256], sizes = [8, 128], strides = [1, 1]} : vector<8x384xf32> to vector<8x128xf32>
    %30 = arith.addf %29, %6 : vector<8x128xf32>
    %31 = arith.mulf %19, %30 : vector<8x128xf32>
    %32 = arith.addf %28, %31 : vector<8x128xf32>
    %33 = math.tanh %32 : vector<8x128xf32>
    %34 = arith.subf %7, %33 : vector<8x128xf32>
    %35 = arith.mulf %27, %34 : vector<8x128xf32>
    %36 = arith.addf %33, %35 : vector<8x128xf32>
    %37 = arith.index_cast %c0_i32_6 : i32 to index
    %c0_11 = arith.constant 0 : index
    %c0_12 = arith.constant 0 : index
    %38 = vector.load %arg5[%37, %c0_11, %c0_12] : memref<8x8x128xf32, #tpu.memory_space<vmem>>, vector<1x8x128xf32>
    %39 = vector.shape_cast %38 : vector<1x8x128xf32> to vector<8x128xf32>
    %40 = vector.shape_cast %36 : vector<8x128xf32> to vector<1x8x128xf32>
    tpu.vector_store %arg5[%37, %c0_11, %c0_12], %40 {strides = array<i32>} : memref<8x8x128xf32, #tpu.memory_space<vmem>>, vector<1x8x128xf32>,
    %c1_i32 = arith.constant 1 : i32
    %41 = arith.index_cast %c1_i32 : i32 to index
    %c0_13 = arith.constant 0 : index
    %c0_14 = arith.constant 0 : index
    %42 = vector.load %arg2[%41, %c0_13, %c0_14] : memref<8x8x384xf32, #tpu.memory_space<vmem>>, vector<1x8x384xf32>
    %43 = vector.shape_cast %42 : vector<1x8x384xf32> to vector<8x384xf32>
    %cst_15 = arith.constant dense<0.000000e+00> : vector<8x384xf32>
    %44 = tpu.matmul %36, %3, %cst_15 {dimension_numbers = #tpu.dot_dimension_numbers<[1], [0], [0], [1], [0, 0, 1, 1], [], []>} : vector<8x128xf32>, vector<128x384xf32>, vector<8x384xf32> -> vector<8x384xf32>
    %45 = vector.extract_strided_slice %43 {offsets = [0, 0], sizes = [8, 128], strides = [1, 1]} : vector<8x384xf32> to vector<8x128xf32>
    %46 = vector.extract_strided_slice %44 {offsets = [0, 0], sizes = [8, 128], strides = [1, 1]} : vector<8x384xf32> to vector<8x128xf32>
    %47 = arith.addf %45, %46 : vector<8x128xf32>
    %48 = arith.negf %47 : vector<8x128xf32>
    %49 = math.exp %48 : vector<8x128xf32>
    %cst_16 = arith.constant 1.000000e+00 : f32
    %50 = vector.broadcast %cst_16 : f32 to vector<8x128xf32>
    %51 = arith.addf %50, %49 : vector<8x128xf32>
    %52 = arith.divf %50, %51 : vector<8x128xf32>
    %53 = vector.extract_strided_slice %43 {offsets = [0, 128], sizes = [8, 128], strides = [1, 1]} : vector<8x384xf32> to vector<8x128xf32>
    %54 = vector.extract_strided_slice %44 {offsets = [0, 128], sizes = [8, 128], strides = [1, 1]} : vector<8x384xf32> to vector<8x128xf32>
    %55 = arith.addf %53, %54 : vector<8x128xf32>
    %56 = arith.negf %55 : vector<8x128xf32>
    %57 = math.exp %56 : vector<8x128xf32>
    %cst_17 = arith.constant 1.000000e+00 : f32
    %58 = vector.broadcast %cst_17 : f32 to vector<8x128xf32>
    %59 = arith.addf %58, %57 : vector<8x128xf32>
    %60 = arith.divf %58, %59 : vector<8x128xf32>
    %61 = vector.extract_strided_slice %43 {offsets = [0, 256], sizes = [8, 128], strides = [1, 1]} : vector<8x384xf32> to vector<8x128xf32>
    %62 = vector.extract_strided_slice %44 {offsets = [0, 256], sizes = [8, 128], strides = [1, 1]} : vector<8x384xf32> to vector<8x128xf32>
    %63 = arith.addf %62, %6 : vector<8x128xf32>
    %64 = arith.mulf %52, %63 : vector<8x128xf32>
    %65 = arith.addf %61, %64 : vector<8x128xf32>
    %66 = math.tanh %65 : vector<8x128xf32>
    %67 = arith.subf %36, %66 : vector<8x128xf32>
    %68 = arith.mulf %60, %67 : vector<8x128xf32>
    %69 = arith.addf %66, %68 : vector<8x128xf32>
    %70 = arith.index_cast %c1_i32 : i32 to index
    %c0_18 = arith.constant 0 : index
    %c0_19 = arith.constant 0 : index
    %71 = vector.load %arg5[%70, %c0_18, %c0_19] : memref<8x8x128xf32, #tpu.memory_space<vmem>>, vector<1x8x128xf32>
    %72 = vector.shape_cast %71 : vector<1x8x128xf32> to vector<8x128xf32>
    %73 = vector.shape_cast %69 : vector<8x128xf32> to vector<1x8x128xf32>
    tpu.vector_store %arg5[%70, %c0_18, %c0_19], %73 {strides = array<i32>} : memref<8x8x128xf32, #tpu.memory_space<vmem>>, vector<1x8x128xf32>,
    %c2_i32 = arith.constant 2 : i32
    %74 = arith.index_cast %c2_i32 : i32 to index
    %c0_20 = arith.constant 0 : index
    %c0_21 = arith.constant 0 : index
    %75 = vector.load %arg2[%74, %c0_20, %c0_21] : memref<8x8x384xf32, #tpu.memory_space<vmem>>, vector<1x8x384xf32>
    %76 = vector.shape_cast %75 : vector<1x8x384xf32> to vector<8x384xf32>
    %cst_22 = arith.constant dense<0.000000e+00> : vector<8x384xf32>
    %77 = tpu.matmul %69, %3, %cst_22 {dimension_numbers = #tpu.dot_dimension_numbers<[1], [0], [0], [1], [0, 0, 1, 1], [], []>} : vector<8x128xf32>, vector<128x384xf32>, vector<8x384xf32> -> vector<8x384xf32>
    %78 = vector.extract_strided_slice %76 {offsets = [0, 0], sizes = [8, 128], strides = [1, 1]} : vector<8x384xf32> to vector<8x128xf32>
    %79 = vector.extract_strided_slice %77 {offsets = [0, 0], sizes = [8, 128], strides = [1, 1]} : vector<8x384xf32> to vector<8x128xf32>
    %80 = arith.addf %78, %79 : vector<8x128xf32>
    %81 = arith.negf %80 : vector<8x128xf32>
    %82 = math.exp %81 : vector<8x128xf32>
    %cst_23 = arith.constant 1.000000e+00 : f32
    %83 = vector.broadcast %cst_23 : f32 to vector<8x128xf32>
    %84 = arith.addf %83, %82 : vector<8x128xf32>
    %85 = arith.divf %83, %84 : vector<8x128xf32>
    %86 = vector.extract_strided_slice %76 {offsets = [0, 128], sizes = [8, 128], strides = [1, 1]} : vector<8x384xf32> to vector<8x128xf32>
    %87 = vector.extract_strided_slice %77 {offsets = [0, 128], sizes = [8, 128], strides = [1, 1]} : vector<8x384xf32> to vector<8x128xf32>
    %88 = arith.addf %86, %87 : vector<8x128xf32>
    %89 = arith.negf %88 : vector<8x128xf32>
    %90 = math.exp %89 : vector<8x128xf32>
    %cst_24 = arith.constant 1.000000e+00 : f32
    %91 = vector.broadcast %cst_24 : f32 to vector<8x128xf32>
    %92 = arith.addf %91, %90 : vector<8x128xf32>
    %93 = arith.divf %91, %92 : vector<8x128xf32>
    %94 = vector.extract_strided_slice %76 {offsets = [0, 256], sizes = [8, 128], strides = [1, 1]} : vector<8x384xf32> to vector<8x128xf32>
    %95 = vector.extract_strided_slice %77 {offsets = [0, 256], sizes = [8, 128], strides = [1, 1]} : vector<8x384xf32> to vector<8x128xf32>
    %96 = arith.addf %95, %6 : vector<8x128xf32>
    %97 = arith.mulf %85, %96 : vector<8x128xf32>
    %98 = arith.addf %94, %97 : vector<8x128xf32>
    %99 = math.tanh %98 : vector<8x128xf32>
    %100 = arith.subf %69, %99 : vector<8x128xf32>
    %101 = arith.mulf %93, %100 : vector<8x128xf32>
    %102 = arith.addf %99, %101 : vector<8x128xf32>
    %103 = arith.index_cast %c2_i32 : i32 to index
    %c0_25 = arith.constant 0 : index
    %c0_26 = arith.constant 0 : index
    %104 = vector.load %arg5[%103, %c0_25, %c0_26] : memref<8x8x128xf32, #tpu.memory_space<vmem>>, vector<1x8x128xf32>
    %105 = vector.shape_cast %104 : vector<1x8x128xf32> to vector<8x128xf32>
    %106 = vector.shape_cast %102 : vector<8x128xf32> to vector<1x8x128xf32>
    tpu.vector_store %arg5[%103, %c0_25, %c0_26], %106 {strides = array<i32>} : memref<8x8x128xf32, #tpu.memory_space<vmem>>, vector<1x8x128xf32>,
    %c3_i32 = arith.constant 3 : i32
    %107 = arith.index_cast %c3_i32 : i32 to index
    %c0_27 = arith.constant 0 : index
    %c0_28 = arith.constant 0 : index
    %108 = vector.load %arg2[%107, %c0_27, %c0_28] : memref<8x8x384xf32, #tpu.memory_space<vmem>>, vector<1x8x384xf32>
    %109 = vector.shape_cast %108 : vector<1x8x384xf32> to vector<8x384xf32>
    %cst_29 = arith.constant dense<0.000000e+00> : vector<8x384xf32>
    %110 = tpu.matmul %102, %3, %cst_29 {dimension_numbers = #tpu.dot_dimension_numbers<[1], [0], [0], [1], [0, 0, 1, 1], [], []>} : vector<8x128xf32>, vector<128x384xf32>, vector<8x384xf32> -> vector<8x384xf32>
    %111 = vector.extract_strided_slice %109 {offsets = [0, 0], sizes = [8, 128], strides = [1, 1]} : vector<8x384xf32> to vector<8x128xf32>
    %112 = vector.extract_strided_slice %110 {offsets = [0, 0], sizes = [8, 128], strides = [1, 1]} : vector<8x384xf32> to vector<8x128xf32>
    %113 = arith.addf %111, %112 : vector<8x128xf32>
    %114 = arith.negf %113 : vector<8x128xf32>
    %115 = math.exp %114 : vector<8x128xf32>
    %cst_30 = arith.constant 1.000000e+00 : f32
    %116 = vector.broadcast %cst_30 : f32 to vector<8x128xf32>
    %117 = arith.addf %116, %115 : vector<8x128xf32>
    %118 = arith.divf %116, %117 : vector<8x128xf32>
    %119 = vector.extract_strided_slice %109 {offsets = [0, 128], sizes = [8, 128], strides = [1, 1]} : vector<8x384xf32> to vector<8x128xf32>
    %120 = vector.extract_strided_slice %110 {offsets = [0, 128], sizes = [8, 128], strides = [1, 1]} : vector<8x384xf32> to vector<8x128xf32>
    %121 = arith.addf %119, %120 : vector<8x128xf32>
    %122 = arith.negf %121 : vector<8x128xf32>
    %123 = math.exp %122 : vector<8x128xf32>
    %cst_31 = arith.constant 1.000000e+00 : f32
    %124 = vector.broadcast %cst_31 : f32 to vector<8x128xf32>
    %125 = arith.addf %124, %123 : vector<8x128xf32>
    %126 = arith.divf %124, %125 : vector<8x128xf32>
    %127 = vector.extract_strided_slice %109 {offsets = [0, 256], sizes = [8, 128], strides = [1, 1]} : vector<8x384xf32> to vector<8x128xf32>
    %128 = vector.extract_strided_slice %110 {offsets = [0, 256], sizes = [8, 128], strides = [1, 1]} : vector<8x384xf32> to vector<8x128xf32>
    %129 = arith.addf %128, %6 : vector<8x128xf32>
    %130 = arith.mulf %118, %129 : vector<8x128xf32>
    %131 = arith.addf %127, %130 : vector<8x128xf32>
    %132 = math.tanh %131 : vector<8x128xf32>
    %133 = arith.subf %102, %132 : vector<8x128xf32>
    %134 = arith.mulf %126, %133 : vector<8x128xf32>
    %135 = arith.addf %132, %134 : vector<8x128xf32>
    %136 = arith.index_cast %c3_i32 : i32 to index
    %c0_32 = arith.constant 0 : index
    %c0_33 = arith.constant 0 : index
    %137 = vector.load %arg5[%136, %c0_32, %c0_33] : memref<8x8x128xf32, #tpu.memory_space<vmem>>, vector<1x8x128xf32>
    %138 = vector.shape_cast %137 : vector<1x8x128xf32> to vector<8x128xf32>
    %139 = vector.shape_cast %135 : vector<8x128xf32> to vector<1x8x128xf32>
    tpu.vector_store %arg5[%136, %c0_32, %c0_33], %139 {strides = array<i32>} : memref<8x8x128xf32, #tpu.memory_space<vmem>>, vector<1x8x128xf32>,
    %c4_i32 = arith.constant 4 : i32
    %140 = arith.index_cast %c4_i32 : i32 to index
    %c0_34 = arith.constant 0 : index
    %c0_35 = arith.constant 0 : index
    %141 = vector.load %arg2[%140, %c0_34, %c0_35] : memref<8x8x384xf32, #tpu.memory_space<vmem>>, vector<1x8x384xf32>
    %142 = vector.shape_cast %141 : vector<1x8x384xf32> to vector<8x384xf32>
    %cst_36 = arith.constant dense<0.000000e+00> : vector<8x384xf32>
    %143 = tpu.matmul %135, %3, %cst_36 {dimension_numbers = #tpu.dot_dimension_numbers<[1], [0], [0], [1], [0, 0, 1, 1], [], []>} : vector<8x128xf32>, vector<128x384xf32>, vector<8x384xf32> -> vector<8x384xf32>
    %144 = vector.extract_strided_slice %142 {offsets = [0, 0], sizes = [8, 128], strides = [1, 1]} : vector<8x384xf32> to vector<8x128xf32>
    %145 = vector.extract_strided_slice %143 {offsets = [0, 0], sizes = [8, 128], strides = [1, 1]} : vector<8x384xf32> to vector<8x128xf32>
    %146 = arith.addf %144, %145 : vector<8x128xf32>
    %147 = arith.negf %146 : vector<8x128xf32>
    %148 = math.exp %147 : vector<8x128xf32>
    %cst_37 = arith.constant 1.000000e+00 : f32
    %149 = vector.broadcast %cst_37 : f32 to vector<8x128xf32>
    %150 = arith.addf %149, %148 : vector<8x128xf32>
    %151 = arith.divf %149, %150 : vector<8x128xf32>
    %152 = vector.extract_strided_slice %142 {offsets = [0, 128], sizes = [8, 128], strides = [1, 1]} : vector<8x384xf32> to vector<8x128xf32>
    %153 = vector.extract_strided_slice %143 {offsets = [0, 128], sizes = [8, 128], strides = [1, 1]} : vector<8x384xf32> to vector<8x128xf32>
    %154 = arith.addf %152, %153 : vector<8x128xf32>
    %155 = arith.negf %154 : vector<8x128xf32>
    %156 = math.exp %155 : vector<8x128xf32>
    %cst_38 = arith.constant 1.000000e+00 : f32
    %157 = vector.broadcast %cst_38 : f32 to vector<8x128xf32>
    %158 = arith.addf %157, %156 : vector<8x128xf32>
    %159 = arith.divf %157, %158 : vector<8x128xf32>
    %160 = vector.extract_strided_slice %142 {offsets = [0, 256], sizes = [8, 128], strides = [1, 1]} : vector<8x384xf32> to vector<8x128xf32>
    %161 = vector.extract_strided_slice %143 {offsets = [0, 256], sizes = [8, 128], strides = [1, 1]} : vector<8x384xf32> to vector<8x128xf32>
    %162 = arith.addf %161, %6 : vector<8x128xf32>
    %163 = arith.mulf %151, %162 : vector<8x128xf32>
    %164 = arith.addf %160, %163 : vector<8x128xf32>
    %165 = math.tanh %164 : vector<8x128xf32>
    %166 = arith.subf %135, %165 : vector<8x128xf32>
    %167 = arith.mulf %159, %166 : vector<8x128xf32>
    %168 = arith.addf %165, %167 : vector<8x128xf32>
    %169 = arith.index_cast %c4_i32 : i32 to index
    %c0_39 = arith.constant 0 : index
    %c0_40 = arith.constant 0 : index
    %170 = vector.load %arg5[%169, %c0_39, %c0_40] : memref<8x8x128xf32, #tpu.memory_space<vmem>>, vector<1x8x128xf32>
    %171 = vector.shape_cast %170 : vector<1x8x128xf32> to vector<8x128xf32>
    %172 = vector.shape_cast %168 : vector<8x128xf32> to vector<1x8x128xf32>
    tpu.vector_store %arg5[%169, %c0_39, %c0_40], %172 {strides = array<i32>} : memref<8x8x128xf32, #tpu.memory_space<vmem>>, vector<1x8x128xf32>,
    %c5_i32 = arith.constant 5 : i32
    %173 = arith.index_cast %c5_i32 : i32 to index
    %c0_41 = arith.constant 0 : index
    %c0_42 = arith.constant 0 : index
    %174 = vector.load %arg2[%173, %c0_41, %c0_42] : memref<8x8x384xf32, #tpu.memory_space<vmem>>, vector<1x8x384xf32>
    %175 = vector.shape_cast %174 : vector<1x8x384xf32> to vector<8x384xf32>
    %cst_43 = arith.constant dense<0.000000e+00> : vector<8x384xf32>
    %176 = tpu.matmul %168, %3, %cst_43 {dimension_numbers = #tpu.dot_dimension_numbers<[1], [0], [0], [1], [0, 0, 1, 1], [], []>} : vector<8x128xf32>, vector<128x384xf32>, vector<8x384xf32> -> vector<8x384xf32>
    %177 = vector.extract_strided_slice %175 {offsets = [0, 0], sizes = [8, 128], strides = [1, 1]} : vector<8x384xf32> to vector<8x128xf32>
    %178 = vector.extract_strided_slice %176 {offsets = [0, 0], sizes = [8, 128], strides = [1, 1]} : vector<8x384xf32> to vector<8x128xf32>
    %179 = arith.addf %177, %178 : vector<8x128xf32>
    %180 = arith.negf %179 : vector<8x128xf32>
    %181 = math.exp %180 : vector<8x128xf32>
    %cst_44 = arith.constant 1.000000e+00 : f32
    %182 = vector.broadcast %cst_44 : f32 to vector<8x128xf32>
    %183 = arith.addf %182, %181 : vector<8x128xf32>
    %184 = arith.divf %182, %183 : vector<8x128xf32>
    %185 = vector.extract_strided_slice %175 {offsets = [0, 128], sizes = [8, 128], strides = [1, 1]} : vector<8x384xf32> to vector<8x128xf32>
    %186 = vector.extract_strided_slice %176 {offsets = [0, 128], sizes = [8, 128], strides = [1, 1]} : vector<8x384xf32> to vector<8x128xf32>
    %187 = arith.addf %185, %186 : vector<8x128xf32>
    %188 = arith.negf %187 : vector<8x128xf32>
    %189 = math.exp %188 : vector<8x128xf32>
    %cst_45 = arith.constant 1.000000e+00 : f32
    %190 = vector.broadcast %cst_45 : f32 to vector<8x128xf32>
    %191 = arith.addf %190, %189 : vector<8x128xf32>
    %192 = arith.divf %190, %191 : vector<8x128xf32>
    %193 = vector.extract_strided_slice %175 {offsets = [0, 256], sizes = [8, 128], strides = [1, 1]} : vector<8x384xf32> to vector<8x128xf32>
    %194 = vector.extract_strided_slice %176 {offsets = [0, 256], sizes = [8, 128], strides = [1, 1]} : vector<8x384xf32> to vector<8x128xf32>
    %195 = arith.addf %194, %6 : vector<8x128xf32>
    %196 = arith.mulf %184, %195 : vector<8x128xf32>
    %197 = arith.addf %193, %196 : vector<8x128xf32>
    %198 = math.tanh %197 : vector<8x128xf32>
    %199 = arith.subf %168, %198 : vector<8x128xf32>
    %200 = arith.mulf %192, %199 : vector<8x128xf32>
    %201 = arith.addf %198, %200 : vector<8x128xf32>
    %202 = arith.index_cast %c5_i32 : i32 to index
    %c0_46 = arith.constant 0 : index
    %c0_47 = arith.constant 0 : index
    %203 = vector.load %arg5[%202, %c0_46, %c0_47] : memref<8x8x128xf32, #tpu.memory_space<vmem>>, vector<1x8x128xf32>
    %204 = vector.shape_cast %203 : vector<1x8x128xf32> to vector<8x128xf32>
    %205 = vector.shape_cast %201 : vector<8x128xf32> to vector<1x8x128xf32>
    tpu.vector_store %arg5[%202, %c0_46, %c0_47], %205 {strides = array<i32>} : memref<8x8x128xf32, #tpu.memory_space<vmem>>, vector<1x8x128xf32>,
    %c6_i32 = arith.constant 6 : i32
    %206 = arith.index_cast %c6_i32 : i32 to index
    %c0_48 = arith.constant 0 : index
    %c0_49 = arith.constant 0 : index
    %207 = vector.load %arg2[%206, %c0_48, %c0_49] : memref<8x8x384xf32, #tpu.memory_space<vmem>>, vector<1x8x384xf32>
    %208 = vector.shape_cast %207 : vector<1x8x384xf32> to vector<8x384xf32>
    %cst_50 = arith.constant dense<0.000000e+00> : vector<8x384xf32>
    %209 = tpu.matmul %201, %3, %cst_50 {dimension_numbers = #tpu.dot_dimension_numbers<[1], [0], [0], [1], [0, 0, 1, 1], [], []>} : vector<8x128xf32>, vector<128x384xf32>, vector<8x384xf32> -> vector<8x384xf32>
    %210 = vector.extract_strided_slice %208 {offsets = [0, 0], sizes = [8, 128], strides = [1, 1]} : vector<8x384xf32> to vector<8x128xf32>
    %211 = vector.extract_strided_slice %209 {offsets = [0, 0], sizes = [8, 128], strides = [1, 1]} : vector<8x384xf32> to vector<8x128xf32>
    %212 = arith.addf %210, %211 : vector<8x128xf32>
    %213 = arith.negf %212 : vector<8x128xf32>
    %214 = math.exp %213 : vector<8x128xf32>
    %cst_51 = arith.constant 1.000000e+00 : f32
    %215 = vector.broadcast %cst_51 : f32 to vector<8x128xf32>
    %216 = arith.addf %215, %214 : vector<8x128xf32>
    %217 = arith.divf %215, %216 : vector<8x128xf32>
    %218 = vector.extract_strided_slice %208 {offsets = [0, 128], sizes = [8, 128], strides = [1, 1]} : vector<8x384xf32> to vector<8x128xf32>
    %219 = vector.extract_strided_slice %209 {offsets = [0, 128], sizes = [8, 128], strides = [1, 1]} : vector<8x384xf32> to vector<8x128xf32>
    %220 = arith.addf %218, %219 : vector<8x128xf32>
    %221 = arith.negf %220 : vector<8x128xf32>
    %222 = math.exp %221 : vector<8x128xf32>
    %cst_52 = arith.constant 1.000000e+00 : f32
    %223 = vector.broadcast %cst_52 : f32 to vector<8x128xf32>
    %224 = arith.addf %223, %222 : vector<8x128xf32>
    %225 = arith.divf %223, %224 : vector<8x128xf32>
    %226 = vector.extract_strided_slice %208 {offsets = [0, 256], sizes = [8, 128], strides = [1, 1]} : vector<8x384xf32> to vector<8x128xf32>
    %227 = vector.extract_strided_slice %209 {offsets = [0, 256], sizes = [8, 128], strides = [1, 1]} : vector<8x384xf32> to vector<8x128xf32>
    %228 = arith.addf %227, %6 : vector<8x128xf32>
    %229 = arith.mulf %217, %228 : vector<8x128xf32>
    %230 = arith.addf %226, %229 : vector<8x128xf32>
    %231 = math.tanh %230 : vector<8x128xf32>
    %232 = arith.subf %201, %231 : vector<8x128xf32>
    %233 = arith.mulf %225, %232 : vector<8x128xf32>
    %234 = arith.addf %231, %233 : vector<8x128xf32>
    %235 = arith.index_cast %c6_i32 : i32 to index
    %c0_53 = arith.constant 0 : index
    %c0_54 = arith.constant 0 : index
    %236 = vector.load %arg5[%235, %c0_53, %c0_54] : memref<8x8x128xf32, #tpu.memory_space<vmem>>, vector<1x8x128xf32>
    %237 = vector.shape_cast %236 : vector<1x8x128xf32> to vector<8x128xf32>
    %238 = vector.shape_cast %234 : vector<8x128xf32> to vector<1x8x128xf32>
    tpu.vector_store %arg5[%235, %c0_53, %c0_54], %238 {strides = array<i32>} : memref<8x8x128xf32, #tpu.memory_space<vmem>>, vector<1x8x128xf32>,
    %c7_i32 = arith.constant 7 : i32
    %239 = arith.index_cast %c7_i32 : i32 to index
    %c0_55 = arith.constant 0 : index
    %c0_56 = arith.constant 0 : index
    %240 = vector.load %arg2[%239, %c0_55, %c0_56] : memref<8x8x384xf32, #tpu.memory_space<vmem>>, vector<1x8x384xf32>
    %241 = vector.shape_cast %240 : vector<1x8x384xf32> to vector<8x384xf32>
    %cst_57 = arith.constant dense<0.000000e+00> : vector<8x384xf32>
    %242 = tpu.matmul %234, %3, %cst_57 {dimension_numbers = #tpu.dot_dimension_numbers<[1], [0], [0], [1], [0, 0, 1, 1], [], []>} : vector<8x128xf32>, vector<128x384xf32>, vector<8x384xf32> -> vector<8x384xf32>
    %243 = vector.extract_strided_slice %241 {offsets = [0, 0], sizes = [8, 128], strides = [1, 1]} : vector<8x384xf32> to vector<8x128xf32>
    %244 = vector.extract_strided_slice %242 {offsets = [0, 0], sizes = [8, 128], strides = [1, 1]} : vector<8x384xf32> to vector<8x128xf32>
    %245 = arith.addf %243, %244 : vector<8x128xf32>
    %246 = arith.negf %245 : vector<8x128xf32>
    %247 = math.exp %246 : vector<8x128xf32>
    %cst_58 = arith.constant 1.000000e+00 : f32
    %248 = vector.broadcast %cst_58 : f32 to vector<8x128xf32>
    %249 = arith.addf %248, %247 : vector<8x128xf32>
    %250 = arith.divf %248, %249 : vector<8x128xf32>
    %251 = vector.extract_strided_slice %241 {offsets = [0, 128], sizes = [8, 128], strides = [1, 1]} : vector<8x384xf32> to vector<8x128xf32>
    %252 = vector.extract_strided_slice %242 {offsets = [0, 128], sizes = [8, 128], strides = [1, 1]} : vector<8x384xf32> to vector<8x128xf32>
    %253 = arith.addf %251, %252 : vector<8x128xf32>
    %254 = arith.negf %253 : vector<8x128xf32>
    %255 = math.exp %254 : vector<8x128xf32>
    %cst_59 = arith.constant 1.000000e+00 : f32
    %256 = vector.broadcast %cst_59 : f32 to vector<8x128xf32>
    %257 = arith.addf %256, %255 : vector<8x128xf32>
    %258 = arith.divf %256, %257 : vector<8x128xf32>
    %259 = vector.extract_strided_slice %241 {offsets = [0, 256], sizes = [8, 128], strides = [1, 1]} : vector<8x384xf32> to vector<8x128xf32>
    %260 = vector.extract_strided_slice %242 {offsets = [0, 256], sizes = [8, 128], strides = [1, 1]} : vector<8x384xf32> to vector<8x128xf32>
    %261 = arith.addf %260, %6 : vector<8x128xf32>
    %262 = arith.mulf %250, %261 : vector<8x128xf32>
    %263 = arith.addf %259, %262 : vector<8x128xf32>
    %264 = math.tanh %263 : vector<8x128xf32>
    %265 = arith.subf %234, %264 : vector<8x128xf32>
    %266 = arith.mulf %258, %265 : vector<8x128xf32>
    %267 = arith.addf %264, %266 : vector<8x128xf32>
    %268 = arith.index_cast %c7_i32 : i32 to index
    %c0_60 = arith.constant 0 : index
    %c0_61 = arith.constant 0 : index
    %269 = vector.load %arg5[%268, %c0_60, %c0_61] : memref<8x8x128xf32, #tpu.memory_space<vmem>>, vector<1x8x128xf32>
    %270 = vector.shape_cast %269 : vector<1x8x128xf32> to vector<8x128xf32>
    %271 = vector.shape_cast %267 : vector<8x128xf32> to vector<1x8x128xf32>
    tpu.vector_store %arg5[%268, %c0_60, %c0_61], %271 {strides = array<i32>} : memref<8x8x128xf32, #tpu.memory_space<vmem>>, vector<1x8x128xf32>,
    %c8_i32 = arith.constant 8 : i32
    %c0_62 = arith.constant 0 : index
    %c0_63 = arith.constant 0 : index
    %272 = vector.load %arg6[%c0_62, %c0_63] : memref<8x128xf32, #tpu.memory_space<vmem>>, vector<8x128xf32>
    tpu.vector_store %arg6[%c0_62, %c0_63], %267 {strides = array<i32>} : memref<8x128xf32, #tpu.memory_space<vmem>>, vector<8x128xf32>,
    return
  }
  func.func @transform_0(%arg0: i32, %arg1: i32) -> (i32, i32, i32) {
    %c0_i32 = arith.constant 0 : i32
    %c0_i32_0 = arith.constant 0 : i32
    return %arg1, %arg0, %c0_i32 : i32, i32, i32
  }
  func.func @transform_1(%arg0: i32, %arg1: i32) -> (i32, i32) {
    %c0_i32 = arith.constant 0 : i32
    %c0_i32_0 = arith.constant 0 : i32
    %c0_i32_1 = arith.constant 0 : i32
    return %c0_i32, %c0_i32_0 : i32, i32
  }
  func.func @transform_2(%arg0: i32, %arg1: i32) -> (i32, i32) {
    %c0_i32 = arith.constant 0 : i32
    %c0_i32_0 = arith.constant 0 : i32
    %c0_i32_1 = arith.constant 0 : i32
    return %c0_i32, %c0_i32_0 : i32, i32
  }
  func.func @transform_3(%arg0: i32, %arg1: i32) -> (i32, i32, i32) {
    %c0_i32 = arith.constant 0 : i32
    %c0_i32_0 = arith.constant 0 : i32
    return %arg1, %arg0, %c0_i32 : i32, i32, i32
  }
}

</mosaic_0001>

<bundles_post_ra>
// kernel: tpu_custom_call.1
= control target key start
LH: loop header
LB: loop body
LE: loop exit
PB: predicated region body
PF: predicated region fallthrough
CT: control target
= control target key end

     0   :  { %8 = vsyncpa [#allocation4], 0  ;;  %s2920_s0 = inlined_call_operand.hbm [shape: f32[8,8,384], index: 0, kind: input, shape index: {}]   ;;  %s2921_s1 = inlined_call_operand.hbm [shape: f32[128,384], index: 1, kind: input, shape index: {}]   ;;  %s2922_s2 = inlined_call_operand.vmem [shape: f32[1,128], index: 2, kind: input, shape index: {}]   ;;  %s2923_s3 = inlined_call_operand.hbm [shape: f32[8,8,128], index: 3, kind: output, shape index: {}]  }
   0x1   :  { %9 = vsyncpa [#allocation7], 0 }
   0x2   :  { %10 = vsyncpa [#allocation5], 0  ;;  %s2102_s12 = smov [#allocation3]  }
   0x3   :  { %s16_s13 = sshll.u32 %s2102_s12, 4  ;;  %s17_s13 = int_to_ptr.vmem [resolvable:$true] %s16_s13 }
   0x4   :  { %s2044_s14 = scalar_lea.vmem %s17_s13, 3072  ;;  %p2049_p1 = scmp.lt.s32.totalorder %s17_s13, %s17_s13 }
   0x5   :  { %p2045_p0 = scmp.ne.s32.totalorder %s17_s13, %s2044_s14  ;;  %p2050_p2 = scmp.lt.s32.totalorder %s2044_s14, %s2044_s14 }
   0x7   :  { %p2051_p3 = por %p2050_p2, %p2049_p1 }
   0x9   :  { %p2052_p4 = pnand %p2051_p3, %p2045_p0 }
   0xb   :  { %2055 = shalt.err (!%p2052_p4)
}
   0xc   :  { %s2103_s15 = smov 384   ;;  %s2104_s16 = smov 24  }
   0xd   :  { %22 = dma.hbm_to_vmem [thread:$0]  %s2920_s0, 3072, %s17_s13, [#allocation4], %s2103_s15, %s2103_s15, %s2104_s16  }
   0xe   :  { %s2105_s19 = smov [#allocation6]  }
   0xf   :  { %s28_s20 = sshll.u32 %s2105_s19, 4  ;;  %s29_s20 = int_to_ptr.vmem [resolvable:$true] %s28_s20 }
  0x10   :  { %s2064_s21 = scalar_lea.vmem %s29_s20, 6144  ;;  %p2069_p6 = scmp.lt.s32.totalorder %s29_s20, %s29_s20 }
  0x11   :  { %p2065_p5 = scmp.ne.s32.totalorder %s29_s20, %s2064_s21  ;;  %p2070_p7 = scmp.lt.s32.totalorder %s2064_s21, %s2064_s21 }
  0x13   :  { %p2071_p8 = por %p2070_p7, %p2069_p6 }
  0x15   :  { %p2072_p9 = pnand %p2071_p8, %p2065_p5 }
  0x17   :  { %2075 = shalt.err (!%p2072_p9)
}
  0x18   :  { %34 = dma.hbm_to_vmem [thread:$0]  %s2921_s1, 6144, %s29_s20, [#allocation7], %s2103_s15, %s2103_s15, %s2104_s16  }
  0x19   :  { %2096 = dma.done.wait [#allocation4], 3072  }
  0x1a   :  { %2097 = vsyncadd [#allocation4], 4294964224 }
  0x1b   :  { %2098 = dma.done.wait [#allocation7], 6144  }
  0x1c   :  { %2099 = vsyncadd [#allocation7], 4294961152  ;;  %v2924_v0 = vmov 0.0   ;;  %vm2107_vm0 = vmmov 0   ;;  %v2141_v1 = vld [vmem:[#allocation6 + $0x170] sm:$0xff]  ;;  %v2143_v2 = vld [vmem:[#allocation6 + $0x168] sm:$0xff] }
  0x1d   :  { %1618 = vmatprep.subr.mxu1 %v2924_v0  ;;  %171 = vmatprep.mubr.f32.mxu0 %v2924_v0  ;;  %2943 = vst [vmem:[#allocation12_spill] sm:$0xff] %v2141_v1  ;;  %v2145_v3 = vld [vmem:[#allocation6 + $0x158] sm:$0xff]  ;;  %v2148_v4 = vld [vmem:[#allocation6 + $0x150] sm:$0xff]  ;;  %v2151_v5 = vld [vmem:[#allocation6 + $0x140] sm:$0xff] }
  0x1e   :  { %1650 = vmatprep.mubr.msk.f32.mxu1 %vm2107_vm0, %v2924_v0  ;;  %107 = vmatprep.subr.mxu0 %v2141_v1  ;;  %v2154_v6 = vld [vmem:[#allocation6 + $0x138] sm:$0xff]  ;;  %v2157_v7 = vld [vmem:[#allocation6 + $0x128] sm:$0xff]  ;;  %v2160_v8 = vld [vmem:[#allocation6 + $0x120] sm:$0xff] }
  0x1f   :  { %108 = vmatpush1.msra.mxu0 %v2143_v2  ;;  %v2163_v9 = vld [vmem:[#allocation6 + $0x110] sm:$0xff]  ;;  %v2166_v10 = vld [vmem:[#allocation6 + $0x108] sm:$0xff]  ;;  %v2169_v11 = vld [vmem:[#allocation6 + $0xf8] sm:$0xff] }
  0x20   :  { %109 = vmatprep.subr.mxu0 %v2145_v3  ;;  %v2172_v12 = vld [vmem:[#allocation6 + $0xf0] sm:$0xff]  ;;  %v2175_v13 = vld [vmem:[#allocation6 + $0xe0] sm:$0xff]  ;;  %v2177_v14 = vld [vmem:[#allocation6 + $0x178] sm:$0xff] }
  0x21   :  { %110 = vmatpush1.msra.mxu0 %v2148_v4  ;;  %v2180_v15 = vld [vmem:[#allocation6 + $0xd8] sm:$0xff]  ;;  %1619 = vmatpush3.msra.mxu1 %v2177_v14  ;;  %v2183_v16 = vld [vmem:[#allocation6 + $0x160] sm:$0xff]  ;;  %v2186_v17 = vld [vmem:[#allocation6 + $0xc8] sm:$0xff] }
  0x22   :  { %111 = vmatprep.subr.mxu0 %v2151_v5  ;;  %1620 = vmatprep.subr.mxu1 %v2924_v0  ;;  %v2189_v18 = vld [vmem:[#allocation6 + $0x148] sm:$0xff]  ;;  %v2192_v19 = vld [vmem:[#allocation6 + $0xc0] sm:$0xff]  ;;  %v2196_v20 = vld [vmem:[#allocation6 + $0xb0] sm:$0xff] }
  0x23   :  { %112 = vmatpush1.msra.mxu0 %v2154_v6  ;;  %1621 = vmatpush3.msra.mxu1 %v2183_v16  ;;  %v2199_v21 = vld [vmem:[#allocation6 + $0x130] sm:$0xff]  ;;  %v2202_v22 = vld [vmem:[#allocation6 + $0xa8] sm:$0xff]  ;;  %v2206_v23 = vld [vmem:[#allocation6 + $0x98] sm:$0xff] }
  0x24   :  { %113 = vmatprep.subr.mxu0 %v2157_v7  ;;  %1622 = vmatprep.subr.mxu1 %v2924_v0  ;;  %v2209_v24 = vld [vmem:[#allocation6 + $0x118] sm:$0xff]  ;;  %v2212_v25 = vld [vmem:[#allocation6 + $0x90] sm:$0xff]  ;;  %v2216_v26 = vld [vmem:[#allocation6 + $0x80] sm:$0xff] }
  0x25   :  { %114 = vmatpush1.msra.mxu0 %v2160_v8  ;;  %1623 = vmatpush3.msra.mxu1 %v2189_v18  ;;  %v2219_v27 = vld [vmem:[#allocation6 + $0x100] sm:$0xff]  ;;  %v2222_v28 = vld [vmem:[#allocation6 + $0x78] sm:$0xff]  ;;  %v2226_v29 = vld [vmem:[#allocation6 + $0x68] sm:$0xff] }
  0x26   :  { %115 = vmatprep.subr.mxu0 %v2163_v9  ;;  %1624 = vmatprep.subr.mxu1 %v2924_v0  ;;  %v2229_v30 = vld [vmem:[#allocation6 + $0xe8] sm:$0xff]  ;;  %v2232_v31 = vld [vmem:[#allocation6 + $0x60] sm:$0xff]  ;;  %v2236_v32 = vld [vmem:[#allocation6 + $0x50] sm:$0xff] }
  0x27   :  { %116 = vmatpush1.msra.mxu0 %v2166_v10  ;;  %1625 = vmatpush3.msra.mxu1 %v2199_v21  ;;  %v2239_v33 = vld [vmem:[#allocation6 + $0xd0] sm:$0xff]  ;;  %v2242_v34 = vld [vmem:[#allocation6 + $0x48] sm:$0xff]  ;;  %v2246_v35 = vld [vmem:[#allocation6 + $0x38] sm:$0xff] }
  0x28   :  { %117 = vmatprep.subr.mxu0 %v2169_v11  ;;  %1626 = vmatprep.subr.mxu1 %v2924_v0  ;;  %v2249_v36 = vld [vmem:[#allocation6 + $0xb8] sm:$0xff]  ;;  %v2252_v37 = vld [vmem:[#allocation6 + $0x30] sm:$0xff]  ;;  %v2256_v38 = vld [vmem:[#allocation6 + $0x20] sm:$0xff] }
  0x29   :  { %118 = vmatpush1.msra.mxu0 %v2172_v12  ;;  %1627 = vmatpush3.msra.mxu1 %v2209_v24  ;;  %v2259_v39 = vld [vmem:[#allocation6 + $0xa0] sm:$0xff]  ;;  %v2262_v40 = vld [vmem:[#allocation6 + $0x18] sm:$0xff]  ;;  %v2266_v41 = vld [vmem:[#allocation6 + $0x8] sm:$0xff] }
  0x2a   :  { %119 = vmatprep.subr.mxu0 %v2175_v13  ;;  %1628 = vmatprep.subr.mxu1 %v2924_v0  ;;  %2944 = vst [vmem:[#allocation13_spill] sm:$0xff] %v2262_v40  ;;  %2945 = vst [vmem:[#allocation14_spill] sm:$0xff] %v2266_v41  ;;  %v2269_v42 = vld [vmem:[#allocation6 + $0x88] sm:$0xff]  ;;  %v2272_v43 = vld [vmem:[#allocation6] sm:$0xff] }
  0x2b   :  { %120 = vmatpush1.msra.mxu0 %v2180_v15  ;;  %1629 = vmatpush3.msra.mxu1 %v2219_v27  ;;  %2946 = vst [vmem:[#allocation15_spill] sm:$0xff] %v2272_v43  ;;  %v2277_v44 = vld [vmem:[#allocation6 + $0x70] sm:$0xff]  ;;  %v2283_v45 = vld [vmem:[#allocation6 + $0x58] sm:$0xff]  ;;  %v2288_v46 = vld [vmem:[#allocation6 + $0x40] sm:$0xff] }
  0x2c   :  { %121 = vmatprep.subr.mxu0 %v2186_v17  ;;  %1630 = vmatprep.subr.mxu1 %v2924_v0  ;;  %v2294_v47 = vld [vmem:[#allocation6 + $0x28] sm:$0xff]  ;;  %v2300_v48 = vld [vmem:[#allocation6 + $0x10] sm:$0xff]  ;;  %v104_v49 = vld [vmem:[#allocation3] sm:$0xff] }
  0x2d   :  { %122 = vmatpush1.msra.mxu0 %v2192_v19  ;;  %1631 = vmatpush3.msra.mxu1 %v2229_v30  ;;  %2947 = vst [vmem:[#allocation16_spill] sm:$0xff] %v2294_v47  ;;  %2948 = vst [vmem:[#allocation17_spill] sm:$0xff] %v2300_v48  ;;  %v105_v53 = vld [vmem:[#allocation3 + $0x8] sm:$0xff]  ;;  %v2374_v61 = vld [vmem:[%s2922_s2] ss:$0 sm:$0xff] }
  0x2e   :  { %123 = vmatprep.subr.mxu0 %v2196_v20  ;;  %1632 = vmatprep.subr.mxu1 %v2924_v0 }
  0x2f   :  { %124 = vmatpush1.msra.mxu0 %v2202_v22  ;;  %1633 = vmatpush3.msra.mxu1 %v2239_v33 }
  0x30   :  { %125 = vmatprep.subr.mxu0 %v2206_v23  ;;  %1634 = vmatprep.subr.mxu1 %v2924_v0 }
  0x31   :  { %126 = vmatpush1.msra.mxu0 %v2212_v25  ;;  %1635 = vmatpush3.msra.mxu1 %v2249_v36 }
  0x32   :  { %127 = vmatprep.subr.mxu0 %v2216_v26  ;;  %1636 = vmatprep.subr.mxu1 %v2924_v0 }
  0x33   :  { %128 = vmatpush1.msra.mxu0 %v2222_v28  ;;  %1637 = vmatpush3.msra.mxu1 %v2259_v39 }
  0x34   :  { %129 = vmatprep.subr.mxu0 %v2226_v29  ;;  %1638 = vmatprep.subr.mxu1 %v2924_v0 }
  0x35   :  { %130 = vmatpush1.msra.mxu0 %v2232_v31  ;;  %1639 = vmatpush3.msra.mxu1 %v2269_v42 }
  0x36   :  { %131 = vmatprep.subr.mxu0 %v2236_v32  ;;  %1640 = vmatprep.subr.mxu1 %v2924_v0 }
  0x37   :  { %132 = vmatpush1.msra.mxu0 %v2242_v34  ;;  %1641 = vmatpush3.msra.mxu1 %v2277_v44 }
  0x38   :  { %133 = vmatprep.subr.mxu0 %v2246_v35  ;;  %1642 = vmatprep.subr.mxu1 %v2924_v0 }
  0x39   :  { %134 = vmatpush1.msra.mxu0 %v2252_v37  ;;  %1643 = vmatpush3.msra.mxu1 %v2283_v45 }
  0x3a   :  { %135 = vmatprep.subr.mxu0 %v2256_v38  ;;  %1644 = vmatprep.subr.mxu1 %v2924_v0 }
  0x3b   :  { %136 = vmatpush1.msra.mxu0 %v2262_v40  ;;  %1645 = vmatpush3.msra.mxu1 %v2288_v46 }
  0x3c   :  { %137 = vmatprep.subr.mxu0 %v2266_v41  ;;  %1646 = vmatprep.subr.mxu1 %v2924_v0 }
  0x3d   :  { %138 = vmatpush1.msra.mxu0 %v2272_v43  ;;  %1647 = vmatpush3.msra.mxu1 %v2294_v47 }
  0x3e   :  { %172 = vmatmul.mubr.f32.vlgmr.msra.gmra.mxu0 %v2924_v0  ;;  %274 = vmatprep.subr.mxu0 %v2141_v1 }
  0x3f   :  { %275 = vmatpush1.msra.mxu0 %v2143_v2  ;;  %1648 = vmatprep.subr.mxu1 %v2924_v0 }
  0x40   :  { %276 = vmatprep.subr.mxu0 %v2145_v3  ;;  %1649 = vmatpush3.msra.mxu1 %v2300_v48 }
  0x41   :  { %277 = vmatpush1.msra.mxu0 %v2148_v4  ;;  %1651 = vmatmul.mubr.f32.vlgmr.msra.gmra.mxu1 %v2924_v0 }
  0x42   :  { %278 = vmatprep.subr.mxu0 %v2151_v5  ;;  %1653 = vmatprep.subr.mxu1 %v2924_v0 }
  0x43   :  { %279 = vmatpush1.msra.mxu0 %v2154_v6  ;;  %1654 = vmatpush3.msra.mxu1 %v2177_v14 }
  0x44   :  { %280 = vmatprep.subr.mxu0 %v2157_v7  ;;  %1655 = vmatprep.subr.mxu1 %v2924_v0 }
  0x45   :  { %281 = vmatpush1.msra.mxu0 %v2160_v8  ;;  %1656 = vmatpush3.msra.mxu1 %v2183_v16 }
  0x46   :  { %282 = vmatprep.subr.mxu0 %v2163_v9  ;;  %1657 = vmatprep.subr.mxu1 %v2924_v0 }
  0x47   :  { %283 = vmatpush1.msra.mxu0 %v2166_v10  ;;  %1658 = vmatpush3.msra.mxu1 %v2189_v18 }
  0x48   :  { %284 = vmatprep.subr.mxu0 %v2169_v11  ;;  %1659 = vmatprep.subr.mxu1 %v2924_v0 }
  0x49   :  { %285 = vmatpush1.msra.mxu0 %v2172_v12  ;;  %1660 = vmatpush3.msra.mxu1 %v2199_v21 }
  0x4a   :  { %286 = vmatprep.subr.mxu0 %v2175_v13  ;;  %1661 = vmatprep.subr.mxu1 %v2924_v0 }
  0x4b   :  { %287 = vmatpush1.msra.mxu0 %v2180_v15  ;;  %1662 = vmatpush3.msra.mxu1 %v2209_v24 }
  0x4c   :  { %288 = vmatprep.subr.mxu0 %v2186_v17  ;;  %1663 = vmatprep.subr.mxu1 %v2924_v0 }
  0x4d   :  { %289 = vmatpush1.msra.mxu0 %v2192_v19  ;;  %1664 = vmatpush3.msra.mxu1 %v2219_v27 }
  0x4e   :  { %290 = vmatprep.subr.mxu0 %v2196_v20  ;;  %1665 = vmatprep.subr.mxu1 %v2924_v0 }
  0x4f   :  { %291 = vmatpush1.msra.mxu0 %v2202_v22  ;;  %1666 = vmatpush3.msra.mxu1 %v2229_v30 }
  0x50   :  { %292 = vmatprep.subr.mxu0 %v2206_v23  ;;  %1667 = vmatprep.subr.mxu1 %v2924_v0 }
  0x51   :  { %293 = vmatpush1.msra.mxu0 %v2212_v25  ;;  %1668 = vmatpush3.msra.mxu1 %v2239_v33 }
  0x52   :  { %294 = vmatprep.subr.mxu0 %v2216_v26  ;;  %1669 = vmatprep.subr.mxu1 %v2924_v0 }
  0x53   :  { %295 = vmatpush1.msra.mxu0 %v2222_v28  ;;  %1670 = vmatpush3.msra.mxu1 %v2249_v36 }
  0x54   :  { %296 = vmatprep.subr.mxu0 %v2226_v29  ;;  %1671 = vmatprep.subr.mxu1 %v2924_v0 }
  0x55   :  { %297 = vmatpush1.msra.mxu0 %v2232_v31  ;;  %1672 = vmatpush3.msra.mxu1 %v2259_v39 }
  0x56   :  { %298 = vmatprep.subr.mxu0 %v2236_v32  ;;  %1673 = vmatprep.subr.mxu1 %v2924_v0 }
  0x57   :  { %299 = vmatpush1.msra.mxu0 %v2242_v34  ;;  %1674 = vmatpush3.msra.mxu1 %v2269_v42 }
  0x58   :  { %300 = vmatprep.subr.mxu0 %v2246_v35  ;;  %1675 = vmatprep.subr.mxu1 %v2924_v0 }
  0x59   :  { %301 = vmatpush1.msra.mxu0 %v2252_v37  ;;  %1676 = vmatpush3.msra.mxu1 %v2277_v44 }
  0x5a   :  { %302 = vmatprep.subr.mxu0 %v2256_v38  ;;  %1677 = vmatprep.subr.mxu1 %v2924_v0 }
  0x5b   :  { %303 = vmatpush1.msra.mxu0 %v2262_v40  ;;  %1678 = vmatpush3.msra.mxu1 %v2283_v45 }
  0x5c   :  { %304 = vmatprep.subr.mxu0 %v2266_v41  ;;  %338 = vmatprep.mubr.f32.mxu0 %v2924_v0 }
  0x5d   :  { %305 = vmatpush1.msra.mxu0 %v2272_v43  ;;  %1679 = vmatprep.subr.mxu1 %v2924_v0 }
  0x5e   :  { %1685 = vmatprep.mubr.msk.f32.mxu1 %vm2107_vm0, %v2924_v0  ;;  %1680 = vmatpush3.msra.mxu1 %v2288_v46 }
  0x5f   :  { %442 = vmatprep.subr.mxu0 %v2141_v1  ;;  %1681 = vmatprep.subr.mxu1 %v2924_v0 }
  0x60   :  { %1682 = vmatpush3.msra.mxu1 %v2294_v47 }
  0x61   :  { %1683 = vmatprep.subr.mxu1 %v2924_v0 }
  0x62   :  { %1684 = vmatpush3.msra.mxu1 %v2300_v48 }
  0x63   :  { %1688 = vmatprep.subr.mxu1 %v2924_v0 }
  0xfe   :  { %v173_v50 = vpop.f32.mrf.mxu0 }
  0xff   :  { %v248_v51 = vadd.f32 %v173_v50, %v104_v49  ;;  %v106_v50 = vld [vmem:[#allocation3 + $0x10] sm:$0xff] }
 0x100   :  { %v175_v54 = vpop.f32.mrf.mxu0 }
 0x101   :  { %v1466_v52 = vmul.f32 -1.442695, %v248_v51  ;;  %v244_v55 = vpop.f32.mrf.mxu1  ;;  %v255_v57 = vadd.f32 %v175_v54, %v105_v53 }
 0x102   :  { %v262_v62 = vadd.f32 %v2374_v61, %v244_v55  ;;  %v271_v55 = vld [vmem:[#allocation3 + $0x18] sm:$0xff] }
 0x103   :  { %1907 = vpow2.f32 %v1466_v52  ;;  %v1652_v56 = vpop.f32.mrf.mxu1  ;;  %v1467_v58 = vmul.f32 -1.442695, %v255_v57 }
 0x105   :  { %1909 = vpow2.f32 %v1467_v58 }
 0x110   :  { %v1908_v59 = vpop.eup %1907 }
 0x111   :  { %v252_v60 = vadd.f32 1.0, %v1908_v59 }
 0x112   :  { %v1910_v63 = vpop.eup %1909 }
 0x113   :  { %1911 = vrcp.f32 %v252_v60  ;;  %v259_v52 = vadd.f32 1.0, %v1910_v63 }
 0x120   :  { %v1912_v49 = vpop.eup %1911 }
 0x121   :  { %v263_v51 = vmul.f32 %v1912_v49, %v262_v62 }
 0x123   :  { %v264_v0 = vadd.f32 %v263_v51, %v106_v50  ;;  %v272_v50 = vld [vmem:[#allocation3 + $0x20] sm:$0xff] }
 0x125   :  { %1913 = vtanh.f32 %v264_v0  ;;  %v2949_v0 = vmov 0.0  }
 0x126   :  { %1915 = vrcp.f32 %v259_v52 }
 0x132   :  { %v1914_v53 = vpop.eup %1913 }
 0x133   :  { %v266_v54 = vsub.f32 0.0, %v1914_v53  ;;  %v1916_v56 = vpop.eup %1915 }
 0x135   :  { %v267_v57 = vmul.f32 %v1916_v56, %v266_v54 }
 0x137   :  { %v2377_v58 = vadd.f32 %v1914_v53, %v267_v57 }
 0x139   :  { %269 = vst [vmem:[#allocation8] sm:$0xff] %v2377_v58  ;;  %339 = vmatmul.mubr.f32.vlgmr.msra.gmra.mxu0 %v2377_v58  ;;  %1686 = vmatmul.mubr.f32.vlgmr.msra.gmra.mxu1 %v2377_v58 }
 0x13a   :  { %443 = vmatpush1.msra.mxu0 %v2143_v2  ;;  %1689 = vmatpush3.msra.mxu1 %v2177_v14 }
 0x13b   :  { %444 = vmatprep.subr.mxu0 %v2145_v3  ;;  %1690 = vmatprep.subr.mxu1 %v2949_v0 }
 0x13c   :  { %445 = vmatpush1.msra.mxu0 %v2148_v4  ;;  %1691 = vmatpush3.msra.mxu1 %v2183_v16 }
 0x13d   :  { %446 = vmatprep.subr.mxu0 %v2151_v5  ;;  %1692 = vmatprep.subr.mxu1 %v2949_v0 }
 0x13e   :  { %447 = vmatpush1.msra.mxu0 %v2154_v6  ;;  %1693 = vmatpush3.msra.mxu1 %v2189_v18 }
 0x13f   :  { %448 = vmatprep.subr.mxu0 %v2157_v7  ;;  %1694 = vmatprep.subr.mxu1 %v2949_v0 }
 0x140   :  { %449 = vmatpush1.msra.mxu0 %v2160_v8  ;;  %1695 = vmatpush3.msra.mxu1 %v2199_v21 }
 0x141   :  { %450 = vmatprep.subr.mxu0 %v2163_v9  ;;  %1696 = vmatprep.subr.mxu1 %v2949_v0 }
 0x142   :  { %451 = vmatpush1.msra.mxu0 %v2166_v10  ;;  %1697 = vmatpush3.msra.mxu1 %v2209_v24 }
 0x143   :  { %452 = vmatprep.subr.mxu0 %v2169_v11  ;;  %1698 = vmatprep.subr.mxu1 %v2949_v0 }
 0x144   :  { %453 = vmatpush1.msra.mxu0 %v2172_v12  ;;  %1699 = vmatpush3.msra.mxu1 %v2219_v27 }
 0x145   :  { %454 = vmatprep.subr.mxu0 %v2175_v13  ;;  %1700 = vmatprep.subr.mxu1 %v2949_v0 }
 0x146   :  { %455 = vmatpush1.msra.mxu0 %v2180_v15  ;;  %1701 = vmatpush3.msra.mxu1 %v2229_v30 }
 0x147   :  { %456 = vmatprep.subr.mxu0 %v2186_v17  ;;  %1702 = vmatprep.subr.mxu1 %v2949_v0 }
 0x148   :  { %457 = vmatpush1.msra.mxu0 %v2192_v19  ;;  %1703 = vmatpush3.msra.mxu1 %v2239_v33 }
 0x149   :  { %458 = vmatprep.subr.mxu0 %v2196_v20  ;;  %1704 = vmatprep.subr.mxu1 %v2949_v0 }
 0x14a   :  { %459 = vmatpush1.msra.mxu0 %v2202_v22  ;;  %1705 = vmatpush3.msra.mxu1 %v2249_v36 }
 0x14b   :  { %460 = vmatprep.subr.mxu0 %v2206_v23  ;;  %1706 = vmatprep.subr.mxu1 %v2949_v0 }
 0x14c   :  { %461 = vmatpush1.msra.mxu0 %v2212_v25  ;;  %1707 = vmatpush3.msra.mxu1 %v2259_v39 }
 0x14d   :  { %462 = vmatprep.subr.mxu0 %v2216_v26  ;;  %1708 = vmatprep.subr.mxu1 %v2949_v0 }
 0x14e   :  { %463 = vmatpush1.msra.mxu0 %v2222_v28  ;;  %1709 = vmatpush3.msra.mxu1 %v2269_v42 }
 0x14f   :  { %464 = vmatprep.subr.mxu0 %v2226_v29  ;;  %1710 = vmatprep.subr.mxu1 %v2949_v0 }
 0x150   :  { %465 = vmatpush1.msra.mxu0 %v2232_v31  ;;  %1711 = vmatpush3.msra.mxu1 %v2277_v44 }
 0x151   :  { %466 = vmatprep.subr.mxu0 %v2236_v32  ;;  %1712 = vmatprep.subr.mxu1 %v2949_v0 }
 0x152   :  { %467 = vmatpush1.msra.mxu0 %v2242_v34  ;;  %1713 = vmatpush3.msra.mxu1 %v2283_v45 }
 0x153   :  { %468 = vmatprep.subr.mxu0 %v2246_v35  ;;  %1714 = vmatprep.subr.mxu1 %v2949_v0 }
 0x154   :  { %469 = vmatpush1.msra.mxu0 %v2252_v37  ;;  %1715 = vmatpush3.msra.mxu1 %v2288_v46 }
 0x155   :  { %470 = vmatprep.subr.mxu0 %v2256_v38  ;;  %1716 = vmatprep.subr.mxu1 %v2949_v0 }
 0x156   :  { %471 = vmatpush1.msra.mxu0 %v2262_v40  ;;  %1717 = vmatpush3.msra.mxu1 %v2294_v47 }
 0x157   :  { %472 = vmatprep.subr.mxu0 %v2266_v41  ;;  %1718 = vmatprep.subr.mxu1 %v2949_v0 }
 0x158   :  { %473 = vmatpush1.msra.mxu0 %v2272_v43  ;;  %506 = vmatprep.mubr.f32.mxu0 %v2949_v0  ;;  %v273_v43 = vld [vmem:[#allocation3 + $0x28] sm:$0xff] }
 0x159   :  { %1719 = vmatpush3.msra.mxu1 %v2300_v48  ;;  %1720 = vmatprep.mubr.msk.f32.mxu1 %vm2107_vm0, %v2949_v0 }
 0x15a   :  { %610 = vmatprep.subr.mxu0 %v2141_v1  ;;  %1723 = vmatprep.subr.mxu1 %v2949_v0 }
 0x1f9   :  { %v340_v59 = vpop.f32.mrf.mxu0  ;;  %v411_v60 = vpop.f32.mrf.mxu1 }
 0x1fa   :  { %v415_v62 = vadd.f32 %v340_v59, %v271_v55  ;;  %v429_v1 = vadd.f32 %v2374_v61, %v411_v60 }
 0x1fb   :  { %v1687_v63 = vpop.f32.mrf.mxu1  ;;  %v342_v51 = vpop.f32.mrf.mxu0 }
 0x1fc   :  { %v1468_v49 = vmul.f32 -1.442695, %v415_v62  ;;  %v422_v52 = vadd.f32 %v342_v51, %v272_v50 }
 0x1fe   :  { %1917 = vpow2.f32 %v1468_v49  ;;  %v1469_v53 = vmul.f32 -1.442695, %v422_v52 }
 0x200   :  { %1919 = vpow2.f32 %v1469_v53 }
 0x20b   :  { %v1918_v54 = vpop.eup %1917 }
 0x20c   :  { %v419_v56 = vadd.f32 1.0, %v1918_v54  ;;  %v440_v54 = vld [vmem:[#allocation3 + $0x38] sm:$0xff] }
 0x20d   :  { %v1920_v57 = vpop.eup %1919 }
 0x20e   :  { %1921 = vrcp.f32 %v419_v56  ;;  %v426_v40 = vadd.f32 1.0, %v1920_v57 }
 0x21b   :  { %v1922_v48 = vpop.eup %1921 }
 0x21c   :  { %v430_v41 = vmul.f32 %v1922_v48, %v429_v1  ;;  %v2950_v1 = vld [vmem:[#allocation13_spill] sm:$0xff]  ;;  %v2955_v48 = vld [vmem:[#allocation12_spill] sm:$0xff] }
 0x21e   :  { %v431_v47 = vadd.f32 %v430_v41, %v273_v43  ;;  %v2952_v41 = vld [vmem:[#allocation14_spill] sm:$0xff]  ;;  %v2953_v43 = vld [vmem:[#allocation15_spill] sm:$0xff] }
 0x220   :  { %1923 = vtanh.f32 %v431_v47  ;;  %v2954_v47 = vld [vmem:[#allocation17_spill] sm:$0xff] }
 0x221   :  { %1925 = vrcp.f32 %v426_v40  ;;  %v2951_v40 = vld [vmem:[#allocation16_spill] sm:$0xff] }
 0x22d   :  { %v1924_v55 = vpop.eup %1923 }
 0x22e   :  { %v433_v59 = vsub.f32 %v2377_v58, %v1924_v55  ;;  %v1926_v62 = vpop.eup %1925  ;;  %v439_v58 = vld [vmem:[#allocation3 + $0x30] sm:$0xff] }
 0x230   :  { %v434_v63 = vmul.f32 %v1926_v62, %v433_v59 }
 0x232   :  { %v2451_v49 = vadd.f32 %v1924_v55, %v434_v63 }
 0x234   :  { %437 = vst [vmem:[#allocation8 + $0x8] sm:$0xff] %v2451_v49  ;;  %507 = vmatmul.mubr.f32.vlgmr.msra.gmra.mxu0 %v2451_v49  ;;  %1721 = vmatmul.mubr.f32.vlgmr.msra.gmra.mxu1 %v2451_v49 }
 0x235   :  { %611 = vmatpush1.msra.mxu0 %v2143_v2  ;;  %1724 = vmatpush3.msra.mxu1 %v2177_v14 }
 0x236   :  { %612 = vmatprep.subr.mxu0 %v2145_v3  ;;  %1725 = vmatprep.subr.mxu1 %v2949_v0 }
 0x237   :  { %613 = vmatpush1.msra.mxu0 %v2148_v4  ;;  %1726 = vmatpush3.msra.mxu1 %v2183_v16 }
 0x238   :  { %614 = vmatprep.subr.mxu0 %v2151_v5  ;;  %1727 = vmatprep.subr.mxu1 %v2949_v0 }
 0x239   :  { %615 = vmatpush1.msra.mxu0 %v2154_v6  ;;  %1728 = vmatpush3.msra.mxu1 %v2189_v18 }
 0x23a   :  { %616 = vmatprep.subr.mxu0 %v2157_v7  ;;  %1729 = vmatprep.subr.mxu1 %v2949_v0 }
 0x23b   :  { %617 = vmatpush1.msra.mxu0 %v2160_v8  ;;  %1730 = vmatpush3.msra.mxu1 %v2199_v21 }
 0x23c   :  { %618 = vmatprep.subr.mxu0 %v2163_v9  ;;  %1731 = vmatprep.subr.mxu1 %v2949_v0 }
 0x23d   :  { %619 = vmatpush1.msra.mxu0 %v2166_v10  ;;  %1732 = vmatpush3.msra.mxu1 %v2209_v24 }
 0x23e   :  { %620 = vmatprep.subr.mxu0 %v2169_v11  ;;  %1733 = vmatprep.subr.mxu1 %v2949_v0 }
 0x23f   :  { %621 = vmatpush1.msra.mxu0 %v2172_v12  ;;  %1734 = vmatpush3.msra.mxu1 %v2219_v27 }
 0x240   :  { %622 = vmatprep.subr.mxu0 %v2175_v13  ;;  %1735 = vmatprep.subr.mxu1 %v2949_v0 }
 0x241   :  { %623 = vmatpush1.msra.mxu0 %v2180_v15  ;;  %1736 = vmatpush3.msra.mxu1 %v2229_v30 }
 0x242   :  { %624 = vmatprep.subr.mxu0 %v2186_v17  ;;  %1737 = vmatprep.subr.mxu1 %v2949_v0 }
 0x243   :  { %625 = vmatpush1.msra.mxu0 %v2192_v19  ;;  %1738 = vmatpush3.msra.mxu1 %v2239_v33 }
 0x244   :  { %626 = vmatprep.subr.mxu0 %v2196_v20  ;;  %1739 = vmatprep.subr.mxu1 %v2949_v0 }
 0x245   :  { %627 = vmatpush1.msra.mxu0 %v2202_v22  ;;  %1740 = vmatpush3.msra.mxu1 %v2249_v36 }
 0x246   :  { %628 = vmatprep.subr.mxu0 %v2206_v23  ;;  %1741 = vmatprep.subr.mxu1 %v2949_v0 }
 0x247   :  { %629 = vmatpush1.msra.mxu0 %v2212_v25  ;;  %1742 = vmatpush3.msra.mxu1 %v2259_v39 }
 0x248   :  { %630 = vmatprep.subr.mxu0 %v2216_v26  ;;  %1743 = vmatprep.subr.mxu1 %v2949_v0 }
 0x249   :  { %631 = vmatpush1.msra.mxu0 %v2222_v28  ;;  %1744 = vmatpush3.msra.mxu1 %v2269_v42 }
 0x24a   :  { %632 = vmatprep.subr.mxu0 %v2226_v29  ;;  %1745 = vmatprep.subr.mxu1 %v2949_v0 }
 0x24b   :  { %633 = vmatpush1.msra.mxu0 %v2232_v31  ;;  %1746 = vmatpush3.msra.mxu1 %v2277_v44 }
 0x24c   :  { %634 = vmatprep.subr.mxu0 %v2236_v32  ;;  %1747 = vmatprep.subr.mxu1 %v2949_v0 }
 0x24d   :  { %635 = vmatpush1.msra.mxu0 %v2242_v34  ;;  %1748 = vmatpush3.msra.mxu1 %v2283_v45 }
 0x24e   :  { %636 = vmatprep.subr.mxu0 %v2246_v35  ;;  %1749 = vmatprep.subr.mxu1 %v2949_v0 }
 0x24f   :  { %637 = vmatpush1.msra.mxu0 %v2252_v37  ;;  %1750 = vmatpush3.msra.mxu1 %v2288_v46 }
 0x250   :  { %638 = vmatprep.subr.mxu0 %v2256_v38  ;;  %1751 = vmatprep.subr.mxu1 %v2949_v0 }
 0x251   :  { %639 = vmatpush1.msra.mxu0 %v2950_v1  ;;  %1752 = vmatpush3.msra.mxu1 %v2951_v40 }
 0x252   :  { %640 = vmatprep.subr.mxu0 %v2952_v41  ;;  %1753 = vmatprep.subr.mxu1 %v2949_v0 }
 0x253   :  { %641 = vmatpush1.msra.mxu0 %v2953_v43  ;;  %674 = vmatprep.mubr.f32.mxu0 %v2949_v0  ;;  %v441_v43 = vld [vmem:[#allocation3 + $0x40] sm:$0xff] }
 0x254   :  { %1754 = vmatpush3.msra.mxu1 %v2954_v47  ;;  %1755 = vmatprep.mubr.msk.f32.mxu1 %vm2107_vm0, %v2949_v0 }
 0x255   :  { %778 = vmatprep.subr.mxu0 %v2955_v48  ;;  %1758 = vmatprep.subr.mxu1 %v2949_v0 }
 0x2f4   :  { %v508_v60 = vpop.f32.mrf.mxu0  ;;  %v579_v50 = vpop.f32.mrf.mxu1 }
 0x2f5   :  { %v583_v51 = vadd.f32 %v508_v60, %v439_v58  ;;  %v597_v48 = vadd.f32 %v2374_v61, %v579_v50 }
 0x2f6   :  { %v1722_v52 = vpop.f32.mrf.mxu1  ;;  %v510_v56 = vpop.f32.mrf.mxu0 }
 0x2f7   :  { %v1470_v53 = vmul.f32 -1.442695, %v583_v51  ;;  %v590_v57 = vadd.f32 %v510_v56, %v440_v54 }
 0x2f9   :  { %1927 = vpow2.f32 %v1470_v53  ;;  %v1471_v55 = vmul.f32 -1.442695, %v590_v57 }
 0x2fb   :  { %1929 = vpow2.f32 %v1471_v55 }
 0x306   :  { %v1928_v59 = vpop.eup %1927 }
 0x307   :  { %v587_v62 = vadd.f32 1.0, %v1928_v59  ;;  %v608_v59 = vld [vmem:[#allocation3 + $0x50] sm:$0xff] }
 0x308   :  { %v1930_v63 = vpop.eup %1929 }
 0x309   :  { %1931 = vrcp.f32 %v587_v62  ;;  %v594_v1 = vadd.f32 1.0, %v1930_v63 }
 0x316   :  { %v1932_v47 = vpop.eup %1931 }
 0x317   :  { %v598_v41 = vmul.f32 %v1932_v47, %v597_v48  ;;  %v2961_v47 = vld [vmem:[#allocation12_spill] sm:$0xff]  ;;  %v607_v48 = vld [vmem:[#allocation3 + $0x48] sm:$0xff] }
 0x319   :  { %v599_v40 = vadd.f32 %v598_v41, %v441_v43  ;;  %v2959_v41 = vld [vmem:[#allocation15_spill] sm:$0xff]  ;;  %v2960_v43 = vld [vmem:[#allocation17_spill] sm:$0xff] }
 0x31b   :  { %1933 = vtanh.f32 %v599_v40  ;;  %v2958_v40 = vld [vmem:[#allocation14_spill] sm:$0xff] }
 0x31c   :  { %1935 = vrcp.f32 %v594_v1  ;;  %v2957_v1 = vld [vmem:[#allocation16_spill] sm:$0xff] }
 0x328   :  { %v1934_v58 = vpop.eup %1933 }
 0x329   :  { %v601_v60 = vsub.f32 %v2451_v49, %v1934_v58  ;;  %v1936_v51 = vpop.eup %1935  ;;  %v2956_v49 = vld [vmem:[#allocation13_spill] sm:$0xff] }
 0x32b   :  { %v602_v52 = vmul.f32 %v1936_v51, %v601_v60 }
 0x32d   :  { %v2525_v53 = vadd.f32 %v1934_v58, %v602_v52 }
 0x32f   :  { %605 = vst [vmem:[#allocation8 + $0x10] sm:$0xff] %v2525_v53  ;;  %675 = vmatmul.mubr.f32.vlgmr.msra.gmra.mxu0 %v2525_v53  ;;  %1756 = vmatmul.mubr.f32.vlgmr.msra.gmra.mxu1 %v2525_v53 }
 0x330   :  { %779 = vmatpush1.msra.mxu0 %v2143_v2  ;;  %1759 = vmatpush3.msra.mxu1 %v2177_v14 }
 0x331   :  { %780 = vmatprep.subr.mxu0 %v2145_v3  ;;  %1760 = vmatprep.subr.mxu1 %v2949_v0 }
 0x332   :  { %781 = vmatpush1.msra.mxu0 %v2148_v4  ;;  %1761 = vmatpush3.msra.mxu1 %v2183_v16 }
 0x333   :  { %782 = vmatprep.subr.mxu0 %v2151_v5  ;;  %1762 = vmatprep.subr.mxu1 %v2949_v0 }
 0x334   :  { %783 = vmatpush1.msra.mxu0 %v2154_v6  ;;  %1763 = vmatpush3.msra.mxu1 %v2189_v18 }
 0x335   :  { %784 = vmatprep.subr.mxu0 %v2157_v7  ;;  %1764 = vmatprep.subr.mxu1 %v2949_v0 }
 0x336   :  { %785 = vmatpush1.msra.mxu0 %v2160_v8  ;;  %1765 = vmatpush3.msra.mxu1 %v2199_v21 }
 0x337   :  { %786 = vmatprep.subr.mxu0 %v2163_v9  ;;  %1766 = vmatprep.subr.mxu1 %v2949_v0 }
 0x338   :  { %787 = vmatpush1.msra.mxu0 %v2166_v10  ;;  %1767 = vmatpush3.msra.mxu1 %v2209_v24 }
 0x339   :  { %788 = vmatprep.subr.mxu0 %v2169_v11  ;;  %1768 = vmatprep.subr.mxu1 %v2949_v0 }
 0x33a   :  { %789 = vmatpush1.msra.mxu0 %v2172_v12  ;;  %1769 = vmatpush3.msra.mxu1 %v2219_v27 }
 0x33b   :  { %790 = vmatprep.subr.mxu0 %v2175_v13  ;;  %1770 = vmatprep.subr.mxu1 %v2949_v0 }
 0x33c   :  { %791 = vmatpush1.msra.mxu0 %v2180_v15  ;;  %1771 = vmatpush3.msra.mxu1 %v2229_v30 }
 0x33d   :  { %792 = vmatprep.subr.mxu0 %v2186_v17  ;;  %1772 = vmatprep.subr.mxu1 %v2949_v0 }
 0x33e   :  { %793 = vmatpush1.msra.mxu0 %v2192_v19  ;;  %1773 = vmatpush3.msra.mxu1 %v2239_v33 }
 0x33f   :  { %794 = vmatprep.subr.mxu0 %v2196_v20  ;;  %1774 = vmatprep.subr.mxu1 %v2949_v0 }
 0x340   :  { %795 = vmatpush1.msra.mxu0 %v2202_v22  ;;  %1775 = vmatpush3.msra.mxu1 %v2249_v36 }
 0x341   :  { %796 = vmatprep.subr.mxu0 %v2206_v23  ;;  %1776 = vmatprep.subr.mxu1 %v2949_v0 }
 0x342   :  { %797 = vmatpush1.msra.mxu0 %v2212_v25  ;;  %1777 = vmatpush3.msra.mxu1 %v2259_v39 }
 0x343   :  { %798 = vmatprep.subr.mxu0 %v2216_v26  ;;  %1778 = vmatprep.subr.mxu1 %v2949_v0 }
 0x344   :  { %799 = vmatpush1.msra.mxu0 %v2222_v28  ;;  %1779 = vmatpush3.msra.mxu1 %v2269_v42 }
 0x345   :  { %800 = vmatprep.subr.mxu0 %v2226_v29  ;;  %1780 = vmatprep.subr.mxu1 %v2949_v0 }
 0x346   :  { %801 = vmatpush1.msra.mxu0 %v2232_v31  ;;  %1781 = vmatpush3.msra.mxu1 %v2277_v44 }
 0x347   :  { %802 = vmatprep.subr.mxu0 %v2236_v32  ;;  %1782 = vmatprep.subr.mxu1 %v2949_v0 }
 0x348   :  { %803 = vmatpush1.msra.mxu0 %v2242_v34  ;;  %1783 = vmatpush3.msra.mxu1 %v2283_v45 }
 0x349   :  { %804 = vmatprep.subr.mxu0 %v2246_v35  ;;  %1784 = vmatprep.subr.mxu1 %v2949_v0 }
 0x34a   :  { %805 = vmatpush1.msra.mxu0 %v2252_v37  ;;  %1785 = vmatpush3.msra.mxu1 %v2288_v46 }
 0x34b   :  { %806 = vmatprep.subr.mxu0 %v2256_v38  ;;  %1786 = vmatprep.subr.mxu1 %v2949_v0 }
 0x34c   :  { %807 = vmatpush1.msra.mxu0 %v2956_v49  ;;  %1787 = vmatpush3.msra.mxu1 %v2957_v1 }
 0x34d   :  { %808 = vmatprep.subr.mxu0 %v2958_v40  ;;  %1788 = vmatprep.subr.mxu1 %v2949_v0 }
 0x34e   :  { %809 = vmatpush1.msra.mxu0 %v2959_v41  ;;  %842 = vmatprep.mubr.f32.mxu0 %v2949_v0  ;;  %v609_v41 = vld [vmem:[#allocation3 + $0x58] sm:$0xff] }
 0x34f   :  { %1789 = vmatpush3.msra.mxu1 %v2960_v43  ;;  %1790 = vmatprep.mubr.msk.f32.mxu1 %vm2107_vm0, %v2949_v0 }
 0x350   :  { %946 = vmatprep.subr.mxu0 %v2961_v47  ;;  %1793 = vmatprep.subr.mxu1 %v2949_v0 }
 0x3ef   :  { %v676_v50 = vpop.f32.mrf.mxu0  ;;  %v747_v54 = vpop.f32.mrf.mxu1 }
 0x3f0   :  { %v751_v56 = vadd.f32 %v676_v50, %v607_v48  ;;  %v765_v47 = vadd.f32 %v2374_v61, %v747_v54  ;;  %v2740_v54 = vld [vmem:[#allocation6 + $0xd8] sm:$0xff] }
 0x3f1   :  { %v1757_v57 = vpop.f32.mrf.mxu1  ;;  %v678_v62 = vpop.f32.mrf.mxu0 }
 0x3f2   :  { %v1472_v55 = vmul.f32 -1.442695, %v751_v56  ;;  %v758_v63 = vadd.f32 %v678_v62, %v608_v59  ;;  %v2743_v59 = vld [vmem:[#allocation6 + $0xe8] sm:$0xff] }
 0x3f3   :  { %v2746_v62 = vld [vmem:[#allocation6 + $0xc8] sm:$0xff] }
 0x3f4   :  { %1937 = vpow2.f32 %v1472_v55  ;;  %v1473_v58 = vmul.f32 -1.442695, %v758_v63  ;;  %v2750_v63 = vld [vmem:[#allocation6 + $0xc0] sm:$0xff] }
 0x3f6   :  { %1939 = vpow2.f32 %v1473_v58  ;;  %v2753_v58 = vld [vmem:[#allocation6 + $0xd0] sm:$0xff] }
 0x401   :  { %v1938_v60 = vpop.eup %1937 }
 0x402   :  { %v755_v51 = vadd.f32 1.0, %v1938_v60  ;;  %v2756_v60 = vld [vmem:[#allocation6 + $0xb0] sm:$0xff] }
 0x403   :  { %v1940_v52 = vpop.eup %1939 }
 0x404   :  { %1941 = vrcp.f32 %v755_v51  ;;  %v762_v49 = vadd.f32 1.0, %v1940_v52  ;;  %v2760_v51 = vld [vmem:[#allocation6 + $0xa8] sm:$0xff]  ;;  %v2763_v52 = vld [vmem:[#allocation6 + $0xb8] sm:$0xff] }
 0x411   :  { %v1942_v43 = vpop.eup %1941 }
 0x412   :  { %v766_v40 = vmul.f32 %v1942_v43, %v765_v47  ;;  %v2736_v43 = vld [vmem:[#allocation6 + $0xe0] sm:$0xff]  ;;  %v2766_v47 = vld [vmem:[#allocation6 + $0x98] sm:$0xff] }
 0x414   :  { %v767_v1 = vadd.f32 %v766_v40, %v609_v41  ;;  %v2730_v40 = vld [vmem:[#allocation6 + $0xf0] sm:$0xff]  ;;  %v2733_v41 = vld [vmem:[#allocation6 + $0x100] sm:$0xff] }
 0x416   :  { %1943 = vtanh.f32 %v767_v1  ;;  %v2726_v1 = vld [vmem:[#allocation6 + $0xf8] sm:$0xff] }
 0x417   :  { %1945 = vrcp.f32 %v762_v49  ;;  %v2723_v49 = vld [vmem:[#allocation6 + $0x118] sm:$0xff] }
 0x423   :  { %v1944_v48 = vpop.eup %1943 }
 0x424   :  { %v769_v50 = vsub.f32 %v2525_v53, %v1944_v48  ;;  %v1946_v56 = vpop.eup %1945  ;;  %v2720_v53 = vld [vmem:[#allocation6 + $0x108] sm:$0xff] }
 0x426   :  { %v770_v57 = vmul.f32 %v1946_v56, %v769_v50  ;;  %v2773_v50 = vld [vmem:[#allocation6 + $0xa0] sm:$0xff] }
 0x427   :  { %v2776_v56 = vld [vmem:[#allocation6 + $0x80] sm:$0xff] }
 0x428   :  { %v2599_v55 = vadd.f32 %v1944_v48, %v770_v57  ;;  %v2770_v48 = vld [vmem:[#allocation6 + $0x90] sm:$0xff]  ;;  %v2780_v57 = vld [vmem:[#allocation6 + $0x78] sm:$0xff] }
 0x42a   :  { %773 = vst [vmem:[#allocation8 + $0x18] sm:$0xff] %v2599_v55  ;;  %843 = vmatmul.mubr.f32.vlgmr.msra.gmra.mxu0 %v2599_v55  ;;  %1791 = vmatmul.mubr.f32.vlgmr.msra.gmra.mxu1 %v2599_v55 }
 0x42b   :  { %947 = vmatpush1.msra.mxu0 %v2143_v2  ;;  %1794 = vmatpush3.msra.mxu1 %v2177_v14  ;;  %v2962_v2 = vld [vmem:[#allocation13_spill] sm:$0xff] }
 0x42c   :  { %948 = vmatprep.subr.mxu0 %v2145_v3  ;;  %1795 = vmatprep.subr.mxu1 %v2949_v0  ;;  %v2963_v3 = vld [vmem:[#allocation16_spill] sm:$0xff]  ;;  %v776_v14 = vld [vmem:[#allocation3 + $0x68] sm:$0xff] }
 0x42d   :  { %949 = vmatpush1.msra.mxu0 %v2148_v4  ;;  %1796 = vmatpush3.msra.mxu1 %v2183_v16  ;;  %v2964_v4 = vld [vmem:[#allocation14_spill] sm:$0xff] }
 0x42e   :  { %950 = vmatprep.subr.mxu0 %v2151_v5  ;;  %1797 = vmatprep.subr.mxu1 %v2949_v0  ;;  %v2965_v5 = vld [vmem:[#allocation15_spill] sm:$0xff] }
 0x42f   :  { %951 = vmatpush1.msra.mxu0 %v2154_v6  ;;  %1798 = vmatpush3.msra.mxu1 %v2189_v18  ;;  %v2966_v6 = vld [vmem:[#allocation17_spill] sm:$0xff] }
 0x430   :  { %952 = vmatprep.subr.mxu0 %v2157_v7  ;;  %1799 = vmatprep.subr.mxu1 %v2949_v0  ;;  %v2669_v7 = vld [vmem:[#allocation6 + $0x170] sm:$0xff] }
 0x431   :  { %953 = vmatpush1.msra.mxu0 %v2160_v8  ;;  %1800 = vmatpush3.msra.mxu1 %v2199_v21  ;;  %v775_v8 = vld [vmem:[#allocation3 + $0x60] sm:$0xff] }
 0x432   :  { %954 = vmatprep.subr.mxu0 %v2163_v9  ;;  %1801 = vmatprep.subr.mxu1 %v2949_v0 }
 0x433   :  { %955 = vmatpush1.msra.mxu0 %v2166_v10  ;;  %1802 = vmatpush3.msra.mxu1 %v2209_v24 }
 0x434   :  { %956 = vmatprep.subr.mxu0 %v2169_v11  ;;  %1803 = vmatprep.subr.mxu1 %v2949_v0 }
 0x435   :  { %957 = vmatpush1.msra.mxu0 %v2172_v12  ;;  %1804 = vmatpush3.msra.mxu1 %v2219_v27 }
 0x436   :  { %958 = vmatprep.subr.mxu0 %v2175_v13  ;;  %1805 = vmatprep.subr.mxu1 %v2949_v0 }
 0x437   :  { %959 = vmatpush1.msra.mxu0 %v2180_v15  ;;  %1806 = vmatpush3.msra.mxu1 %v2229_v30 }
 0x438   :  { %960 = vmatprep.subr.mxu0 %v2186_v17  ;;  %1807 = vmatprep.subr.mxu1 %v2949_v0 }
 0x439   :  { %961 = vmatpush1.msra.mxu0 %v2192_v19  ;;  %1808 = vmatpush3.msra.mxu1 %v2239_v33  ;;  %v2683_v33 = vld [vmem:[#allocation6 + $0x178] sm:$0xff] }
 0x43a   :  { %962 = vmatprep.subr.mxu0 %v2196_v20  ;;  %1809 = vmatprep.subr.mxu1 %v2949_v0 }
 0x43b   :  { %963 = vmatpush1.msra.mxu0 %v2202_v22  ;;  %1810 = vmatpush3.msra.mxu1 %v2249_v36  ;;  %v2693_v36 = vld [vmem:[#allocation6 + $0x160] sm:$0xff] }
 0x43c   :  { %964 = vmatprep.subr.mxu0 %v2206_v23  ;;  %1811 = vmatprep.subr.mxu1 %v2949_v0  ;;  %v777_v23 = vld [vmem:[#allocation3 + $0x70] sm:$0xff] }
 0x43d   :  { %965 = vmatpush1.msra.mxu0 %v2212_v25  ;;  %1812 = vmatpush3.msra.mxu1 %v2259_v39  ;;  %v2703_v39 = vld [vmem:[#allocation6 + $0x148] sm:$0xff] }
 0x43e   :  { %966 = vmatprep.subr.mxu0 %v2216_v26  ;;  %1813 = vmatprep.subr.mxu1 %v2949_v0 }
 0x43f   :  { %967 = vmatpush1.msra.mxu0 %v2222_v28  ;;  %1814 = vmatpush3.msra.mxu1 %v2269_v42  ;;  %v2706_v42 = vld [vmem:[#allocation6 + $0x128] sm:$0xff] }
 0x440   :  { %968 = vmatprep.subr.mxu0 %v2226_v29  ;;  %1815 = vmatprep.subr.mxu1 %v2949_v0 }
 0x441   :  { %969 = vmatpush1.msra.mxu0 %v2232_v31  ;;  %1816 = vmatpush3.msra.mxu1 %v2277_v44  ;;  %v2710_v44 = vld [vmem:[#allocation6 + $0x120] sm:$0xff] }
 0x442   :  { %970 = vmatprep.subr.mxu0 %v2236_v32  ;;  %1817 = vmatprep.subr.mxu1 %v2949_v0  ;;  %v2680_v32 = vld [vmem:[#allocation6 + $0x168] sm:$0xff] }
 0x443   :  { %971 = vmatpush1.msra.mxu0 %v2242_v34  ;;  %1818 = vmatpush3.msra.mxu1 %v2283_v45  ;;  %v2686_v34 = vld [vmem:[#allocation6 + $0x158] sm:$0xff]  ;;  %v2713_v45 = vld [vmem:[#allocation6 + $0x130] sm:$0xff] }
 0x444   :  { %972 = vmatprep.subr.mxu0 %v2246_v35  ;;  %1819 = vmatprep.subr.mxu1 %v2949_v0  ;;  %v2690_v35 = vld [vmem:[#allocation6 + $0x150] sm:$0xff] }
 0x445   :  { %973 = vmatpush1.msra.mxu0 %v2252_v37  ;;  %1820 = vmatpush3.msra.mxu1 %v2288_v46  ;;  %v2696_v37 = vld [vmem:[#allocation6 + $0x140] sm:$0xff]  ;;  %v2716_v46 = vld [vmem:[#allocation6 + $0x110] sm:$0xff] }
 0x446   :  { %974 = vmatprep.subr.mxu0 %v2256_v38  ;;  %1821 = vmatprep.subr.mxu1 %v2949_v0  ;;  %v2700_v38 = vld [vmem:[#allocation6 + $0x138] sm:$0xff] }
 0x447   :  { %975 = vmatpush1.msra.mxu0 %v2962_v2  ;;  %1822 = vmatpush3.msra.mxu1 %v2963_v3  ;;  %v2786_v2 = vld [vmem:[#allocation6 + $0x68] sm:$0xff]  ;;  %v2790_v3 = vld [vmem:[#allocation6 + $0x60] sm:$0xff] }
 0x448   :  { %976 = vmatprep.subr.mxu0 %v2964_v4  ;;  %1823 = vmatprep.subr.mxu1 %v2949_v0  ;;  %v2793_v4 = vld [vmem:[#allocation6 + $0x70] sm:$0xff] }
 0x449   :  { %977 = vmatpush1.msra.mxu0 %v2965_v5  ;;  %1010 = vmatprep.mubr.f32.mxu0 %v2949_v0  ;;  %v2796_v5 = vld [vmem:[#allocation6 + $0x50] sm:$0xff] }
 0x44a   :  { %1824 = vmatpush3.msra.mxu1 %v2966_v6  ;;  %1825 = vmatprep.mubr.msk.f32.mxu1 %vm2107_vm0, %v2949_v0  ;;  %v2800_v6 = vld [vmem:[#allocation6 + $0x48] sm:$0xff] }
 0x44b   :  { %1114 = vmatprep.subr.mxu0 %v2669_v7  ;;  %1828 = vmatprep.subr.mxu1 %v2949_v0 }
 0x4ea   :  { %v844_v9 = vpop.f32.mrf.mxu0  ;;  %v915_v10 = vpop.f32.mrf.mxu1 }
 0x4eb   :  { %v919_v11 = vadd.f32 %v844_v9, %v775_v8  ;;  %v933_v21 = vadd.f32 %v2374_v61, %v915_v10  ;;  %v2803_v8 = vld [vmem:[#allocation6 + $0x58] sm:$0xff]  ;;  %v2810_v10 = vld [vmem:[#allocation6 + $0x30] sm:$0xff] }
 0x4ec   :  { %v1792_v12 = vpop.f32.mrf.mxu1  ;;  %v846_v15 = vpop.f32.mrf.mxu0  ;;  %v2806_v9 = vld [vmem:[#allocation6 + $0x38] sm:$0xff] }
 0x4ed   :  { %v1474_v13 = vmul.f32 -1.442695, %v919_v11  ;;  %v926_v16 = vadd.f32 %v846_v15, %v776_v14  ;;  %v2813_v11 = vld [vmem:[#allocation6 + $0x40] sm:$0xff]  ;;  %v2823_v14 = vld [vmem:[#allocation6 + $0x28] sm:$0xff] }
 0x4ee   :  { %v2816_v12 = vld [vmem:[#allocation6 + $0x20] sm:$0xff]  ;;  %2968 = vst [vmem:[#allocation13_spill] sm:$0xff] %v2823_v14  ;;  %v2826_v15 = vld [vmem:[#allocation6 + $0x8] sm:$0xff] }
 0x4ef   :  { %1947 = vpow2.f32 %v1474_v13  ;;  %v1475_v17 = vmul.f32 -1.442695, %v926_v16  ;;  %v2820_v13 = vld [vmem:[#allocation6 + $0x18] sm:$0xff]  ;;  %2969 = vst [vmem:[#allocation16_spill] sm:$0xff] %v2826_v15  ;;  %v2830_v16 = vld [vmem:[#allocation6] sm:$0xff] }
 0x4f0   :  { %2967 = vst [vmem:[#allocation12_spill] sm:$0xff] %v2820_v13  ;;  %2970 = vst [vmem:[#allocation14_spill] sm:$0xff] %v2830_v16 }
 0x4f1   :  { %1949 = vpow2.f32 %v1475_v17  ;;  %v2834_v17 = vld [vmem:[#allocation6 + $0x10] sm:$0xff] }
 0x4f2   :  { %2971 = vst [vmem:[#allocation15_spill] sm:$0xff] %v2834_v17 }
 0x4fc   :  { %v1948_v18 = vpop.eup %1947 }
 0x4fd   :  { %v923_v19 = vadd.f32 1.0, %v1948_v18  ;;  %v943_v18 = vld [vmem:[#allocation3 + $0x78] sm:$0xff] }
 0x4fe   :  { %v1950_v20 = vpop.eup %1949 }
 0x4ff   :  { %1951 = vrcp.f32 %v923_v19  ;;  %v930_v26 = vadd.f32 1.0, %v1950_v20 }
 0x50c   :  { %v1952_v22 = vpop.eup %1951 }
 0x50d   :  { %v934_v24 = vmul.f32 %v1952_v22, %v933_v21 }
 0x50f   :  { %v935_v25 = vadd.f32 %v934_v24, %v777_v23  ;;  %v944_v24 = vld [vmem:[#allocation3 + $0x80] sm:$0xff] }
 0x511   :  { %1953 = vtanh.f32 %v935_v25 }
 0x512   :  { %1955 = vrcp.f32 %v930_v26 }
 0x51e   :  { %v1954_v27 = vpop.eup %1953 }
 0x51f   :  { %v937_v28 = vsub.f32 %v2599_v55, %v1954_v27  ;;  %v1956_v29 = vpop.eup %1955  ;;  %v2783_v55 = vld [vmem:[#allocation6 + $0x88] sm:$0xff] }
 0x521   :  { %v938_v30 = vmul.f32 %v1956_v29, %v937_v28 }
 0x523   :  { %v2675_v31 = vadd.f32 %v1954_v27, %v938_v30 }
 0x525   :  { %941 = vst [vmem:[#allocation8 + $0x20] sm:$0xff] %v2675_v31  ;;  %1011 = vmatmul.mubr.f32.vlgmr.msra.gmra.mxu0 %v2675_v31  ;;  %1826 = vmatmul.mubr.f32.vlgmr.msra.gmra.mxu1 %v2675_v31 }
 0x526   :  { %1115 = vmatpush1.msra.mxu0 %v2680_v32  ;;  %1829 = vmatpush3.msra.mxu1 %v2683_v33 }
 0x527   :  { %1116 = vmatprep.subr.mxu0 %v2686_v34  ;;  %1830 = vmatprep.subr.mxu1 %v2949_v0 }
 0x528   :  { %1117 = vmatpush1.msra.mxu0 %v2690_v35  ;;  %1831 = vmatpush3.msra.mxu1 %v2693_v36 }
 0x529   :  { %1118 = vmatprep.subr.mxu0 %v2696_v37  ;;  %1832 = vmatprep.subr.mxu1 %v2949_v0 }
 0x52a   :  { %1119 = vmatpush1.msra.mxu0 %v2700_v38  ;;  %1833 = vmatpush3.msra.mxu1 %v2703_v39 }
 0x52b   :  { %1120 = vmatprep.subr.mxu0 %v2706_v42  ;;  %1834 = vmatprep.subr.mxu1 %v2949_v0 }
 0x52c   :  { %1121 = vmatpush1.msra.mxu0 %v2710_v44  ;;  %1835 = vmatpush3.msra.mxu1 %v2713_v45 }
 0x52d   :  { %1122 = vmatprep.subr.mxu0 %v2716_v46  ;;  %1836 = vmatprep.subr.mxu1 %v2949_v0 }
 0x52e   :  { %1123 = vmatpush1.msra.mxu0 %v2720_v53  ;;  %1837 = vmatpush3.msra.mxu1 %v2723_v49 }
 0x52f   :  { %1124 = vmatprep.subr.mxu0 %v2726_v1  ;;  %1838 = vmatprep.subr.mxu1 %v2949_v0 }
 0x530   :  { %1125 = vmatpush1.msra.mxu0 %v2730_v40  ;;  %1839 = vmatpush3.msra.mxu1 %v2733_v41 }
 0x531   :  { %1126 = vmatprep.subr.mxu0 %v2736_v43  ;;  %1840 = vmatprep.subr.mxu1 %v2949_v0 }
 0x532   :  { %1127 = vmatpush1.msra.mxu0 %v2740_v54  ;;  %1841 = vmatpush3.msra.mxu1 %v2743_v59 }
 0x533   :  { %1128 = vmatprep.subr.mxu0 %v2746_v62  ;;  %1842 = vmatprep.subr.mxu1 %v2949_v0 }
 0x534   :  { %1129 = vmatpush1.msra.mxu0 %v2750_v63  ;;  %1843 = vmatpush3.msra.mxu1 %v2753_v58 }
 0x535   :  { %1130 = vmatprep.subr.mxu0 %v2756_v60  ;;  %1844 = vmatprep.subr.mxu1 %v2949_v0 }
 0x536   :  { %1131 = vmatpush1.msra.mxu0 %v2760_v51  ;;  %1845 = vmatpush3.msra.mxu1 %v2763_v52 }
 0x537   :  { %1132 = vmatprep.subr.mxu0 %v2766_v47  ;;  %1846 = vmatprep.subr.mxu1 %v2949_v0 }
 0x538   :  { %1133 = vmatpush1.msra.mxu0 %v2770_v48  ;;  %1847 = vmatpush3.msra.mxu1 %v2773_v50 }
 0x539   :  { %1134 = vmatprep.subr.mxu0 %v2776_v56  ;;  %1848 = vmatprep.subr.mxu1 %v2949_v0 }
 0x53a   :  { %1135 = vmatpush1.msra.mxu0 %v2780_v57  ;;  %1849 = vmatpush3.msra.mxu1 %v2783_v55 }
 0x53b   :  { %1136 = vmatprep.subr.mxu0 %v2786_v2  ;;  %1850 = vmatprep.subr.mxu1 %v2949_v0 }
 0x53c   :  { %1137 = vmatpush1.msra.mxu0 %v2790_v3  ;;  %1851 = vmatpush3.msra.mxu1 %v2793_v4 }
 0x53d   :  { %1138 = vmatprep.subr.mxu0 %v2796_v5  ;;  %1852 = vmatprep.subr.mxu1 %v2949_v0 }
 0x53e   :  { %1139 = vmatpush1.msra.mxu0 %v2800_v6  ;;  %1853 = vmatpush3.msra.mxu1 %v2803_v8 }
 0x53f   :  { %1140 = vmatprep.subr.mxu0 %v2806_v9  ;;  %1854 = vmatprep.subr.mxu1 %v2949_v0 }
 0x540   :  { %1141 = vmatpush1.msra.mxu0 %v2810_v10  ;;  %1855 = vmatpush3.msra.mxu1 %v2813_v11 }
 0x541   :  { %1142 = vmatprep.subr.mxu0 %v2816_v12  ;;  %1856 = vmatprep.subr.mxu1 %v2949_v0 }
 0x542   :  { %1143 = vmatpush1.msra.mxu0 %v2820_v13  ;;  %1857 = vmatpush3.msra.mxu1 %v2823_v14 }
 0x543   :  { %1144 = vmatprep.subr.mxu0 %v2826_v15  ;;  %1858 = vmatprep.subr.mxu1 %v2949_v0 }
 0x544   :  { %1145 = vmatpush1.msra.mxu0 %v2830_v16  ;;  %1178 = vmatprep.mubr.f32.mxu0 %v2949_v0  ;;  %v945_v16 = vld [vmem:[#allocation3 + $0x88] sm:$0xff] }
 0x545   :  { %1859 = vmatpush3.msra.mxu1 %v2834_v17  ;;  %1860 = vmatprep.mubr.msk.f32.mxu1 %vm2107_vm0, %v2949_v0 }
 0x546   :  { %1282 = vmatprep.subr.mxu0 %v2669_v7  ;;  %1863 = vmatprep.subr.mxu1 %v2949_v0 }
 0x5e5   :  { %v1012_v19 = vpop.f32.mrf.mxu0  ;;  %v1083_v20 = vpop.f32.mrf.mxu1 }
 0x5e6   :  { %v1087_v21 = vadd.f32 %v1012_v19, %v943_v18  ;;  %v1101_v7 = vadd.f32 %v2374_v61, %v1083_v20  ;;  %v2972_v61 = vld [vmem:[#allocation12_spill] sm:$0xff] }
 0x5e7   :  { %v1827_v22 = vpop.f32.mrf.mxu1  ;;  %v1014_v25 = vpop.f32.mrf.mxu0 }
 0x5e8   :  { %v1476_v23 = vmul.f32 -1.442695, %v1087_v21  ;;  %v1094_v26 = vadd.f32 %v1014_v25, %v944_v24 }
 0x5ea   :  { %1957 = vpow2.f32 %v1476_v23  ;;  %v1477_v27 = vmul.f32 -1.442695, %v1094_v26 }
 0x5ec   :  { %1959 = vpow2.f32 %v1477_v27 }
 0x5f7   :  { %v1958_v28 = vpop.eup %1957 }
 0x5f8   :  { %v1091_v29 = vadd.f32 1.0, %v1958_v28 }
 0x5f9   :  { %v1960_v30 = vpop.eup %1959 }
 0x5fa   :  { %1961 = vrcp.f32 %v1091_v29  ;;  %v1098_v13 = vadd.f32 1.0, %v1960_v30 }
 0x607   :  { %v1962_v17 = vpop.eup %1961 }
 0x608   :  { %v1102_v15 = vmul.f32 %v1962_v17, %v1101_v7 }
 0x60a   :  { %v1103_v14 = vadd.f32 %v1102_v15, %v945_v16 }
 0x60c   :  { %1963 = vtanh.f32 %v1103_v14 }
 0x60d   :  { %1965 = vrcp.f32 %v1098_v13  ;;  %v1281_v13 = vld [vmem:[#allocation3 + $0xb8] sm:$0xff] }
 0x619   :  { %v1964_v18 = vpop.eup %1963 }
 0x61a   :  { %v1105_v19 = vsub.f32 %v2675_v31, %v1964_v18  ;;  %v1966_v21 = vpop.eup %1965  ;;  %v2973_v31 = vld [vmem:[#allocation13_spill] sm:$0xff] }
 0x61c   :  { %v1106_v22 = vmul.f32 %v1966_v21, %v1105_v19 }
 0x61e   :  { %v2843_v23 = vadd.f32 %v1964_v18, %v1106_v22 }
 0x620   :  { %1109 = vst [vmem:[#allocation8 + $0x28] sm:$0xff] %v2843_v23  ;;  %1179 = vmatmul.mubr.f32.vlgmr.msra.gmra.mxu0 %v2843_v23  ;;  %1861 = vmatmul.mubr.f32.vlgmr.msra.gmra.mxu1 %v2843_v23 }
 0x621   :  { %1283 = vmatpush1.msra.mxu0 %v2680_v32  ;;  %1864 = vmatpush3.msra.mxu1 %v2683_v33  ;;  %v2974_v32 = vld [vmem:[#allocation16_spill] sm:$0xff]  ;;  %v2975_v33 = vld [vmem:[#allocation14_spill] sm:$0xff] }
 0x622   :  { %1284 = vmatprep.subr.mxu0 %v2686_v34  ;;  %1865 = vmatprep.subr.mxu1 %v2949_v0  ;;  %v2976_v34 = vld [vmem:[#allocation15_spill] sm:$0xff] }
 0x623   :  { %1285 = vmatpush1.msra.mxu0 %v2690_v35  ;;  %1866 = vmatpush3.msra.mxu1 %v2693_v36  ;;  %v1111_v35 = vld [vmem:[#allocation3 + $0x90] sm:$0xff] }
 0x624   :  { %1286 = vmatprep.subr.mxu0 %v2696_v37  ;;  %1867 = vmatprep.subr.mxu1 %v2949_v0 }
 0x625   :  { %1287 = vmatpush1.msra.mxu0 %v2700_v38  ;;  %1868 = vmatpush3.msra.mxu1 %v2703_v39 }
 0x626   :  { %1288 = vmatprep.subr.mxu0 %v2706_v42  ;;  %1869 = vmatprep.subr.mxu1 %v2949_v0 }
 0x627   :  { %1289 = vmatpush1.msra.mxu0 %v2710_v44  ;;  %1870 = vmatpush3.msra.mxu1 %v2713_v45  ;;  %v1112_v44 = vld [vmem:[#allocation3 + $0x98] sm:$0xff] }
 0x628   :  { %1290 = vmatprep.subr.mxu0 %v2716_v46  ;;  %1871 = vmatprep.subr.mxu1 %v2949_v0 }
 0x629   :  { %1291 = vmatpush1.msra.mxu0 %v2720_v53  ;;  %1872 = vmatpush3.msra.mxu1 %v2723_v49 }
 0x62a   :  { %1292 = vmatprep.subr.mxu0 %v2726_v1  ;;  %1873 = vmatprep.subr.mxu1 %v2949_v0 }
 0x62b   :  { %1293 = vmatpush1.msra.mxu0 %v2730_v40  ;;  %1874 = vmatpush3.msra.mxu1 %v2733_v41 }
 0x62c   :  { %1294 = vmatprep.subr.mxu0 %v2736_v43  ;;  %1875 = vmatprep.subr.mxu1 %v2949_v0 }
 0x62d   :  { %1295 = vmatpush1.msra.mxu0 %v2740_v54  ;;  %1876 = vmatpush3.msra.mxu1 %v2743_v59  ;;  %v1113_v54 = vld [vmem:[#allocation3 + $0xa0] sm:$0xff] }
 0x62e   :  { %1296 = vmatprep.subr.mxu0 %v2746_v62  ;;  %1877 = vmatprep.subr.mxu1 %v2949_v0 }
 0x62f   :  { %1297 = vmatpush1.msra.mxu0 %v2750_v63  ;;  %1878 = vmatpush3.msra.mxu1 %v2753_v58 }
 0x630   :  { %1298 = vmatprep.subr.mxu0 %v2756_v60  ;;  %1879 = vmatprep.subr.mxu1 %v2949_v0 }
 0x631   :  { %1299 = vmatpush1.msra.mxu0 %v2760_v51  ;;  %1880 = vmatpush3.msra.mxu1 %v2763_v52 }
 0x632   :  { %1300 = vmatprep.subr.mxu0 %v2766_v47  ;;  %1881 = vmatprep.subr.mxu1 %v2949_v0 }
 0x633   :  { %1301 = vmatpush1.msra.mxu0 %v2770_v48  ;;  %1882 = vmatpush3.msra.mxu1 %v2773_v50  ;;  %v1279_v48 = vld [vmem:[#allocation3 + $0xa8] sm:$0xff] }
 0x634   :  { %1302 = vmatprep.subr.mxu0 %v2776_v56  ;;  %1883 = vmatprep.subr.mxu1 %v2949_v0 }
 0x635   :  { %1303 = vmatpush1.msra.mxu0 %v2780_v57  ;;  %1884 = vmatpush3.msra.mxu1 %v2783_v55 }
 0x636   :  { %1304 = vmatprep.subr.mxu0 %v2786_v2  ;;  %1885 = vmatprep.subr.mxu1 %v2949_v0 }
 0x637   :  { %1305 = vmatpush1.msra.mxu0 %v2790_v3  ;;  %1886 = vmatpush3.msra.mxu1 %v2793_v4  ;;  %v1280_v3 = vld [vmem:[#allocation3 + $0xb0] sm:$0xff] }
 0x638   :  { %1306 = vmatprep.subr.mxu0 %v2796_v5  ;;  %1887 = vmatprep.subr.mxu1 %v2949_v0 }
 0x639   :  { %1307 = vmatpush1.msra.mxu0 %v2800_v6  ;;  %1888 = vmatpush3.msra.mxu1 %v2803_v8 }
 0x63a   :  { %1308 = vmatprep.subr.mxu0 %v2806_v9  ;;  %1889 = vmatprep.subr.mxu1 %v2949_v0 }
 0x63b   :  { %1309 = vmatpush1.msra.mxu0 %v2810_v10  ;;  %1890 = vmatpush3.msra.mxu1 %v2813_v11 }
 0x63c   :  { %1310 = vmatprep.subr.mxu0 %v2816_v12  ;;  %1891 = vmatprep.subr.mxu1 %v2949_v0 }
 0x63d   :  { %1311 = vmatpush1.msra.mxu0 %v2972_v61  ;;  %1892 = vmatpush3.msra.mxu1 %v2973_v31 }
 0x63e   :  { %1312 = vmatprep.subr.mxu0 %v2974_v32  ;;  %1893 = vmatprep.subr.mxu1 %v2949_v0 }
 0x63f   :  { %1313 = vmatpush1.msra.mxu0 %v2975_v33  ;;  %1346 = vmatprep.mubr.f32.mxu0 %v2949_v0 }
 0x640   :  { %1894 = vmatpush3.msra.mxu1 %v2976_v34  ;;  %1895 = vmatprep.mubr.msk.f32.mxu1 %vm2107_vm0, %v2949_v0  ;;  %v2035_v0 = vld [vmem:[%s2922_s2] ss:$0 sm:$0xff]  ;;  %s2108_s2 = smov [#allocation8]  }
 0x641   :  { %s1452_s26 = sshll.u32 %s2108_s2, 4  ;;  %s1453_s26 = int_to_ptr.vmem [resolvable:$true] %s1452_s26 }
 0x642   :  { %s2076_s27 = scalar_lea.vmem %s1453_s26, 1024  ;;  %p2081_p11 = scmp.lt.s32.totalorder %s1453_s26, %s1453_s26 }
 0x643   :  { %p2077_p10 = scmp.ne.s32.totalorder %s1453_s26, %s2076_s27  ;;  %p2082_p12 = scmp.lt.s32.totalorder %s2076_s27, %s2076_s27 }
 0x645   :  { %p2083_p13 = por %p2082_p12, %p2081_p11 }
 0x647   :  { %p2084_p0 = pnand %p2083_p13, %p2077_p10 }
 0x6e0   :  { %v1180_v36 = vpop.f32.mrf.mxu0  ;;  %v1251_v37 = vpop.f32.mrf.mxu1 }
 0x6e1   :  { %v1255_v38 = vadd.f32 %v1180_v36, %v1111_v35  ;;  %v1269_v41 = vadd.f32 %v2035_v0, %v1251_v37 }
 0x6e2   :  { %v1862_v39 = vpop.f32.mrf.mxu1  ;;  %v1182_v45 = vpop.f32.mrf.mxu0 }
 0x6e3   :  { %v1478_v42 = vmul.f32 -1.442695, %v1255_v38  ;;  %v1262_v46 = vadd.f32 %v1182_v45, %v1112_v44 }
 0x6e5   :  { %1967 = vpow2.f32 %v1478_v42  ;;  %v1479_v53 = vmul.f32 -1.442695, %v1262_v46 }
 0x6e7   :  { %1969 = vpow2.f32 %v1479_v53 }
 0x6f2   :  { %v1968_v49 = vpop.eup %1967 }
 0x6f3   :  { %v1259_v1 = vadd.f32 1.0, %v1968_v49 }
 0x6f4   :  { %v1970_v40 = vpop.eup %1969 }
 0x6f5   :  { %1971 = vrcp.f32 %v1259_v1  ;;  %v1266_v63 = vadd.f32 1.0, %v1970_v40 }
 0x702   :  { %v1972_v43 = vpop.eup %1971 }
 0x703   :  { %v1270_v59 = vmul.f32 %v1972_v43, %v1269_v41 }
 0x705   :  { %v1271_v62 = vadd.f32 %v1270_v59, %v1113_v54 }
 0x707   :  { %1973 = vtanh.f32 %v1271_v62 }
 0x708   :  { %1975 = vrcp.f32 %v1266_v63 }
 0x714   :  { %v1974_v58 = vpop.eup %1973 }
 0x715   :  { %v1273_v60 = vsub.f32 %v2843_v23, %v1974_v58  ;;  %v1976_v51 = vpop.eup %1975 }
 0x717   :  { %v1274_v52 = vmul.f32 %v1976_v51, %v1273_v60 }
 0x719   :  { %v1275_v47 = vadd.f32 %v1974_v58, %v1274_v52 }
 0x71b   :  { %1277 = vst [vmem:[#allocation8 + $0x30] sm:$0xff] %v1275_v47  ;;  %1347 = vmatmul.mubr.f32.vlgmr.msra.gmra.mxu0 %v1275_v47  ;;  %1896 = vmatmul.mubr.f32.vlgmr.msra.gmra.mxu1 %v1275_v47 }
 0x7db   :  { %v1348_v50 = vpop.f32.mrf.mxu0  ;;  %v1419_v56 = vpop.f32.mrf.mxu1 }
 0x7dc   :  { %v1423_v57 = vadd.f32 %v1348_v50, %v1279_v48  ;;  %v1437_v11 = vadd.f32 %v2035_v0, %v1419_v56 }
 0x7dd   :  { %v1897_v55 = vpop.f32.mrf.mxu1  ;;  %v1350_v4 = vpop.f32.mrf.mxu0 }
 0x7de   :  { %v1480_v2 = vmul.f32 -1.442695, %v1423_v57  ;;  %v1430_v5 = vadd.f32 %v1350_v4, %v1280_v3 }
 0x7e0   :  { %1977 = vpow2.f32 %v1480_v2  ;;  %v1481_v6 = vmul.f32 -1.442695, %v1430_v5 }
 0x7e2   :  { %1979 = vpow2.f32 %v1481_v6 }
 0x7ed   :  { %v1978_v8 = vpop.eup %1977 }
 0x7ee   :  { %v1427_v9 = vadd.f32 1.0, %v1978_v8 }
 0x7ef   :  { %v1980_v10 = vpop.eup %1979 }
 0x7f0   :  { %1981 = vrcp.f32 %v1427_v9  ;;  %v1434_v16 = vadd.f32 1.0, %v1980_v10 }
 0x7fd   :  { %v1982_v12 = vpop.eup %1981 }
 0x7fe   :  { %v1438_v14 = vmul.f32 %v1982_v12, %v1437_v11 }
 0x800   :  { %v1439_v15 = vadd.f32 %v1438_v14, %v1281_v13 }
 0x802   :  { %1983 = vtanh.f32 %v1439_v15 }
 0x803   :  { %1985 = vrcp.f32 %v1434_v16 }
 0x80f   :  { %v1984_v17 = vpop.eup %1983 }
 0x810   :  { %v1441_v20 = vsub.f32 %v1275_v47, %v1984_v17  ;;  %v1986_v24 = vpop.eup %1985 }
 0x812   :  { %v1442_v25 = vmul.f32 %v1986_v24, %v1441_v20 }
 0x814   :  { %v1443_v26 = vadd.f32 %v1984_v17, %v1442_v25 }
 0x816   :  { %1445 = vst [vmem:[#allocation8 + $0x38] sm:$0xff] %v1443_v26 }
 0x817   :  { %2087 = shalt.err (!%p2084_p0)
}
 0x818   :  { %s2109_s28 = smov 128   ;;  %s2110_s29 = smov 8  }
 0x819   :  { %1458 = dma.vmem_to_hbm [thread:$0]  %s1453_s26, 1024, %s2923_s3, [#allocation5], %s2109_s28, %s2109_s28, %s2110_s29  }
 0x81a   :  { %2100 = dma.done.wait [#allocation5], 1024  }
 0x81b   :  { %2101 = vsyncadd [#allocation5], 4294966272 }
 0x81c   :  { %1462 = vsyncpa [#allocation4], 1 }
 0x81d   :  { %1463 = vsyncpa [#allocation7], 1 }
 0x81e   :  { %1464 = vsyncpa [#allocation5], 1 }

// kernel: tpu_custom_call.1
= control target key start
LH: loop header
LB: loop body
LE: loop exit
PB: predicated region body
PF: predicated region fallthrough
CT: control target
= control target key end

     0   :  { %8 = vsyncpa [#allocation4], 0  ;;  %s2920_s0 = inlined_call_operand.hbm [shape: f32[8,8,384], index: 0, kind: input, shape index: {}]   ;;  %s2921_s1 = inlined_call_operand.hbm [shape: f32[128,384], index: 1, kind: input, shape index: {}]   ;;  %s2922_s2 = inlined_call_operand.vmem [shape: f32[1,128], index: 2, kind: input, shape index: {}]   ;;  %s2923_s3 = inlined_call_operand.hbm [shape: f32[8,8,128], index: 3, kind: output, shape index: {}]  }
   0x1   :  { %9 = vsyncpa [#allocation7], 0 }
   0x2   :  { %10 = vsyncpa [#allocation5], 0  ;;  %s2102_s12 = smov [#allocation3]  }
   0x3   :  { %s16_s13 = sshll.u32 %s2102_s12, 4  ;;  %s17_s13 = int_to_ptr.vmem [resolvable:$true] %s16_s13 }
   0x4   :  { %s2044_s14 = scalar_lea.vmem %s17_s13, 3072  ;;  %p2049_p1 = scmp.lt.s32.totalorder %s17_s13, %s17_s13 }
   0x5   :  { %p2045_p0 = scmp.ne.s32.totalorder %s17_s13, %s2044_s14  ;;  %p2050_p2 = scmp.lt.s32.totalorder %s2044_s14, %s2044_s14 }
   0x7   :  { %p2051_p3 = por %p2050_p2, %p2049_p1 }
   0x9   :  { %p2052_p4 = pnand %p2051_p3, %p2045_p0 }
   0xb   :  { %2055 = shalt.err (!%p2052_p4)
}
   0xc   :  { %s2103_s15 = smov 384   ;;  %s2104_s16 = smov 24  }
   0xd   :  { %22 = dma.hbm_to_vmem [thread:$0]  %s2920_s0, 3072, %s17_s13, [#allocation4], %s2103_s15, %s2103_s15, %s2104_s16  }
   0xe   :  { %s2105_s19 = smov [#allocation6]  }
   0xf   :  { %s28_s20 = sshll.u32 %s2105_s19, 4  ;;  %s29_s20 = int_to_ptr.vmem [resolvable:$true] %s28_s20 }
  0x10   :  { %s2064_s21 = scalar_lea.vmem %s29_s20, 6144  ;;  %p2069_p6 = scmp.lt.s32.totalorder %s29_s20, %s29_s20 }
  0x11   :  { %p2065_p5 = scmp.ne.s32.totalorder %s29_s20, %s2064_s21  ;;  %p2070_p7 = scmp.lt.s32.totalorder %s2064_s21, %s2064_s21 }
  0x13   :  { %p2071_p8 = por %p2070_p7, %p2069_p6 }
  0x15   :  { %p2072_p9 = pnand %p2071_p8, %p2065_p5 }
  0x17   :  { %2075 = shalt.err (!%p2072_p9)
}
  0x18   :  { %34 = dma.hbm_to_vmem [thread:$0]  %s2921_s1, 6144, %s29_s20, [#allocation7], %s2103_s15, %s2103_s15, %s2104_s16  }
  0x19   :  { %2096 = dma.done.wait [#allocation4], 3072  }
  0x1a   :  { %2097 = vsyncadd [#allocation4], 4294964224 }
  0x1b   :  { %2098 = dma.done.wait [#allocation7], 6144  }
  0x1c   :  { %2099 = vsyncadd [#allocation7], 4294961152  ;;  %v2924_v0 = vmov 0.0   ;;  %vm2107_vm0 = vmmov 0   ;;  %v2141_v1 = vld [vmem:[#allocation6 + $0x170] sm:$0xff]  ;;  %v2143_v2 = vld [vmem:[#allocation6 + $0x168] sm:$0xff] }
  0x1d   :  { %1618 = vmatprep.subr.mxu1 %v2924_v0  ;;  %171 = vmatprep.mubr.f32.mxu0 %v2924_v0  ;;  %2943 = vst [vmem:[#allocation12_spill] sm:$0xff] %v2141_v1  ;;  %v2145_v3 = vld [vmem:[#allocation6 + $0x158] sm:$0xff]  ;;  %v2148_v4 = vld [vmem:[#allocation6 + $0x150] sm:$0xff]  ;;  %v2151_v5 = vld [vmem:[#allocation6 + $0x140] sm:$0xff] }
  0x1e   :  { %1650 = vmatprep.mubr.msk.f32.mxu1 %vm2107_vm0, %v2924_v0  ;;  %107 = vmatprep.subr.mxu0 %v2141_v1  ;;  %v2154_v6 = vld [vmem:[#allocation6 + $0x138] sm:$0xff]  ;;  %v2157_v7 = vld [vmem:[#allocation6 + $0x128] sm:$0xff]  ;;  %v2160_v8 = vld [vmem:[#allocation6 + $0x120] sm:$0xff] }
  0x1f   :  { %108 = vmatpush1.msra.mxu0 %v2143_v2  ;;  %v2163_v9 = vld [vmem:[#allocation6 + $0x110] sm:$0xff]  ;;  %v2166_v10 = vld [vmem:[#allocation6 + $0x108] sm:$0xff]  ;;  %v2169_v11 = vld [vmem:[#allocation6 + $0xf8] sm:$0xff] }
  0x20   :  { %109 = vmatprep.subr.mxu0 %v2145_v3  ;;  %v2172_v12 = vld [vmem:[#allocation6 + $0xf0] sm:$0xff]  ;;  %v2175_v13 = vld [vmem:[#allocation6 + $0xe0] sm:$0xff]  ;;  %v2177_v14 = vld [vmem:[#allocation6 + $0x178] sm:$0xff] }
  0x21   :  { %110 = vmatpush1.msra.mxu0 %v2148_v4  ;;  %v2180_v15 = vld [vmem:[#allocation6 + $0xd8] sm:$0xff]  ;;  %1619 = vmatpush3.msra.mxu1 %v2177_v14  ;;  %v2183_v16 = vld [vmem:[#allocation6 + $0x160] sm:$0xff]  ;;  %v2186_v17 = vld [vmem:[#allocation6 + $0xc8] sm:$0xff] }
  0x22   :  { %111 = vmatprep.subr.mxu0 %v2151_v5  ;;  %1620 = vmatprep.subr.mxu1 %v2924_v0  ;;  %v2189_v18 = vld [vmem:[#allocation6 + $0x148] sm:$0xff]  ;;  %v2192_v19 = vld [vmem:[#allocation6 + $0xc0] sm:$0xff]  ;;  %v2196_v20 = vld [vmem:[#allocation6 + $0xb0] sm:$0xff] }
  0x23   :  { %112 = vmatpush1.msra.mxu0 %v2154_v6  ;;  %1621 = vmatpush3.msra.mxu1 %v2183_v16  ;;  %v2199_v21 = vld [vmem:[#allocation6 + $0x130] sm:$0xff]  ;;  %v2202_v22 = vld [vmem:[#allocation6 + $0xa8] sm:$0xff]  ;;  %v2206_v23 = vld [vmem:[#allocation6 + $0x98] sm:$0xff] }
  0x24   :  { %113 = vmatprep.subr.mxu0 %v2157_v7  ;;  %1622 = vmatprep.subr.mxu1 %v2924_v0  ;;  %v2209_v24 = vld [vmem:[#allocation6 + $0x118] sm:$0xff]  ;;  %v2212_v25 = vld [vmem:[#allocation6 + $0x90] sm:$0xff]  ;;  %v2216_v26 = vld [vmem:[#allocation6 + $0x80] sm:$0xff] }
  0x25   :  { %114 = vmatpush1.msra.mxu0 %v2160_v8  ;;  %1623 = vmatpush3.msra.mxu1 %v2189_v18  ;;  %v2219_v27 = vld [vmem:[#allocation6 + $0x100] sm:$0xff]  ;;  %v2222_v28 = vld [vmem:[#allocation6 + $0x78] sm:$0xff]  ;;  %v2226_v29 = vld [vmem:[#allocation6 + $0x68] sm:$0xff] }
  0x26   :  { %115 = vmatprep.subr.mxu0 %v2163_v9  ;;  %1624 = vmatprep.subr.mxu1 %v2924_v0  ;;  %v2229_v30 = vld [vmem:[#allocation6 + $0xe8] sm:$0xff]  ;;  %v2232_v31 = vld [vmem:[#allocation6 + $0x60] sm:$0xff]  ;;  %v2236_v32 = vld [vmem:[#allocation6 + $0x50] sm:$0xff] }
  0x27   :  { %116 = vmatpush1.msra.mxu0 %v2166_v10  ;;  %1625 = vmatpush3.msra.mxu1 %v2199_v21  ;;  %v2239_v33 = vld [vmem:[#allocation6 + $0xd0] sm:$0xff]  ;;  %v2242_v34 = vld [vmem:[#allocation6 + $0x48] sm:$0xff]  ;;  %v2246_v35 = vld [vmem:[#allocation6 + $0x38] sm:$0xff] }
  0x28   :  { %117 = vmatprep.subr.mxu0 %v2169_v11  ;;  %1626 = vmatprep.subr.mxu1 %v2924_v0  ;;  %v2249_v36 = vld [vmem:[#allocation6 + $0xb8] sm:$0xff]  ;;  %v2252_v37 = vld [vmem:[#allocation6 + $0x30] sm:$0xff]  ;;  %v2256_v38 = vld [vmem:[#allocation6 + $0x20] sm:$0xff] }
  0x29   :  { %118 = vmatpush1.msra.mxu0 %v2172_v12  ;;  %1627 = vmatpush3.msra.mxu1 %v2209_v24  ;;  %v2259_v39 = vld [vmem:[#allocation6 + $0xa0] sm:$0xff]  ;;  %v2262_v40 = vld [vmem:[#allocation6 + $0x18] sm:$0xff]  ;;  %v2266_v41 = vld [vmem:[#allocation6 + $0x8] sm:$0xff] }
  0x2a   :  { %119 = vmatprep.subr.mxu0 %v2175_v13  ;;  %1628 = vmatprep.subr.mxu1 %v2924_v0  ;;  %2944 = vst [vmem:[#allocation13_spill] sm:$0xff] %v2262_v40  ;;  %2945 = vst [vmem:[#allocation14_spill] sm:$0xff] %v2266_v41  ;;  %v2269_v42 = vld [vmem:[#allocation6 + $0x88] sm:$0xff]  ;;  %v2272_v43 = vld [vmem:[#allocation6] sm:$0xff] }
  0x2b   :  { %120 = vmatpush1.msra.mxu0 %v2180_v15  ;;  %1629 = vmatpush3.msra.mxu1 %v2219_v27  ;;  %2946 = vst [vmem:[#allocation15_spill] sm:$0xff] %v2272_v43  ;;  %v2277_v44 = vld [vmem:[#allocation6 + $0x70] sm:$0xff]  ;;  %v2283_v45 = vld [vmem:[#allocation6 + $0x58] sm:$0xff]  ;;  %v2288_v46 = vld [vmem:[#allocation6 + $0x40] sm:$0xff] }
  0x2c   :  { %121 = vmatprep.subr.mxu0 %v2186_v17  ;;  %1630 = vmatprep.subr.mxu1 %v2924_v0  ;;  %v2294_v47 = vld [vmem:[#allocation6 + $0x28] sm:$0xff]  ;;  %v2300_v48 = vld [vmem:[#allocation6 + $0x10] sm:$0xff]  ;;  %v104_v49 = vld [vmem:[#allocation3] sm:$0xff] }
  0x2d   :  { %122 = vmatpush1.msra.mxu0 %v2192_v19  ;;  %1631 = vmatpush3.msra.mxu1 %v2229_v30  ;;  %2947 = vst [vmem:[#allocation16_spill] sm:$0xff] %v2294_v47  ;;  %2948 = vst [vmem:[#allocation17_spill] sm:$0xff] %v2300_v48  ;;  %v105_v53 = vld [vmem:[#allocation3 + $0x8] sm:$0xff]  ;;  %v2374_v61 = vld [vmem:[%s2922_s2] ss:$0 sm:$0xff] }
  0x2e   :  { %123 = vmatprep.subr.mxu0 %v2196_v20  ;;  %1632 = vmatprep.subr.mxu1 %v2924_v0 }
  0x2f   :  { %124 = vmatpush1.msra.mxu0 %v2202_v22  ;;  %1633 = vmatpush3.msra.mxu1 %v2239_v33 }
  0x30   :  { %125 = vmatprep.subr.mxu0 %v2206_v23  ;;  %1634 = vmatprep.subr.mxu1 %v2924_v0 }
  0x31   :  { %126 = vmatpush1.msra.mxu0 %v2212_v25  ;;  %1635 = vmatpush3.msra.mxu1 %v2249_v36 }
  0x32   :  { %127 = vmatprep.subr.mxu0 %v2216_v26  ;;  %1636 = vmatprep.subr.mxu1 %v2924_v0 }
  0x33   :  { %128 = vmatpush1.msra.mxu0 %v2222_v28  ;;  %1637 = vmatpush3.msra.mxu1 %v2259_v39 }
  0x34   :  { %129 = vmatprep.subr.mxu0 %v2226_v29  ;;  %1638 = vmatprep.subr.mxu1 %v2924_v0 }
  0x35   :  { %130 = vmatpush1.msra.mxu0 %v2232_v31  ;;  %1639 = vmatpush3.msra.mxu1 %v2269_v42 }
  0x36   :  { %131 = vmatprep.subr.mxu0 %v2236_v32  ;;  %1640 = vmatprep.subr.mxu1 %v2924_v0 }
  0x37   :  { %132 = vmatpush1.msra.mxu0 %v2242_v34  ;;  %1641 = vmatpush3.msra.mxu1 %v2277_v44 }
  0x38   :  { %133 = vmatprep.subr.mxu0 %v2246_v35  ;;  %1642 = vmatprep.subr.mxu1 %v2924_v0 }
  0x39   :  { %134 = vmatpush1.msra.mxu0 %v2252_v37  ;;  %1643 = vmatpush3.msra.mxu1 %v2283_v45 }
  0x3a   :  { %135 = vmatprep.subr.mxu0 %v2256_v38  ;;  %1644 = vmatprep.subr.mxu1 %v2924_v0 }
  0x3b   :  { %136 = vmatpush1.msra.mxu0 %v2262_v40  ;;  %1645 = vmatpush3.msra.mxu1 %v2288_v46 }
  0x3c   :  { %137 = vmatprep.subr.mxu0 %v2266_v41  ;;  %1646 = vmatprep.subr.mxu1 %v2924_v0 }
  0x3d   :  { %138 = vmatpush1.msra.mxu0 %v2272_v43  ;;  %1647 = vmatpush3.msra.mxu1 %v2294_v47 }
  0x3e   :  { %172 = vmatmul.mubr.f32.vlgmr.msra.gmra.mxu0 %v2924_v0  ;;  %274 = vmatprep.subr.mxu0 %v2141_v1 }
  0x3f   :  { %275 = vmatpush1.msra.mxu0 %v2143_v2  ;;  %1648 = vmatprep.subr.mxu1 %v2924_v0 }
  0x40   :  { %276 = vmatprep.subr.mxu0 %v2145_v3  ;;  %1649 = vmatpush3.msra.mxu1 %v2300_v48 }
  0x41   :  { %277 = vmatpush1.msra.mxu0 %v2148_v4  ;;  %1651 = vmatmul.mubr.f32.vlgmr.msra.gmra.mxu1 %v2924_v0 }
  0x42   :  { %278 = vmatprep.subr.mxu0 %v2151_v5  ;;  %1653 = vmatprep.subr.mxu1 %v2924_v0 }
  0x43   :  { %279 = vmatpush1.msra.mxu0 %v2154_v6  ;;  %1654 = vmatpush3.msra.mxu1 %v2177_v14 }
  0x44   :  { %280 = vmatprep.subr.mxu0 %v2157_v7  ;;  %1655 = vmatprep.subr.mxu1 %v2924_v0 }
  0x45   :  { %281 = vmatpush1.msra.mxu0 %v2160_v8  ;;  %1656 = vmatpush3.msra.mxu1 %v2183_v16 }
  0x46   :  { %282 = vmatprep.subr.mxu0 %v2163_v9  ;;  %1657 = vmatprep.subr.mxu1 %v2924_v0 }
  0x47   :  { %283 = vmatpush1.msra.mxu0 %v2166_v10  ;;  %1658 = vmatpush3.msra.mxu1 %v2189_v18 }
  0x48   :  { %284 = vmatprep.subr.mxu0 %v2169_v11  ;;  %1659 = vmatprep.subr.mxu1 %v2924_v0 }
  0x49   :  { %285 = vmatpush1.msra.mxu0 %v2172_v12  ;;  %1660 = vmatpush3.msra.mxu1 %v2199_v21 }
  0x4a   :  { %286 = vmatprep.subr.mxu0 %v2175_v13  ;;  %1661 = vmatprep.subr.mxu1 %v2924_v0 }
  0x4b   :  { %287 = vmatpush1.msra.mxu0 %v2180_v15  ;;  %1662 = vmatpush3.msra.mxu1 %v2209_v24 }
  0x4c   :  { %288 = vmatprep.subr.mxu0 %v2186_v17  ;;  %1663 = vmatprep.subr.mxu1 %v2924_v0 }
  0x4d   :  { %289 = vmatpush1.msra.mxu0 %v2192_v19  ;;  %1664 = vmatpush3.msra.mxu1 %v2219_v27 }
  0x4e   :  { %290 = vmatprep.subr.mxu0 %v2196_v20  ;;  %1665 = vmatprep.subr.mxu1 %v2924_v0 }
  0x4f   :  { %291 = vmatpush1.msra.mxu0 %v2202_v22  ;;  %1666 = vmatpush3.msra.mxu1 %v2229_v30 }
  0x50   :  { %292 = vmatprep.subr.mxu0 %v2206_v23  ;;  %1667 = vmatprep.subr.mxu1 %v2924_v0 }
  0x51   :  { %293 = vmatpush1.msra.mxu0 %v2212_v25  ;;  %1668 = vmatpush3.msra.mxu1 %v2239_v33 }
  0x52   :  { %294 = vmatprep.subr.mxu0 %v2216_v26  ;;  %1669 = vmatprep.subr.mxu1 %v2924_v0 }
  0x53   :  { %295 = vmatpush1.msra.mxu0 %v2222_v28  ;;  %1670 = vmatpush3.msra.mxu1 %v2249_v36 }
  0x54   :  { %296 = vmatprep.subr.mxu0 %v2226_v29  ;;  %1671 = vmatprep.subr.mxu1 %v2924_v0 }
  0x55   :  { %297 = vmatpush1.msra.mxu0 %v2232_v31  ;;  %1672 = vmatpush3.msra.mxu1 %v2259_v39 }
  0x56   :  { %298 = vmatprep.subr.mxu0 %v2236_v32  ;;  %1673 = vmatprep.subr.mxu1 %v2924_v0 }
  0x57   :  { %299 = vmatpush1.msra.mxu0 %v2242_v34  ;;  %1674 = vmatpush3.msra.mxu1 %v2269_v42 }
  0x58   :  { %300 = vmatprep.subr.mxu0 %v2246_v35  ;;  %1675 = vmatprep.subr.mxu1 %v2924_v0 }
  0x59   :  { %301 = vmatpush1.msra.mxu0 %v2252_v37  ;;  %1676 = vmatpush3.msra.mxu1 %v2277_v44 }
  0x5a   :  { %302 = vmatprep.subr.mxu0 %v2256_v38  ;;  %1677 = vmatprep.subr.mxu1 %v2924_v0 }
  0x5b   :  { %303 = vmatpush1.msra.mxu0 %v2262_v40  ;;  %1678 = vmatpush3.msra.mxu1 %v2283_v45 }
  0x5c   :  { %304 = vmatprep.subr.mxu0 %v2266_v41  ;;  %338 = vmatprep.mubr.f32.mxu0 %v2924_v0 }
  0x5d   :  { %305 = vmatpush1.msra.mxu0 %v2272_v43  ;;  %1679 = vmatprep.subr.mxu1 %v2924_v0 }
  0x5e   :  { %1685 = vmatprep.mubr.msk.f32.mxu1 %vm2107_vm0, %v2924_v0  ;;  %1680 = vmatpush3.msra.mxu1 %v2288_v46 }
  0x5f   :  { %442 = vmatprep.subr.mxu0 %v2141_v1  ;;  %1681 = vmatprep.subr.mxu1 %v2924_v0 }
  0x60   :  { %1682 = vmatpush3.msra.mxu1 %v2294_v47 }
  0x61   :  { %1683 = vmatprep.subr.mxu1 %v2924_v0 }
  0x62   :  { %1684 = vmatpush3.msra.mxu1 %v2300_v48 }
  0x63   :  { %1688 = vmatprep.subr.mxu1 %v2924_v0 }
  0xfe   :  { %v173_v50 = vpop.f32.mrf.mxu0 }
  0xff   :  { %v248_v51 = vadd.f32 %v173_v50, %v104_v49  ;;  %v106_v50 = vld [vmem:[#allocation3 + $0x10] sm:$0xff] }
 0x100   :  { %v175_v54 = vpop.f32.mrf.mxu0 }
 0x101   :  { %v1466_v52 = vmul.f32 -1.442695, %v248_v51  ;;  %v244_v55 = vpop.f32.mrf.mxu1  ;;  %v255_v57 = vadd.f32 %v175_v54, %v105_v53 }
 0x102   :  { %v262_v62 = vadd.f32 %v2374_v61, %v244_v55  ;;  %v271_v55 = vld [vmem:[#allocation3 + $0x18] sm:$0xff] }
 0x103   :  { %1907 = vpow2.f32 %v1466_v52  ;;  %v1652_v56 = vpop.f32.mrf.mxu1  ;;  %v1467_v58 = vmul.f32 -1.442695, %v255_v57 }
 0x105   :  { %1909 = vpow2.f32 %v1467_v58 }
 0x110   :  { %v1908_v59 = vpop.eup %1907 }
 0x111   :  { %v252_v60 = vadd.f32 1.0, %v1908_v59 }
 0x112   :  { %v1910_v63 = vpop.eup %1909 }
 0x113   :  { %1911 = vrcp.f32 %v252_v60  ;;  %v259_v52 = vadd.f32 1.0, %v1910_v63 }
 0x120   :  { %v1912_v49 = vpop.eup %1911 }
 0x121   :  { %v263_v51 = vmul.f32 %v1912_v49, %v262_v62 }
 0x123   :  { %v264_v0 = vadd.f32 %v263_v51, %v106_v50  ;;  %v272_v50 = vld [vmem:[#allocation3 + $0x20] sm:$0xff] }
 0x125   :  { %1913 = vtanh.f32 %v264_v0  ;;  %v2949_v0 = vmov 0.0  }
 0x126   :  { %1915 = vrcp.f32 %v259_v52 }
 0x132   :  { %v1914_v53 = vpop.eup %1913 }
 0x133   :  { %v266_v54 = vsub.f32 0.0, %v1914_v53  ;;  %v1916_v56 = vpop.eup %1915 }
 0x135   :  { %v267_v57 = vmul.f32 %v1916_v56, %v266_v54 }
 0x137   :  { %v2377_v58 = vadd.f32 %v1914_v53, %v267_v57 }
 0x139   :  { %269 = vst [vmem:[#allocation8] sm:$0xff] %v2377_v58  ;;  %339 = vmatmul.mubr.f32.vlgmr.msra.gmra.mxu0 %v2377_v58  ;;  %1686 = vmatmul.mubr.f32.vlgmr.msra.gmra.mxu1 %v2377_v58 }
 0x13a   :  { %443 = vmatpush1.msra.mxu0 %v2143_v2  ;;  %1689 = vmatpush3.msra.mxu1 %v2177_v14 }
 0x13b   :  { %444 = vmatprep.subr.mxu0 %v2145_v3  ;;  %1690 = vmatprep.subr.mxu1 %v2949_v0 }
 0x13c   :  { %445 = vmatpush1.msra.mxu0 %v2148_v4  ;;  %1691 = vmatpush3.msra.mxu1 %v2183_v16 }
 0x13d   :  { %446 = vmatprep.subr.mxu0 %v2151_v5  ;;  %1692 = vmatprep.subr.mxu1 %v2949_v0 }
 0x13e   :  { %447 = vmatpush1.msra.mxu0 %v2154_v6  ;;  %1693 = vmatpush3.msra.mxu1 %v2189_v18 }
 0x13f   :  { %448 = vmatprep.subr.mxu0 %v2157_v7  ;;  %1694 = vmatprep.subr.mxu1 %v2949_v0 }
 0x140   :  { %449 = vmatpush1.msra.mxu0 %v2160_v8  ;;  %1695 = vmatpush3.msra.mxu1 %v2199_v21 }
 0x141   :  { %450 = vmatprep.subr.mxu0 %v2163_v9  ;;  %1696 = vmatprep.subr.mxu1 %v2949_v0 }
 0x142   :  { %451 = vmatpush1.msra.mxu0 %v2166_v10  ;;  %1697 = vmatpush3.msra.mxu1 %v2209_v24 }
 0x143   :  { %452 = vmatprep.subr.mxu0 %v2169_v11  ;;  %1698 = vmatprep.subr.mxu1 %v2949_v0 }
 0x144   :  { %453 = vmatpush1.msra.mxu0 %v2172_v12  ;;  %1699 = vmatpush3.msra.mxu1 %v2219_v27 }
 0x145   :  { %454 = vmatprep.subr.mxu0 %v2175_v13  ;;  %1700 = vmatprep.subr.mxu1 %v2949_v0 }
 0x146   :  { %455 = vmatpush1.msra.mxu0 %v2180_v15  ;;  %1701 = vmatpush3.msra.mxu1 %v2229_v30 }
 0x147   :  { %456 = vmatprep.subr.mxu0 %v2186_v17  ;;  %1702 = vmatprep.subr.mxu1 %v2949_v0 }
 0x148   :  { %457 = vmatpush1.msra.mxu0 %v2192_v19  ;;  %1703 = vmatpush3.msra.mxu1 %v2239_v33 }
 0x149   :  { %458 = vmatprep.subr.mxu0 %v2196_v20  ;;  %1704 = vmatprep.subr.mxu1 %v2949_v0 }
 0x14a   :  { %459 = vmatpush1.msra.mxu0 %v2202_v22  ;;  %1705 = vmatpush3.msra.mxu1 %v2249_v36 }
 0x14b   :  { %460 = vmatprep.subr.mxu0 %v2206_v23  ;;  %1706 = vmatprep.subr.mxu1 %v2949_v0 }
 0x14c   :  { %461 = vmatpush1.msra.mxu0 %v2212_v25  ;;  %1707 = vmatpush3.msra.mxu1 %v2259_v39 }
 0x14d   :  { %462 = vmatprep.subr.mxu0 %v2216_v26  ;;  %1708 = vmatprep.subr.mxu1 %v2949_v0 }
 0x14e   :  { %463 = vmatpush1.msra.mxu0 %v2222_v28  ;;  %1709 = vmatpush3.msra.mxu1 %v2269_v42 }
 0x14f   :  { %464 = vmatprep.subr.mxu0 %v2226_v29  ;;  %1710 = vmatprep.subr.mxu1 %v2949_v0 }
 0x150   :  { %465 = vmatpush1.msra.mxu0 %v2232_v31  ;;  %1711 = vmatpush3.msra.mxu1 %v2277_v44 }
 0x151   :  { %466 = vmatprep.subr.mxu0 %v2236_v32  ;;  %1712 = vmatprep.subr.mxu1 %v2949_v0 }
 0x152   :  { %467 = vmatpush1.msra.mxu0 %v2242_v34  ;;  %1713 = vmatpush3.msra.mxu1 %v2283_v45 }
 0x153   :  { %468 = vmatprep.subr.mxu0 %v2246_v35  ;;  %1714 = vmatprep.subr.mxu1 %v2949_v0 }
 0x154   :  { %469 = vmatpush1.msra.mxu0 %v2252_v37  ;;  %1715 = vmatpush3.msra.mxu1 %v2288_v46 }
 0x155   :  { %470 = vmatprep.subr.mxu0 %v2256_v38  ;;  %1716 = vmatprep.subr.mxu1 %v2949_v0 }
 0x156   :  { %471 = vmatpush1.msra.mxu0 %v2262_v40  ;;  %1717 = vmatpush3.msra.mxu1 %v2294_v47 }
 0x157   :  { %472 = vmatprep.subr.mxu0 %v2266_v41  ;;  %1718 = vmatprep.subr.mxu1 %v2949_v0 }
 0x158   :  { %473 = vmatpush1.msra.mxu0 %v2272_v43  ;;  %506 = vmatprep.mubr.f32.mxu0 %v2949_v0  ;;  %v273_v43 = vld [vmem:[#allocation3 + $0x28] sm:$0xff] }
 0x159   :  { %1719 = vmatpush3.msra.mxu1 %v2300_v48  ;;  %1720 = vmatprep.mubr.msk.f32.mxu1 %vm2107_vm0, %v2949_v0 }
 0x15a   :  { %610 = vmatprep.subr.mxu0 %v2141_v1  ;;  %1723 = vmatprep.subr.mxu1 %v2949_v0 }
 0x1f9   :  { %v340_v59 = vpop.f32.mrf.mxu0  ;;  %v411_v60 = vpop.f32.mrf.mxu1 }
 0x1fa   :  { %v415_v62 = vadd.f32 %v340_v59, %v271_v55  ;;  %v429_v1 = vadd.f32 %v2374_v61, %v411_v60 }
 0x1fb   :  { %v1687_v63 = vpop.f32.mrf.mxu1  ;;  %v342_v51 = vpop.f32.mrf.mxu0 }
 0x1fc   :  { %v1468_v49 = vmul.f32 -1.442695, %v415_v62  ;;  %v422_v52 = vadd.f32 %v342_v51, %v272_v50 }
 0x1fe   :  { %1917 = vpow2.f32 %v1468_v49  ;;  %v1469_v53 = vmul.f32 -1.442695, %v422_v52 }
 0x200   :  { %1919 = vpow2.f32 %v1469_v53 }
 0x20b   :  { %v1918_v54 = vpop.eup %1917 }
 0x20c   :  { %v419_v56 = vadd.f32 1.0, %v1918_v54  ;;  %v440_v54 = vld [vmem:[#allocation3 + $0x38] sm:$0xff] }
 0x20d   :  { %v1920_v57 = vpop.eup %1919 }
 0x20e   :  { %1921 = vrcp.f32 %v419_v56  ;;  %v426_v40 = vadd.f32 1.0, %v1920_v57 }
 0x21b   :  { %v1922_v48 = vpop.eup %1921 }
 0x21c   :  { %v430_v41 = vmul.f32 %v1922_v48, %v429_v1  ;;  %v2950_v1 = vld [vmem:[#allocation13_spill] sm:$0xff]  ;;  %v2955_v48 = vld [vmem:[#allocation12_spill] sm:$0xff] }
 0x21e   :  { %v431_v47 = vadd.f32 %v430_v41, %v273_v43  ;;  %v2952_v41 = vld [vmem:[#allocation14_spill] sm:$0xff]  ;;  %v2953_v43 = vld [vmem:[#allocation15_spill] sm:$0xff] }
 0x220   :  { %1923 = vtanh.f32 %v431_v47  ;;  %v2954_v47 = vld [vmem:[#allocation17_spill] sm:$0xff] }
 0x221   :  { %1925 = vrcp.f32 %v426_v40  ;;  %v2951_v40 = vld [vmem:[#allocation16_spill] sm:$0xff] }
 0x22d   :  { %v1924_v55 = vpop.eup %1923 }
 0x22e   :  { %v433_v59 = vsub.f32 %v2377_v58, %v1924_v55  ;;  %v1926_v62 = vpop.eup %1925  ;;  %v439_v58 = vld [vmem:[#allocation3 + $0x30] sm:$0xff] }
 0x230   :  { %v434_v63 = vmul.f32 %v1926_v62, %v433_v59 }
 0x232   :  { %v2451_v49 = vadd.f32 %v1924_v55, %v434_v63 }
 0x234   :  { %437 = vst [vmem:[#allocation8 + $0x8] sm:$0xff] %v2451_v49  ;;  %507 = vmatmul.mubr.f32.vlgmr.msra.gmra.mxu0 %v2451_v49  ;;  %1721 = vmatmul.mubr.f32.vlgmr.msra.gmra.mxu1 %v2451_v49 }
 0x235   :  { %611 = vmatpush1.msra.mxu0 %v2143_v2  ;;  %1724 = vmatpush3.msra.mxu1 %v2177_v14 }
 0x236   :  { %612 = vmatprep.subr.mxu0 %v2145_v3  ;;  %1725 = vmatprep.subr.mxu1 %v2949_v0 }
 0x237   :  { %613 = vmatpush1.msra.mxu0 %v2148_v4  ;;  %1726 = vmatpush3.msra.mxu1 %v2183_v16 }
 0x238   :  { %614 = vmatprep.subr.mxu0 %v2151_v5  ;;  %1727 = vmatprep.subr.mxu1 %v2949_v0 }
 0x239   :  { %615 = vmatpush1.msra.mxu0 %v2154_v6  ;;  %1728 = vmatpush3.msra.mxu1 %v2189_v18 }
 0x23a   :  { %616 = vmatprep.subr.mxu0 %v2157_v7  ;;  %1729 = vmatprep.subr.mxu1 %v2949_v0 }
 0x23b   :  { %617 = vmatpush1.msra.mxu0 %v2160_v8  ;;  %1730 = vmatpush3.msra.mxu1 %v2199_v21 }
 0x23c   :  { %618 = vmatprep.subr.mxu0 %v2163_v9  ;;  %1731 = vmatprep.subr.mxu1 %v2949_v0 }
 0x23d   :  { %619 = vmatpush1.msra.mxu0 %v2166_v10  ;;  %1732 = vmatpush3.msra.mxu1 %v2209_v24 }
 0x23e   :  { %620 = vmatprep.subr.mxu0 %v2169_v11  ;;  %1733 = vmatprep.subr.mxu1 %v2949_v0 }
 0x23f   :  { %621 = vmatpush1.msra.mxu0 %v2172_v12  ;;  %1734 = vmatpush3.msra.mxu1 %v2219_v27 }
 0x240   :  { %622 = vmatprep.subr.mxu0 %v2175_v13  ;;  %1735 = vmatprep.subr.mxu1 %v2949_v0 }
 0x241   :  { %623 = vmatpush1.msra.mxu0 %v2180_v15  ;;  %1736 = vmatpush3.msra.mxu1 %v2229_v30 }
 0x242   :  { %624 = vmatprep.subr.mxu0 %v2186_v17  ;;  %1737 = vmatprep.subr.mxu1 %v2949_v0 }
 0x243   :  { %625 = vmatpush1.msra.mxu0 %v2192_v19  ;;  %1738 = vmatpush3.msra.mxu1 %v2239_v33 }
 0x244   :  { %626 = vmatprep.subr.mxu0 %v2196_v20  ;;  %1739 = vmatprep.subr.mxu1 %v2949_v0 }
 0x245   :  { %627 = vmatpush1.msra.mxu0 %v2202_v22  ;;  %1740 = vmatpush3.msra.mxu1 %v2249_v36 }
 0x246   :  { %628 = vmatprep.subr.mxu0 %v2206_v23  ;;  %1741 = vmatprep.subr.mxu1 %v2949_v0 }
 0x247   :  { %629 = vmatpush1.msra.mxu0 %v2212_v25  ;;  %1742 = vmatpush3.msra.mxu1 %v2259_v39 }
 0x248   :  { %630 = vmatprep.subr.mxu0 %v2216_v26  ;;  %1743 = vmatprep.subr.mxu1 %v2949_v0 }
 0x249   :  { %631 = vmatpush1.msra.mxu0 %v2222_v28  ;;  %1744 = vmatpush3.msra.mxu1 %v2269_v42 }
 0x24a   :  { %632 = vmatprep.subr.mxu0 %v2226_v29  ;;  %1745 = vmatprep.subr.mxu1 %v2949_v0 }
 0x24b   :  { %633 = vmatpush1.msra.mxu0 %v2232_v31  ;;  %1746 = vmatpush3.msra.mxu1 %v2277_v44 }
 0x24c   :  { %634 = vmatprep.subr.mxu0 %v2236_v32  ;;  %1747 = vmatprep.subr.mxu1 %v2949_v0 }
 0x24d   :  { %635 = vmatpush1.msra.mxu0 %v2242_v34  ;;  %1748 = vmatpush3.msra.mxu1 %v2283_v45 }
 0x24e   :  { %636 = vmatprep.subr.mxu0 %v2246_v35  ;;  %1749 = vmatprep.subr.mxu1 %v2949_v0 }
 0x24f   :  { %637 = vmatpush1.msra.mxu0 %v2252_v37  ;;  %1750 = vmatpush3.msra.mxu1 %v2288_v46 }
 0x250   :  { %638 = vmatprep.subr.mxu0 %v2256_v38  ;;  %1751 = vmatprep.subr.mxu1 %v2949_v0 }
 0x251   :  { %639 = vmatpush1.msra.mxu0 %v2950_v1  ;;  %1752 = vmatpush3.msra.mxu1 %v2951_v40 }
 0x252   :  { %640 = vmatprep.subr.mxu0 %v2952_v41  ;;  %1753 = vmatprep.subr.mxu1 %v2949_v0 }
 0x253   :  { %641 = vmatpush1.msra.mxu0 %v2953_v43  ;;  %674 = vmatprep.mubr.f32.mxu0 %v2949_v0  ;;  %v441_v43 = vld [vmem:[#allocation3 + $0x40] sm:$0xff] }
 0x254   :  { %1754 = vmatpush3.msra.mxu1 %v2954_v47  ;;  %1755 = vmatprep.mubr.msk.f32.mxu1 %vm2107_vm0, %v2949_v0 }
 0x255   :  { %778 = vmatprep.subr.mxu0 %v2955_v48  ;;  %1758 = vmatprep.subr.mxu1 %v2949_v0 }
 0x2f4   :  { %v508_v60 = vpop.f32.mrf.mxu0  ;;  %v579_v50 = vpop.f32.mrf.mxu1 }
 0x2f5   :  { %v583_v51 = vadd.f32 %v508_v60, %v439_v58  ;;  %v597_v48 = vadd.f32 %v2374_v61, %v579_v50 }
 0x2f6   :  { %v1722_v52 = vpop.f32.mrf.mxu1  ;;  %v510_v56 = vpop.f32.mrf.mxu0 }
 0x2f7   :  { %v1470_v53 = vmul.f32 -1.442695, %v583_v51  ;;  %v590_v57 = vadd.f32 %v510_v56, %v440_v54 }
 0x2f9   :  { %1927 = vpow2.f32 %v1470_v53  ;;  %v1471_v55 = vmul.f32 -1.442695, %v590_v57 }
 0x2fb   :  { %1929 = vpow2.f32 %v1471_v55 }
 0x306   :  { %v1928_v59 = vpop.eup %1927 }
 0x307   :  { %v587_v62 = vadd.f32 1.0, %v1928_v59  ;;  %v608_v59 = vld [vmem:[#allocation3 + $0x50] sm:$0xff] }
 0x308   :  { %v1930_v63 = vpop.eup %1929 }
 0x309   :  { %1931 = vrcp.f32 %v587_v62  ;;  %v594_v1 = vadd.f32 1.0, %v1930_v63 }
 0x316   :  { %v1932_v47 = vpop.eup %1931 }
 0x317   :  { %v598_v41 = vmul.f32 %v1932_v47, %v597_v48  ;;  %v2961_v47 = vld [vmem:[#allocation12_spill] sm:$0xff]  ;;  %v607_v48 = vld [vmem:[#allocation3 + $0x48] sm:$0xff] }
 0x319   :  { %v599_v40 = vadd.f32 %v598_v41, %v441_v43  ;;  %v2959_v41 = vld [vmem:[#allocation15_spill] sm:$0xff]  ;;  %v2960_v43 = vld [vmem:[#allocation17_spill] sm:$0xff] }
 0x31b   :  { %1933 = vtanh.f32 %v599_v40  ;;  %v2958_v40 = vld [vmem:[#allocation14_spill] sm:$0xff] }
 0x31c   :  { %1935 = vrcp.f32 %v594_v1  ;;  %v2957_v1 = vld [vmem:[#allocation16_spill] sm:$0xff] }
 0x328   :  { %v1934_v58 = vpop.eup %1933 }
 0x329   :  { %v601_v60 = vsub.f32 %v2451_v49, %v1934_v58  ;;  %v1936_v51 = vpop.eup %1935  ;;  %v2956_v49 = vld [vmem:[#allocation13_spill] sm:$0xff] }
 0x32b   :  { %v602_v52 = vmul.f32 %v1936_v51, %v601_v60 }
 0x32d   :  { %v2525_v53 = vadd.f32 %v1934_v58, %v602_v52 }
 0x32f   :  { %605 = vst [vmem:[#allocation8 + $0x10] sm:$0xff] %v2525_v53  ;;  %675 = vmatmul.mubr.f32.vlgmr.msra.gmra.mxu0 %v2525_v53  ;;  %1756 = vmatmul.mubr.f32.vlgmr.msra.gmra.mxu1 %v2525_v53 }
 0x330   :  { %779 = vmatpush1.msra.mxu0 %v2143_v2  ;;  %1759 = vmatpush3.msra.mxu1 %v2177_v14 }
 0x331   :  { %780 = vmatprep.subr.mxu0 %v2145_v3  ;;  %1760 = vmatprep.subr.mxu1 %v2949_v0 }
 0x332   :  { %781 = vmatpush1.msra.mxu0 %v2148_v4  ;;  %1761 = vmatpush3.msra.mxu1 %v2183_v16 }
 0x333   :  { %782 = vmatprep.subr.mxu0 %v2151_v5  ;;  %1762 = vmatprep.subr.mxu1 %v2949_v0 }
 0x334   :  { %783 = vmatpush1.msra.mxu0 %v2154_v6  ;;  %1763 = vmatpush3.msra.mxu1 %v2189_v18 }
 0x335   :  { %784 = vmatprep.subr.mxu0 %v2157_v7  ;;  %1764 = vmatprep.subr.mxu1 %v2949_v0 }
 0x336   :  { %785 = vmatpush1.msra.mxu0 %v2160_v8  ;;  %1765 = vmatpush3.msra.mxu1 %v2199_v21 }
 0x337   :  { %786 = vmatprep.subr.mxu0 %v2163_v9  ;;  %1766 = vmatprep.subr.mxu1 %v2949_v0 }
 0x338   :  { %787 = vmatpush1.msra.mxu0 %v2166_v10  ;;  %1767 = vmatpush3.msra.mxu1 %v2209_v24 }
 0x339   :  { %788 = vmatprep.subr.mxu0 %v2169_v11  ;;  %1768 = vmatprep.subr.mxu1 %v2949_v0 }
 0x33a   :  { %789 = vmatpush1.msra.mxu0 %v2172_v12  ;;  %1769 = vmatpush3.msra.mxu1 %v2219_v27 }
 0x33b   :  { %790 = vmatprep.subr.mxu0 %v2175_v13  ;;  %1770 = vmatprep.subr.mxu1 %v2949_v0 }
 0x33c   :  { %791 = vmatpush1.msra.mxu0 %v2180_v15  ;;  %1771 = vmatpush3.msra.mxu1 %v2229_v30 }
 0x33d   :  { %792 = vmatprep.subr.mxu0 %v2186_v17  ;;  %1772 = vmatprep.subr.mxu1 %v2949_v0 }
 0x33e   :  { %793 = vmatpush1.msra.mxu0 %v2192_v19  ;;  %1773 = vmatpush3.msra.mxu1 %v2239_v33 }
 0x33f   :  { %794 = vmatprep.subr.mxu0 %v2196_v20  ;;  %1774 = vmatprep.subr.mxu1 %v2949_v0 }
 0x340   :  { %795 = vmatpush1.msra.mxu0 %v2202_v22  ;;  %1775 = vmatpush3.msra.mxu1 %v2249_v36 }
 0x341   :  { %796 = vmatprep.subr.mxu0 %v2206_v23  ;;  %1776 = vmatprep.subr.mxu1 %v2949_v0 }
 0x342   :  { %797 = vmatpush1.msra.mxu0 %v2212_v25  ;;  %1777 = vmatpush3.msra.mxu1 %v2259_v39 }
 0x343   :  { %798 = vmatprep.subr.mxu0 %v2216_v26  ;;  %1778 = vmatprep.subr.mxu1 %v2949_v0 }
 0x344   :  { %799 = vmatpush1.msra.mxu0 %v2222_v28  ;;  %1779 = vmatpush3.msra.mxu1 %v2269_v42 }
 0x345   :  { %800 = vmatprep.subr.mxu0 %v2226_v29  ;;  %1780 = vmatprep.subr.mxu1 %v2949_v0 }
 0x346   :  { %801 = vmatpush1.msra.mxu0 %v2232_v31  ;;  %1781 = vmatpush3.msra.mxu1 %v2277_v44 }
 0x347   :  { %802 = vmatprep.subr.mxu0 %v2236_v32  ;;  %1782 = vmatprep.subr.mxu1 %v2949_v0 }
 0x348   :  { %803 = vmatpush1.msra.mxu0 %v2242_v34  ;;  %1783 = vmatpush3.msra.mxu1 %v2283_v45 }
 0x349   :  { %804 = vmatprep.subr.mxu0 %v2246_v35  ;;  %1784 = vmatprep.subr.mxu1 %v2949_v0 }
 0x34a   :  { %805 = vmatpush1.msra.mxu0 %v2252_v37  ;;  %1785 = vmatpush3.msra.mxu1 %v2288_v46 }
 0x34b   :  { %806 = vmatprep.subr.mxu0 %v2256_v38  ;;  %1786 = vmatprep.subr.mxu1 %v2949_v0 }
 0x34c   :  { %807 = vmatpush1.msra.mxu0 %v2956_v49  ;;  %1787 = vmatpush3.msra.mxu1 %v2957_v1 }
 0x34d   :  { %808 = vmatprep.subr.mxu0 %v2958_v40  ;;  %1788 = vmatprep.subr.mxu1 %v2949_v0 }
 0x34e   :  { %809 = vmatpush1.msra.mxu0 %v2959_v41  ;;  %842 = vmatprep.mubr.f32.mxu0 %v2949_v0  ;;  %v609_v41 = vld [vmem:[#allocation3 + $0x58] sm:$0xff] }
 0x34f   :  { %1789 = vmatpush3.msra.mxu1 %v2960_v43  ;;  %1790 = vmatprep.mubr.msk.f32.mxu1 %vm2107_vm0, %v2949_v0 }
 0x350   :  { %946 = vmatprep.subr.mxu0 %v2961_v47  ;;  %1793 = vmatprep.subr.mxu1 %v2949_v0 }
 0x3ef   :  { %v676_v50 = vpop.f32.mrf.mxu0  ;;  %v747_v54 = vpop.f32.mrf.mxu1 }
 0x3f0   :  { %v751_v56 = vadd.f32 %v676_v50, %v607_v48  ;;  %v765_v47 = vadd.f32 %v2374_v61, %v747_v54  ;;  %v2740_v54 = vld [vmem:[#allocation6 + $0xd8] sm:$0xff] }
 0x3f1   :  { %v1757_v57 = vpop.f32.mrf.mxu1  ;;  %v678_v62 = vpop.f32.mrf.mxu0 }
 0x3f2   :  { %v1472_v55 = vmul.f32 -1.442695, %v751_v56  ;;  %v758_v63 = vadd.f32 %v678_v62, %v608_v59  ;;  %v2743_v59 = vld [vmem:[#allocation6 + $0xe8] sm:$0xff] }
 0x3f3   :  { %v2746_v62 = vld [vmem:[#allocation6 + $0xc8] sm:$0xff] }
 0x3f4   :  { %1937 = vpow2.f32 %v1472_v55  ;;  %v1473_v58 = vmul.f32 -1.442695, %v758_v63  ;;  %v2750_v63 = vld [vmem:[#allocation6 + $0xc0] sm:$0xff] }
 0x3f6   :  { %1939 = vpow2.f32 %v1473_v58  ;;  %v2753_v58 = vld [vmem:[#allocation6 + $0xd0] sm:$0xff] }
 0x401   :  { %v1938_v60 = vpop.eup %1937 }
 0x402   :  { %v755_v51 = vadd.f32 1.0, %v1938_v60  ;;  %v2756_v60 = vld [vmem:[#allocation6 + $0xb0] sm:$0xff] }
 0x403   :  { %v1940_v52 = vpop.eup %1939 }
 0x404   :  { %1941 = vrcp.f32 %v755_v51  ;;  %v762_v49 = vadd.f32 1.0, %v1940_v52  ;;  %v2760_v51 = vld [vmem:[#allocation6 + $0xa8] sm:$0xff]  ;;  %v2763_v52 = vld [vmem:[#allocation6 + $0xb8] sm:$0xff] }
 0x411   :  { %v1942_v43 = vpop.eup %1941 }
 0x412   :  { %v766_v40 = vmul.f32 %v1942_v43, %v765_v47  ;;  %v2736_v43 = vld [vmem:[#allocation6 + $0xe0] sm:$0xff]  ;;  %v2766_v47 = vld [vmem:[#allocation6 + $0x98] sm:$0xff] }
 0x414   :  { %v767_v1 = vadd.f32 %v766_v40, %v609_v41  ;;  %v2730_v40 = vld [vmem:[#allocation6 + $0xf0] sm:$0xff]  ;;  %v2733_v41 = vld [vmem:[#allocation6 + $0x100] sm:$0xff] }
 0x416   :  { %1943 = vtanh.f32 %v767_v1  ;;  %v2726_v1 = vld [vmem:[#allocation6 + $0xf8] sm:$0xff] }
 0x417   :  { %1945 = vrcp.f32 %v762_v49  ;;  %v2723_v49 = vld [vmem:[#allocation6 + $0x118] sm:$0xff] }
 0x423   :  { %v1944_v48 = vpop.eup %1943 }
 0x424   :  { %v769_v50 = vsub.f32 %v2525_v53, %v1944_v48  ;;  %v1946_v56 = vpop.eup %1945  ;;  %v2720_v53 = vld [vmem:[#allocation6 + $0x108] sm:$0xff] }
 0x426   :  { %v770_v57 = vmul.f32 %v1946_v56, %v769_v50  ;;  %v2773_v50 = vld [vmem:[#allocation6 + $0xa0] sm:$0xff] }
 0x427   :  { %v2776_v56 = vld [vmem:[#allocation6 + $0x80] sm:$0xff] }
 0x428   :  { %v2599_v55 = vadd.f32 %v1944_v48, %v770_v57  ;;  %v2770_v48 = vld [vmem:[#allocation6 + $0x90] sm:$0xff]  ;;  %v2780_v57 = vld [vmem:[#allocation6 + $0x78] sm:$0xff] }
 0x42a   :  { %773 = vst [vmem:[#allocation8 + $0x18] sm:$0xff] %v2599_v55  ;;  %843 = vmatmul.mubr.f32.vlgmr.msra.gmra.mxu0 %v2599_v55  ;;  %1791 = vmatmul.mubr.f32.vlgmr.msra.gmra.mxu1 %v2599_v55 }
 0x42b   :  { %947 = vmatpush1.msra.mxu0 %v2143_v2  ;;  %1794 = vmatpush3.msra.mxu1 %v2177_v14  ;;  %v2962_v2 = vld [vmem:[#allocation13_spill] sm:$0xff] }
 0x42c   :  { %948 = vmatprep.subr.mxu0 %v2145_v3  ;;  %1795 = vmatprep.subr.mxu1 %v2949_v0  ;;  %v2963_v3 = vld [vmem:[#allocation16_spill] sm:$0xff]  ;;  %v776_v14 = vld [vmem:[#allocation3 + $0x68] sm:$0xff] }
 0x42d   :  { %949 = vmatpush1.msra.mxu0 %v2148_v4  ;;  %1796 = vmatpush3.msra.mxu1 %v2183_v16  ;;  %v2964_v4 = vld [vmem:[#allocation14_spill] sm:$0xff] }
 0x42e   :  { %950 = vmatprep.subr.mxu0 %v2151_v5  ;;  %1797 = vmatprep.subr.mxu1 %v2949_v0  ;;  %v2965_v5 = vld [vmem:[#allocation15_spill] sm:$0xff] }
 0x42f   :  { %951 = vmatpush1.msra.mxu0 %v2154_v6  ;;  %1798 = vmatpush3.msra.mxu1 %v2189_v18  ;;  %v2966_v6 = vld [vmem:[#allocation17_spill] sm:$0xff] }
 0x430   :  { %952 = vmatprep.subr.mxu0 %v2157_v7  ;;  %1799 = vmatprep.subr.mxu1 %v2949_v0  ;;  %v2669_v7 = vld [vmem:[#allocation6 + $0x170] sm:$0xff] }
 0x431   :  { %953 = vmatpush1.msra.mxu0 %v2160_v8  ;;  %1800 = vmatpush3.msra.mxu1 %v2199_v21  ;;  %v775_v8 = vld [vmem:[#allocation3 + $0x60] sm:$0xff] }
 0x432   :  { %954 = vmatprep.subr.mxu0 %v2163_v9  ;;  %1801 = vmatprep.subr.mxu1 %v2949_v0 }
 0x433   :  { %955 = vmatpush1.msra.mxu0 %v2166_v10  ;;  %1802 = vmatpush3.msra.mxu1 %v2209_v24 }
 0x434   :  { %956 = vmatprep.subr.mxu0 %v2169_v11  ;;  %1803 = vmatprep.subr.mxu1 %v2949_v0 }
 0x435   :  { %957 = vmatpush1.msra.mxu0 %v2172_v12  ;;  %1804 = vmatpush3.msra.mxu1 %v2219_v27 }
 0x436   :  { %958 = vmatprep.subr.mxu0 %v2175_v13  ;;  %1805 = vmatprep.subr.mxu1 %v2949_v0 }
 0x437   :  { %959 = vmatpush1.msra.mxu0 %v2180_v15  ;;  %1806 = vmatpush3.msra.mxu1 %v2229_v30 }
 0x438   :  { %960 = vmatprep.subr.mxu0 %v2186_v17  ;;  %1807 = vmatprep.subr.mxu1 %v2949_v0 }
 0x439   :  { %961 = vmatpush1.msra.mxu0 %v2192_v19  ;;  %1808 = vmatpush3.msra.mxu1 %v2239_v33  ;;  %v2683_v33 = vld [vmem:[#allocation6 + $0x178] sm:$0xff] }
 0x43a   :  { %962 = vmatprep.subr.mxu0 %v2196_v20  ;;  %1809 = vmatprep.subr.mxu1 %v2949_v0 }
 0x43b   :  { %963 = vmatpush1.msra.mxu0 %v2202_v22  ;;  %1810 = vmatpush3.msra.mxu1 %v2249_v36  ;;  %v2693_v36 = vld [vmem:[#allocation6 + $0x160] sm:$0xff] }
 0x43c   :  { %964 = vmatprep.subr.mxu0 %v2206_v23  ;;  %1811 = vmatprep.subr.mxu1 %v2949_v0  ;;  %v777_v23 = vld [vmem:[#allocation3 + $0x70] sm:$0xff] }
 0x43d   :  { %965 = vmatpush1.msra.mxu0 %v2212_v25  ;;  %1812 = vmatpush3.msra.mxu1 %v2259_v39  ;;  %v2703_v39 = vld [vmem:[#allocation6 + $0x148] sm:$0xff] }
 0x43e   :  { %966 = vmatprep.subr.mxu0 %v2216_v26  ;;  %1813 = vmatprep.subr.mxu1 %v2949_v0 }
 0x43f   :  { %967 = vmatpush1.msra.mxu0 %v2222_v28  ;;  %1814 = vmatpush3.msra.mxu1 %v2269_v42  ;;  %v2706_v42 = vld [vmem:[#allocation6 + $0x128] sm:$0xff] }
 0x440   :  { %968 = vmatprep.subr.mxu0 %v2226_v29  ;;  %1815 = vmatprep.subr.mxu1 %v2949_v0 }
 0x441   :  { %969 = vmatpush1.msra.mxu0 %v2232_v31  ;;  %1816 = vmatpush3.msra.mxu1 %v2277_v44  ;;  %v2710_v44 = vld [vmem:[#allocation6 + $0x120] sm:$0xff] }
 0x442   :  { %970 = vmatprep.subr.mxu0 %v2236_v32  ;;  %1817 = vmatprep.subr.mxu1 %v2949_v0  ;;  %v2680_v32 = vld [vmem:[#allocation6 + $0x168] sm:$0xff] }
 0x443   :  { %971 = vmatpush1.msra.mxu0 %v2242_v34  ;;  %1818 = vmatpush3.msra.mxu1 %v2283_v45  ;;  %v2686_v34 = vld [vmem:[#allocation6 + $0x158] sm:$0xff]  ;;  %v2713_v45 = vld [vmem:[#allocation6 + $0x130] sm:$0xff] }
 0x444   :  { %972 = vmatprep.subr.mxu0 %v2246_v35  ;;  %1819 = vmatprep.subr.mxu1 %v2949_v0  ;;  %v2690_v35 = vld [vmem:[#allocation6 + $0x150] sm:$0xff] }
 0x445   :  { %973 = vmatpush1.msra.mxu0 %v2252_v37  ;;  %1820 = vmatpush3.msra.mxu1 %v2288_v46  ;;  %v2696_v37 = vld [vmem:[#allocation6 + $0x140] sm:$0xff]  ;;  %v2716_v46 = vld [vmem:[#allocation6 + $0x110] sm:$0xff] }
 0x446   :  { %974 = vmatprep.subr.mxu0 %v2256_v38  ;;  %1821 = vmatprep.subr.mxu1 %v2949_v0  ;;  %v2700_v38 = vld [vmem:[#allocation6 + $0x138] sm:$0xff] }
 0x447   :  { %975 = vmatpush1.msra.mxu0 %v2962_v2  ;;  %1822 = vmatpush3.msra.mxu1 %v2963_v3  ;;  %v2786_v2 = vld [vmem:[#allocation6 + $0x68] sm:$0xff]  ;;  %v2790_v3 = vld [vmem:[#allocation6 + $0x60] sm:$0xff] }
 0x448   :  { %976 = vmatprep.subr.mxu0 %v2964_v4  ;;  %1823 = vmatprep.subr.mxu1 %v2949_v0  ;;  %v2793_v4 = vld [vmem:[#allocation6 + $0x70] sm:$0xff] }
 0x449   :  { %977 = vmatpush1.msra.mxu0 %v2965_v5  ;;  %1010 = vmatprep.mubr.f32.mxu0 %v2949_v0  ;;  %v2796_v5 = vld [vmem:[#allocation6 + $0x50] sm:$0xff] }
 0x44a   :  { %1824 = vmatpush3.msra.mxu1 %v2966_v6  ;;  %1825 = vmatprep.mubr.msk.f32.mxu1 %vm2107_vm0, %v2949_v0  ;;  %v2800_v6 = vld [vmem:[#allocation6 + $0x48] sm:$0xff] }
 0x44b   :  { %1114 = vmatprep.subr.mxu0 %v2669_v7  ;;  %1828 = vmatprep.subr.mxu1 %v2949_v0 }
 0x4ea   :  { %v844_v9 = vpop.f32.mrf.mxu0  ;;  %v915_v10 = vpop.f32.mrf.mxu1 }
 0x4eb   :  { %v919_v11 = vadd.f32 %v844_v9, %v775_v8  ;;  %v933_v21 = vadd.f32 %v2374_v61, %v915_v10  ;;  %v2803_v8 = vld [vmem:[#allocation6 + $0x58] sm:$0xff]  ;;  %v2810_v10 = vld [vmem:[#allocation6 + $0x30] sm:$0xff] }
 0x4ec   :  { %v1792_v12 = vpop.f32.mrf.mxu1  ;;  %v846_v15 = vpop.f32.mrf.mxu0  ;;  %v2806_v9 = vld [vmem:[#allocation6 + $0x38] sm:$0xff] }
 0x4ed   :  { %v1474_v13 = vmul.f32 -1.442695, %v919_v11  ;;  %v926_v16 = vadd.f32 %v846_v15, %v776_v14  ;;  %v2813_v11 = vld [vmem:[#allocation6 + $0x40] sm:$0xff]  ;;  %v2823_v14 = vld [vmem:[#allocation6 + $0x28] sm:$0xff] }
 0x4ee   :  { %v2816_v12 = vld [vmem:[#allocation6 + $0x20] sm:$0xff]  ;;  %2968 = vst [vmem:[#allocation13_spill] sm:$0xff] %v2823_v14  ;;  %v2826_v15 = vld [vmem:[#allocation6 + $0x8] sm:$0xff] }
 0x4ef   :  { %1947 = vpow2.f32 %v1474_v13  ;;  %v1475_v17 = vmul.f32 -1.442695, %v926_v16  ;;  %v2820_v13 = vld [vmem:[#allocation6 + $0x18] sm:$0xff]  ;;  %2969 = vst [vmem:[#allocation16_spill] sm:$0xff] %v2826_v15  ;;  %v2830_v16 = vld [vmem:[#allocation6] sm:$0xff] }
 0x4f0   :  { %2967 = vst [vmem:[#allocation12_spill] sm:$0xff] %v2820_v13  ;;  %2970 = vst [vmem:[#allocation14_spill] sm:$0xff] %v2830_v16 }
 0x4f1   :  { %1949 = vpow2.f32 %v1475_v17  ;;  %v2834_v17 = vld [vmem:[#allocation6 + $0x10] sm:$0xff] }
 0x4f2   :  { %2971 = vst [vmem:[#allocation15_spill] sm:$0xff] %v2834_v17 }
 0x4fc   :  { %v1948_v18 = vpop.eup %1947 }
 0x4fd   :  { %v923_v19 = vadd.f32 1.0, %v1948_v18  ;;  %v943_v18 = vld [vmem:[#allocation3 + $0x78] sm:$0xff] }
 0x4fe   :  { %v1950_v20 = vpop.eup %1949 }
 0x4ff   :  { %1951 = vrcp.f32 %v923_v19  ;;  %v930_v26 = vadd.f32 1.0, %v1950_v20 }
 0x50c   :  { %v1952_v22 = vpop.eup %1951 }
 0x50d   :  { %v934_v24 = vmul.f32 %v1952_v22, %v933_v21 }
 0x50f   :  { %v935_v25 = vadd.f32 %v934_v24, %v777_v23  ;;  %v944_v24 = vld [vmem:[#allocation3 + $0x80] sm:$0xff] }
 0x511   :  { %1953 = vtanh.f32 %v935_v25 }
 0x512   :  { %1955 = vrcp.f32 %v930_v26 }
 0x51e   :  { %v1954_v27 = vpop.eup %1953 }
 0x51f   :  { %v937_v28 = vsub.f32 %v2599_v55, %v1954_v27  ;;  %v1956_v29 = vpop.eup %1955  ;;  %v2783_v55 = vld [vmem:[#allocation6 + $0x88] sm:$0xff] }
 0x521   :  { %v938_v30 = vmul.f32 %v1956_v29, %v937_v28 }
 0x523   :  { %v2675_v31 = vadd.f32 %v1954_v27, %v938_v30 }
 0x525   :  { %941 = vst [vmem:[#allocation8 + $0x20] sm:$0xff] %v2675_v31  ;;  %1011 = vmatmul.mubr.f32.vlgmr.msra.gmra.mxu0 %v2675_v31  ;;  %1826 = vmatmul.mubr.f32.vlgmr.msra.gmra.mxu1 %v2675_v31 }
 0x526   :  { %1115 = vmatpush1.msra.mxu0 %v2680_v32  ;;  %1829 = vmatpush3.msra.mxu1 %v2683_v33 }
 0x527   :  { %1116 = vmatprep.subr.mxu0 %v2686_v34  ;;  %1830 = vmatprep.subr.mxu1 %v2949_v0 }
 0x528   :  { %1117 = vmatpush1.msra.mxu0 %v2690_v35  ;;  %1831 = vmatpush3.msra.mxu1 %v2693_v36 }
 0x529   :  { %1118 = vmatprep.subr.mxu0 %v2696_v37  ;;  %1832 = vmatprep.subr.mxu1 %v2949_v0 }
 0x52a   :  { %1119 = vmatpush1.msra.mxu0 %v2700_v38  ;;  %1833 = vmatpush3.msra.mxu1 %v2703_v39 }
 0x52b   :  { %1120 = vmatprep.subr.mxu0 %v2706_v42  ;;  %1834 = vmatprep.subr.mxu1 %v2949_v0 }
 0x52c   :  { %1121 = vmatpush1.msra.mxu0 %v2710_v44  ;;  %1835 = vmatpush3.msra.mxu1 %v2713_v45 }
 0x52d   :  { %1122 = vmatprep.subr.mxu0 %v2716_v46  ;;  %1836 = vmatprep.subr.mxu1 %v2949_v0 }
 0x52e   :  { %1123 = vmatpush1.msra.mxu0 %v2720_v53  ;;  %1837 = vmatpush3.msra.mxu1 %v2723_v49 }
 0x52f   :  { %1124 = vmatprep.subr.mxu0 %v2726_v1  ;;  %1838 = vmatprep.subr.mxu1 %v2949_v0 }
 0x530   :  { %1125 = vmatpush1.msra.mxu0 %v2730_v40  ;;  %1839 = vmatpush3.msra.mxu1 %v2733_v41 }
 0x531   :  { %1126 = vmatprep.subr.mxu0 %v2736_v43  ;;  %1840 = vmatprep.subr.mxu1 %v2949_v0 }
 0x532   :  { %1127 = vmatpush1.msra.mxu0 %v2740_v54  ;;  %1841 = vmatpush3.msra.mxu1 %v2743_v59 }
 0x533   :  { %1128 = vmatprep.subr.mxu0 %v2746_v62  ;;  %1842 = vmatprep.subr.mxu1 %v2949_v0 }
 0x534   :  { %1129 = vmatpush1.msra.mxu0 %v2750_v63  ;;  %1843 = vmatpush3.msra.mxu1 %v2753_v58 }
 0x535   :  { %1130 = vmatprep.subr.mxu0 %v2756_v60  ;;  %1844 = vmatprep.subr.mxu1 %v2949_v0 }
 0x536   :  { %1131 = vmatpush1.msra.mxu0 %v2760_v51  ;;  %1845 = vmatpush3.msra.mxu1 %v2763_v52 }
 0x537   :  { %1132 = vmatprep.subr.mxu0 %v2766_v47  ;;  %1846 = vmatprep.subr.mxu1 %v2949_v0 }
 0x538   :  { %1133 = vmatpush1.msra.mxu0 %v2770_v48  ;;  %1847 = vmatpush3.msra.mxu1 %v2773_v50 }
 0x539   :  { %1134 = vmatprep.subr.mxu0 %v2776_v56  ;;  %1848 = vmatprep.subr.mxu1 %v2949_v0 }
 0x53a   :  { %1135 = vmatpush1.msra.mxu0 %v2780_v57  ;;  %1849 = vmatpush3.msra.mxu1 %v2783_v55 }
 0x53b   :  { %1136 = vmatprep.subr.mxu0 %v2786_v2  ;;  %1850 = vmatprep.subr.mxu1 %v2949_v0 }
 0x53c   :  { %1137 = vmatpush1.msra.mxu0 %v2790_v3  ;;  %1851 = vmatpush3.msra.mxu1 %v2793_v4 }
 0x53d   :  { %1138 = vmatprep.subr.mxu0 %v2796_v5  ;;  %1852 = vmatprep.subr.mxu1 %v2949_v0 }
 0x53e   :  { %1139 = vmatpush1.msra.mxu0 %v2800_v6  ;;  %1853 = vmatpush3.msra.mxu1 %v2803_v8 }
 0x53f   :  { %1140 = vmatprep.subr.mxu0 %v2806_v9  ;;  %1854 = vmatprep.subr.mxu1 %v2949_v0 }
 0x540   :  { %1141 = vmatpush1.msra.mxu0 %v2810_v10  ;;  %1855 = vmatpush3.msra.mxu1 %v2813_v11 }
 0x541   :  { %1142 = vmatprep.subr.mxu0 %v2816_v12  ;;  %1856 = vmatprep.subr.mxu1 %v2949_v0 }
 0x542   :  { %1143 = vmatpush1.msra.mxu0 %v2820_v13  ;;  %1857 = vmatpush3.msra.mxu1 %v2823_v14 }
 0x543   :  { %1144 = vmatprep.subr.mxu0 %v2826_v15  ;;  %1858 = vmatprep.subr.mxu1 %v2949_v0 }
 0x544   :  { %1145 = vmatpush1.msra.mxu0 %v2830_v16  ;;  %1178 = vmatprep.mubr.f32.mxu0 %v2949_v0  ;;  %v945_v16 = vld [vmem:[#allocation3 + $0x88] sm:$0xff] }
 0x545   :  { %1859 = vmatpush3.msra.mxu1 %v2834_v17  ;;  %1860 = vmatprep.mubr.msk.f32.mxu1 %vm2107_vm0, %v2949_v0 }
 0x546   :  { %1282 = vmatprep.subr.mxu0 %v2669_v7  ;;  %1863 = vmatprep.subr.mxu1 %v2949_v0 }
 0x5e5   :  { %v1012_v19 = vpop.f32.mrf.mxu0  ;;  %v1083_v20 = vpop.f32.mrf.mxu1 }
 0x5e6   :  { %v1087_v21 = vadd.f32 %v1012_v19, %v943_v18  ;;  %v1101_v7 = vadd.f32 %v2374_v61, %v1083_v20  ;;  %v2972_v61 = vld [vmem:[#allocation12_spill] sm:$0xff] }
 0x5e7   :  { %v1827_v22 = vpop.f32.mrf.mxu1  ;;  %v1014_v25 = vpop.f32.mrf.mxu0 }
 0x5e8   :  { %v1476_v23 = vmul.f32 -1.442695, %v1087_v21  ;;  %v1094_v26 = vadd.f32 %v1014_v25, %v944_v24 }
 0x5ea   :  { %1957 = vpow2.f32 %v1476_v23  ;;  %v1477_v27 = vmul.f32 -1.442695, %v1094_v26 }
 0x5ec   :  { %1959 = vpow2.f32 %v1477_v27 }
 0x5f7   :  { %v1958_v28 = vpop.eup %1957 }
 0x5f8   :  { %v1091_v29 = vadd.f32 1.0, %v1958_v28 }
 0x5f9   :  { %v1960_v30 = vpop.eup %1959 }
 0x5fa   :  { %1961 = vrcp.f32 %v1091_v29  ;;  %v1098_v13 = vadd.f32 1.0, %v1960_v30 }
 0x607   :  { %v1962_v17 = vpop.eup %1961 }
 0x608   :  { %v1102_v15 = vmul.f32 %v1962_v17, %v1101_v7 }
 0x60a   :  { %v1103_v14 = vadd.f32 %v1102_v15, %v945_v16 }
 0x60c   :  { %1963 = vtanh.f32 %v1103_v14 }
 0x60d   :  { %1965 = vrcp.f32 %v1098_v13  ;;  %v1281_v13 = vld [vmem:[#allocation3 + $0xb8] sm:$0xff] }
 0x619   :  { %v1964_v18 = vpop.eup %1963 }
 0x61a   :  { %v1105_v19 = vsub.f32 %v2675_v31, %v1964_v18  ;;  %v1966_v21 = vpop.eup %1965  ;;  %v2973_v31 = vld [vmem:[#allocation13_spill] sm:$0xff] }
 0x61c   :  { %v1106_v22 = vmul.f32 %v1966_v21, %v1105_v19 }
 0x61e   :  { %v2843_v23 = vadd.f32 %v1964_v18, %v1106_v22 }
 0x620   :  { %1109 = vst [vmem:[#allocation8 + $0x28] sm:$0xff] %v2843_v23  ;;  %1179 = vmatmul.mubr.f32.vlgmr.msra.gmra.mxu0 %v2843_v23  ;;  %1861 = vmatmul.mubr.f32.vlgmr.msra.gmra.mxu1 %v2843_v23 }
 0x621   :  { %1283 = vmatpush1.msra.mxu0 %v2680_v32  ;;  %1864 = vmatpush3.msra.mxu1 %v2683_v33  ;;  %v2974_v32 = vld [vmem:[#allocation16_spill] sm:$0xff]  ;;  %v2975_v33 = vld [vmem:[#allocation14_spill] sm:$0xff] }
 0x622   :  { %1284 = vmatprep.subr.mxu0 %v2686_v34  ;;  %1865 = vmatprep.subr.mxu1 %v2949_v0  ;;  %v2976_v34 = vld [vmem:[#allocation15_spill] sm:$0xff] }
 0x623   :  { %1285 = vmatpush1.msra.mxu0 %v2690_v35  ;;  %1866 = vmatpush3.msra.mxu1 %v2693_v36  ;;  %v1111_v35 = vld [vmem:[#allocation3 + $0x90] sm:$0xff] }
 0x624   :  { %1286 = vmatprep.subr.mxu0 %v2696_v37  ;;  %1867 = vmatprep.subr.mxu1 %v2949_v0 }
 0x625   :  { %1287 = vmatpush1.msra.mxu0 %v2700_v38  ;;  %1868 = vmatpush3.msra.mxu1 %v2703_v39 }
 0x626   :  { %1288 = vmatprep.subr.mxu0 %v2706_v42  ;;  %1869 = vmatprep.subr.mxu1 %v2949_v0 }
 0x627   :  { %1289 = vmatpush1.msra.mxu0 %v2710_v44  ;;  %1870 = vmatpush3.msra.mxu1 %v2713_v45  ;;  %v1112_v44 = vld [vmem:[#allocation3 + $0x98] sm:$0xff] }
 0x628   :  { %1290 = vmatprep.subr.mxu0 %v2716_v46  ;;  %1871 = vmatprep.subr.mxu1 %v2949_v0 }
 0x629   :  { %1291 = vmatpush1.msra.mxu0 %v2720_v53  ;;  %1872 = vmatpush3.msra.mxu1 %v2723_v49 }
 0x62a   :  { %1292 = vmatprep.subr.mxu0 %v2726_v1  ;;  %1873 = vmatprep.subr.mxu1 %v2949_v0 }
 0x62b   :  { %1293 = vmatpush1.msra.mxu0 %v2730_v40  ;;  %1874 = vmatpush3.msra.mxu1 %v2733_v41 }
 0x62c   :  { %1294 = vmatprep.subr.mxu0 %v2736_v43  ;;  %1875 = vmatprep.subr.mxu1 %v2949_v0 }
 0x62d   :  { %1295 = vmatpush1.msra.mxu0 %v2740_v54  ;;  %1876 = vmatpush3.msra.mxu1 %v2743_v59  ;;  %v1113_v54 = vld [vmem:[#allocation3 + $0xa0] sm:$0xff] }
 0x62e   :  { %1296 = vmatprep.subr.mxu0 %v2746_v62  ;;  %1877 = vmatprep.subr.mxu1 %v2949_v0 }
 0x62f   :  { %1297 = vmatpush1.msra.mxu0 %v2750_v63  ;;  %1878 = vmatpush3.msra.mxu1 %v2753_v58 }
 0x630   :  { %1298 = vmatprep.subr.mxu0 %v2756_v60  ;;  %1879 = vmatprep.subr.mxu1 %v2949_v0 }
 0x631   :  { %1299 = vmatpush1.msra.mxu0 %v2760_v51  ;;  %1880 = vmatpush3.msra.mxu1 %v2763_v52 }
 0x632   :  { %1300 = vmatprep.subr.mxu0 %v2766_v47  ;;  %1881 = vmatprep.subr.mxu1 %v2949_v0 }
 0x633   :  { %1301 = vmatpush1.msra.mxu0 %v2770_v48  ;;  %1882 = vmatpush3.msra.mxu1 %v2773_v50  ;;  %v1279_v48 = vld [vmem:[#allocation3 + $0xa8] sm:$0xff] }
 0x634   :  { %1302 = vmatprep.subr.mxu0 %v2776_v56  ;;  %1883 = vmatprep.subr.mxu1 %v2949_v0 }
 0x635   :  { %1303 = vmatpush1.msra.mxu0 %v2780_v57  ;;  %1884 = vmatpush3.msra.mxu1 %v2783_v55 }
 0x636   :  { %1304 = vmatprep.subr.mxu0 %v2786_v2  ;;  %1885 = vmatprep.subr.mxu1 %v2949_v0 }
 0x637   :  { %1305 = vmatpush1.msra.mxu0 %v2790_v3  ;;  %1886 = vmatpush3.msra.mxu1 %v2793_v4  ;;  %v1280_v3 = vld [vmem:[#allocation3 + $0xb0] sm:$0xff] }
 0x638   :  { %1306 = vmatprep.subr.mxu0 %v2796_v5  ;;  %1887 = vmatprep.subr.mxu1 %v2949_v0 }
 0x639   :  { %1307 = vmatpush1.msra.mxu0 %v2800_v6  ;;  %1888 = vmatpush3.msra.mxu1 %v2803_v8 }
 0x63a   :  { %1308 = vmatprep.subr.mxu0 %v2806_v9  ;;  %1889 = vmatprep.subr.mxu1 %v2949_v0 }
 0x63b   :  { %1309 = vmatpush1.msra.mxu0 %v2810_v10  ;;  %1890 = vmatpush3.msra.mxu1 %v2813_v11 }
 0x63c   :  { %1310 = vmatprep.subr.mxu0 %v2816_v12  ;;  %1891 = vmatprep.subr.mxu1 %v2949_v0 }
 0x63d   :  { %1311 = vmatpush1.msra.mxu0 %v2972_v61  ;;  %1892 = vmatpush3.msra.mxu1 %v2973_v31 }
 0x63e   :  { %1312 = vmatprep.subr.mxu0 %v2974_v32  ;;  %1893 = vmatprep.subr.mxu1 %v2949_v0 }
 0x63f   :  { %1313 = vmatpush1.msra.mxu0 %v2975_v33  ;;  %1346 = vmatprep.mubr.f32.mxu0 %v2949_v0 }
 0x640   :  { %1894 = vmatpush3.msra.mxu1 %v2976_v34  ;;  %1895 = vmatprep.mubr.msk.f32.mxu1 %vm2107_vm0, %v2949_v0  ;;  %v2035_v0 = vld [vmem:[%s2922_s2] ss:$0 sm:$0xff]  ;;  %s2108_s2 = smov [#allocation8]  }
 0x641   :  { %s1452_s26 = sshll.u32 %s2108_s2, 4  ;;  %s1453_s26 = int_to_ptr.vmem [resolvable:$true] %s1452_s26 }
 0x642   :  { %s2076_s27 = scalar_lea.vmem %s1453_s26, 1024  ;;  %p2081_p11 = scmp.lt.s32.totalorder %s1453_s26, %s1453_s26 }
 0x643   :  { %p2077_p10 = scmp.ne.s32.totalorder %s1453_s26, %s2076_s27  ;;  %p2082_p12 = scmp.lt.s32.totalorder %s2076_s27, %s2076_s27 }
 0x645   :  { %p2083_p13 = por %p2082_p12, %p2081_p11 }
 0x647   :  { %p2084_p0 = pnand %p2083_p13, %p2077_p10 }
 0x6e0   :  { %v1180_v36 = vpop.f32.mrf.mxu0  ;;  %v1251_v37 = vpop.f32.mrf.mxu1 }
 0x6e1   :  { %v1255_v38 = vadd.f32 %v1180_v36, %v1111_v35  ;;  %v1269_v41 = vadd.f32 %v2035_v0, %v1251_v37 }
 0x6e2   :  { %v1862_v39 = vpop.f32.mrf.mxu1  ;;  %v1182_v45 = vpop.f32.mrf.mxu0 }
 0x6e3   :  { %v1478_v42 = vmul.f32 -1.442695, %v1255_v38  ;;  %v1262_v46 = vadd.f32 %v1182_v45, %v1112_v44 }
 0x6e5   :  { %1967 = vpow2.f32 %v1478_v42  ;;  %v1479_v53 = vmul.f32 -1.442695, %v1262_v46 }
 0x6e7   :  { %1969 = vpow2.f32 %v1479_v53 }
 0x6f2   :  { %v1968_v49 = vpop.eup %1967 }
 0x6f3   :  { %v1259_v1 = vadd.f32 1.0, %v1968_v49 }
 0x6f4   :  { %v1970_v40 = vpop.eup %1969 }
 0x6f5   :  { %1971 = vrcp.f32 %v1259_v1  ;;  %v1266_v63 = vadd.f32 1.0, %v1970_v40 }
 0x702   :  { %v1972_v43 = vpop.eup %1971 }
 0x703   :  { %v1270_v59 = vmul.f32 %v1972_v43, %v1269_v41 }
 0x705   :  { %v1271_v62 = vadd.f32 %v1270_v59, %v1113_v54 }
 0x707   :  { %1973 = vtanh.f32 %v1271_v62 }
 0x708   :  { %1975 = vrcp.f32 %v1266_v63 }
 0x714   :  { %v1974_v58 = vpop.eup %1973 }
 0x715   :  { %v1273_v60 = vsub.f32 %v2843_v23, %v1974_v58  ;;  %v1976_v51 = vpop.eup %1975 }
 0x717   :  { %v1274_v52 = vmul.f32 %v1976_v51, %v1273_v60 }
 0x719   :  { %v1275_v47 = vadd.f32 %v1974_v58, %v1274_v52 }
 0x71b   :  { %1277 = vst [vmem:[#allocation8 + $0x30] sm:$0xff] %v1275_v47  ;;  %1347 = vmatmul.mubr.f32.vlgmr.msra.gmra.mxu0 %v1275_v47  ;;  %1896 = vmatmul.mubr.f32.vlgmr.msra.gmra.mxu1 %v1275_v47 }
 0x7db   :  { %v1348_v50 = vpop.f32.mrf.mxu0  ;;  %v1419_v56 = vpop.f32.mrf.mxu1 }
 0x7dc   :  { %v1423_v57 = vadd.f32 %v1348_v50, %v1279_v48  ;;  %v1437_v11 = vadd.f32 %v2035_v0, %v1419_v56 }
 0x7dd   :  { %v1897_v55 = vpop.f32.mrf.mxu1  ;;  %v1350_v4 = vpop.f32.mrf.mxu0 }
 0x7de   :  { %v1480_v2 = vmul.f32 -1.442695, %v1423_v57  ;;  %v1430_v5 = vadd.f32 %v1350_v4, %v1280_v3 }
 0x7e0   :  { %1977 = vpow2.f32 %v1480_v2  ;;  %v1481_v6 = vmul.f32 -1.442695, %v1430_v5 }
 0x7e2   :  { %1979 = vpow2.f32 %v1481_v6 }
 0x7ed   :  { %v1978_v8 = vpop.eup %1977 }
 0x7ee   :  { %v1427_v9 = vadd.f32 1.0, %v1978_v8 }
 0x7ef   :  { %v1980_v10 = vpop.eup %1979 }
 0x7f0   :  { %1981 = vrcp.f32 %v1427_v9  ;;  %v1434_v16 = vadd.f32 1.0, %v1980_v10 }
 0x7fd   :  { %v1982_v12 = vpop.eup %1981 }
 0x7fe   :  { %v1438_v14 = vmul.f32 %v1982_v12, %v1437_v11 }
 0x800   :  { %v1439_v15 = vadd.f32 %v1438_v14, %v1281_v13 }
 0x802   :  { %1983 = vtanh.f32 %v1439_v15 }
 0x803   :  { %1985 = vrcp.f32 %v1434_v16 }
 0x80f   :  { %v1984_v17 = vpop.eup %1983 }
 0x810   :  { %v1441_v20 = vsub.f32 %v1275_v47, %v1984_v17  ;;  %v1986_v24 = vpop.eup %1985 }
 0x812   :  { %v1442_v25 = vmul.f32 %v1986_v24, %v1441_v20 }
 0x814   :  { %v1443_v26 = vadd.f32 %v1984_v17, %v1442_v25 }
 0x816   :  { %1445 = vst [vmem:[#allocation8 + $0x38] sm:$0xff] %v1443_v26 }
 0x817   :  { %2087 = shalt.err (!%p2084_p0)
}
 0x818   :  { %s2109_s28 = smov 128   ;;  %s2110_s29 = smov 8  }
 0x819   :  { %1458 = dma.vmem_to_hbm [thread:$0]  %s1453_s26, 1024, %s2923_s3, [#allocation5], %s2109_s28, %s2109_s28, %s2110_s29  }
 0x81a   :  { %2100 = dma.done.wait [#allocation5], 1024  }
 0x81b   :  { %2101 = vsyncadd [#allocation5], 4294966272 }
 0x81c   :  { %1462 = vsyncpa [#allocation4], 1 }
 0x81d   :  { %1463 = vsyncpa [#allocation7], 1 }
 0x81e   :  { %1464 = vsyncpa [#allocation5], 1 }

</bundles_post_ra>
